<compile_context>
chip_gen: v7x
topology: tpu7x:2x2x1
jax: 0.10.0
libtpu: 0.0.40
codegen_flags: <defaults>
</compile_context>

<pallas_src>
import numpy as np
import jax
import jax.numpy as jnp
from jax import lax
from jax.experimental import pallas as pl
from jax.experimental.pallas import tpu as pltpu


# ----------------------------- parameter setup ------------------------------

def _spectral_normalize(w2d, key, n_iter=30):
    """Return w2d / sigma_max(w2d), sigma estimated by power iteration."""
    u = jax.random.normal(key, (w2d.shape[0],), jnp.float32)
    u = u / (jnp.linalg.norm(u) + 1e-12)
    v = jnp.zeros((w2d.shape[1],), jnp.float32)
    for _ in range(n_iter):
        v = w2d.T @ u
        v = v / (jnp.linalg.norm(v) + 1e-12)
        u = w2d @ v
        u = u / (jnp.linalg.norm(u) + 1e-12)
    sigma = u @ (w2d @ v)
    return w2d / sigma


def _init_conv(key, cout, cin, k=3):
    kw, kb, ku = jax.random.split(key, 3)
    fan_in = cin * k * k
    bound = 1.0 / (fan_in ** 0.5)
    w = jax.random.uniform(kw, (cout, cin, k, k), jnp.float32, -bound, bound)
    b = jax.random.uniform(kb, (cout,), jnp.float32, -bound, bound)
    w = _spectral_normalize(w.reshape(cout, -1), ku).reshape(cout, cin, k, k)
    return w, b


def _init_linear(key, out_f, in_f):
    kw, kb, ku = jax.random.split(key, 3)
    bound = 1.0 / (in_f ** 0.5)
    w = jax.random.uniform(kw, (out_f, in_f), jnp.float32, -bound, bound)
    b = jax.random.uniform(kb, (out_f,), jnp.float32, -bound, bound)
    w = _spectral_normalize(w, ku)
    return w, b


def init_params(key, in_ch, out_dim):
    k1, k2, k3, k4 = jax.random.split(key, 4)
    c1, c2, c3 = 2 * in_ch, 4 * in_ch, 8 * in_ch
    w1, b1 = _init_conv(k1, c1, in_ch)
    w2, b2 = _init_conv(k2, c2, c1)
    w3, b3 = _init_conv(k3, c3, c2)
    fw, fb = _init_linear(k4, out_dim, c3 * 2 * 2)
    return dict(w1=w1, b1=b1, w2=w2, b2=b2, w3=w3, b3=b3, fw=fw, fb=fb)


# ------------------------------- Pallas kernel ------------------------------

def _make_kernel(W0, L1, L2, L3, B_tile, inv_pool):
    shifts = [dy * W0 + dx for dy in range(3) for dx in range(3)]

    def leaky(v):
        return jnp.where(v > 0, v, 0.2 * v)

    def kernel(x_ref, w1_ref, b1_ref, w2_ref, b2_ref, w3_ref, b3_ref,
               sel_ref, fw_ref, fb_ref, o_ref):

        def conv3x3(a_bf, w_ref, b_ref, out_len):
            # a_bf is already bf16: the 9 lane-shifted im2col views are sliced
            # from the bf16 slab (single upfront cast, half the load traffic)
            # and stacked on the sublane axis -> ONE MXU matmul with K = 9*Cin.
            stacked = jnp.concatenate(
                [a_bf[:, s:s + out_len] for s in shifts], axis=0)
            acc = jnp.dot(w_ref[...], stacked,
                          preferred_element_type=jnp.float32)
            # bias + LeakyReLU in f32 (v5e has no bf16 VALU), then ONE cast so
            # the next conv / the pooling matmul read a bf16 operand directly.
            return leaky(acc + b_ref[...]).astype(jnp.bfloat16)

        a0 = x_ref[0]                                    # (Cin, L0) bf16
        a1 = conv3x3(a0, w1_ref, b1_ref, L1)             # (C1,  L1) bf16
        a2 = conv3x3(a1, w2_ref, b2_ref, L2)             # (C2,  L2) bf16
        a3 = conv3x3(a2, w3_ref, b3_ref, L3)             # (C3,  L3) bf16

        # 2x2 adaptive average pool: one bf16 MXU matmul against a 0/1 window
        # selector; the exact 1/(ph*pw) scale is applied on the f32 result.
        pooled = jnp.dot(a3, sel_ref[...],
                         preferred_element_type=jnp.float32) * inv_pool
        # pooled: (C3, 4*B_tile), column index w*B_tile + b, w = 2*i + j.

        # Regroup to (4*C3, B_tile) with row index w*C3 + c, then one bf16
        # A^T @ B dot contracting all 4*C3 features at once -> lane-dense
        # (B_tile, out_dim_pad) output block.
        pooled_stack = jnp.concatenate(
            [pooled[:, w * B_tile:(w + 1) * B_tile] for w in range(4)],
            axis=0).astype(jnp.bfloat16)

        out = lax.dot_general(pooled_stack, fw_ref[...],
                              (((0,), (0,)), ((), ())),
                              preferred_element_type=jnp.float32)
        o_ref[0] = leaky(out + fb_ref[...])              # f32, lane-dense store

    return kernel


def _round_up(x, m):
    return ((x + m - 1) // m) * m


def minamo_vision_forward(x, params, *, out_dim):
    """x: (N, Cin, H, W) float32 (NCHW, same as PyTorch). Returns (N, out_dim)."""
    N, Cin, H, W = x.shape
    C1, C2, C3 = 2 * Cin, 4 * Cin, 8 * Cin
    H3, W3 = H - 6, W - 6
    assert H3 >= 2 and W3 >= 2, "input too small for three valid 3x3 convs"
    assert H3 % 2 == 0 and W3 % 2 == 0, "pre-pool map must be even for 2x2 pool"
    ph, pw = H3 // 2, W3 // 2

    P = H * W                       # per-image lane stride (row-major y*W + x)
    margin = 2 * W + 2              # max tap shift dy*W + dx
    out_dim_pad = _round_up(out_dim, 128)   # lane-dense output stores

    # ---- per-tile lane budget derived from VMEM capacity ---------------------
    try:
        vmem_cap = int(getattr(pltpu.get_tpu_info(), "vmem_capacity_bytes",
                               64 << 20))
    except Exception:
        vmem_cap = 64 << 20
    # v5e/v6e: 128 MiB physical VMEM -> bigger tiles amortize per-step overhead;
    # v7x: 64 MiB -> keep the activation working set (im2col slabs) smaller.
    lane_budget = 8192 if vmem_cap >= (100 << 20) else 4096
    B_tile = max(1, min(N, lane_budget // P))     # always respects the budget
    # v7x: prefer >= 2 grid tiles (one per TensorCore, pipelined I/O) once the
    # batch is large enough to split without padding overhead.
    if B_tile == N and N >= 16:
        B_tile = -(-N // 2)
    G = -(-N // B_tile)
    N_pad = G * B_tile

    L3 = B_tile * P                          # conv3 output lane length
    L2 = _round_up(L3 + margin, 128)         # conv2 output lane length
    L1 = _round_up(L2 + margin, 128)         # conv1 output lane length
    L0 = _round_up(L1 + margin, 128)         # padded input lane length / tile

    # ---- input layout: (G, Cin, L0) bf16; image b of tile g at [b*P, b*P+P) ----
    xf = x.astype(jnp.float32).reshape(N, Cin, P)
    if N_pad > N:
        xf = jnp.pad(xf, ((0, N_pad - N), (0, 0), (0, 0)))
    xf = xf.reshape(G, B_tile, Cin, P).transpose(0, 2, 1, 3)
    xf = xf.reshape(G, Cin, B_tile * P)
    x_host = jnp.pad(xf, ((0, 0), (0, 0), (0, L0 - B_tile * P))).astype(jnp.bfloat16)

    # ---- conv weights: (Cout, 9*Cin) tap-major ((dy*3+dx)*Cin + ci), bf16 ----
    def conv_w(w):
        co, ci = w.shape[0], w.shape[1]
        return jnp.transpose(w, (0, 2, 3, 1)).reshape(co, 9 * ci).astype(jnp.bfloat16)

    w1k, b1k = conv_w(params["w1"]), params["b1"].reshape(C1, 1).astype(jnp.float32)
    w2k, b2k = conv_w(params["w2"]), params["b2"].reshape(C2, 1).astype(jnp.float32)
    w3k, b3k = conv_w(params["w3"]), params["b3"].reshape(C3, 1).astype(jnp.float32)

    # ---- pooling selector (trace-time constant): selT[q, w*B_tile + b] = 1 iff
    # lane q lies inside pool window w = 2*i + j of image b; garbage lanes stay
    # zero so they never contribute. 0/1 entries are exact in bf16. ----
    sel = np.zeros((L3, 4 * B_tile), np.float32)
    for b in range(B_tile):
        for i in range(2):
            for j in range(2):
                col = (2 * i + j) * B_tile + b
                for r in range(ph):
                    base = b * P + (ph * i + r) * W + pw * j
                    sel[base:base + pw, col] = 1.0
    selT = jnp.asarray(sel, dtype=jnp.bfloat16)

    # ---- FC: fwk[w*C3 + c, o] = fw[o, c*4 + w] (PyTorch flatten c*4 + i*2 + j),
    # padded to out_dim_pad lanes, bf16; bias stays f32. ----
    fwk = jnp.transpose(params["fw"].reshape(out_dim, C3, 4),
                        (2, 1, 0)).reshape(4 * C3, out_dim)
    fwk = jnp.pad(fwk, ((0, 0), (0, out_dim_pad - out_dim))).astype(jnp.bfloat16)
    fbk = jnp.pad(params["fb"], (0, out_dim_pad - out_dim)).reshape(1, out_dim_pad)
    fbk = fbk.astype(jnp.float32)

    kernel = _make_kernel(W, L1, L2, L3, B_tile, 1.0 / float(ph * pw))

    # ---- explicit scoped-VMEM budget sized from the actual live set ----------
    bf, f4 = 2, 4
    est = (2 * Cin * L0 * bf                                  # input (dbl-buffered)
           + (C1 * 9 * Cin + C2 * 9 * C1 + C3 * 9 * C2) * bf  # conv weights
           + (C1 + C2 + C3) * f4                              # biases
           + L3 * 4 * B_tile * bf                             # pool selector
           + 4 * C3 * out_dim_pad * bf + out_dim_pad * f4     # fc weight / bias
           + (C1 * L1 + C2 * L2 + C3 * L3) * bf               # bf16 activations
           + 9 * C2 * L2 * bf                                 # largest im2col slab
           + C3 * L3 * f4                                     # conv3 f32 accumulator
           + C3 * 4 * B_tile * f4                             # pooled (f32)
           + 2 * B_tile * out_dim_pad * f4)                   # fc out + out block
    vmem_limit = int(min(max(2 * est + (8 << 20), 32 << 20), 48 << 20))

    def run(single_buffer_invariants):
        def inv_spec(shape):
            # Grid-invariant operands (weights / biases / selector / FC): index
            # map is constant, so request a single VMEM buffer instead of the
            # default double buffering of constant data.
            if single_buffer_invariants:
                return pl.BlockSpec(shape, lambda g: (0,) * len(shape),
                                    pipeline_mode=pl.Buffered(1))
            return pl.BlockSpec(shape, lambda g: (0,) * len(shape))

        return pl.pallas_call(
            kernel,
            out_shape=jax.ShapeDtypeStruct((G, B_tile, out_dim_pad), jnp.float32),
            grid=(G,),
            in_specs=[
                pl.BlockSpec((1, Cin, L0), lambda g: (g, 0, 0)),
                inv_spec((C1, 9 * Cin)), inv_spec((C1, 1)),
                inv_spec((C2, 9 * C1)), inv_spec((C2, 1)),
                inv_spec((C3, 9 * C2)), inv_spec((C3, 1)),
                inv_spec((L3, 4 * B_tile)),
                inv_spec((4 * C3, out_dim_pad)), inv_spec((1, out_dim_pad)),
            ],
            out_specs=pl.BlockSpec((1, B_tile, out_dim_pad), lambda g: (g, 0, 0)),
            compiler_params=pltpu.CompilerParams(
                dimension_semantics=("parallel",),   # batch tiles independent
                vmem_limit_bytes=vmem_limit),
        )(x_host, w1k, b1k, w2k, b2k, w3k, b3k, selT, fwk, fbk)

    try:
        out = jax.block_until_ready(run(True))
    except Exception:
        # pl.Buffered(1) not supported by this jax/libtpu combo -> fall back to
        # default double-buffered constants (identical results, slightly more VMEM).
        out = jax.block_until_ready(run(False))

    return out.reshape(N_pad, out_dim_pad)[:N, :out_dim]


# ------------------------------ pure-JAX reference ---------------------------

def reference_forward(x, params, out_dim):
    def leaky(v):
        return jnp.where(v > 0, v, 0.2 * v)

    def conv(h, w, b):
        y = lax.conv_general_dilated(
            h, w, (1, 1), "VALID",
            dimension_numbers=("NCHW", "OIHW", "NCHW"),
            precision=lax.Precision.HIGHEST)
        return leaky(y + b[None, :, None, None])

    h = conv(x, params["w1"], params["b1"])
    h = conv(h, params["w2"], params["b2"])
    h = conv(h, params["w3"], params["b3"])
    N, C, H, W = h.shape
    h = h.reshape(N, C, 2, H // 2, 2, W // 2).mean(axis=(3, 5))
    h = h.reshape(N, -1)
    return leaky(h @ params["fw"].T + params["fb"][None, :])


# ------------------------------------ main -----------------------------------

if __name__ == "__main__":
    in_ch, out_dim = 8, 64          # small stand-in for (in_ch=32, out_dim=512)
    N, H, W = 2, 16, 16

    key = jax.random.PRNGKey(0)
    kx, kp = jax.random.split(key)
    x = jax.random.normal(kx, (N, in_ch, H, W), jnp.float32)
    params = init_params(kp, in_ch, out_dim)

    out = minamo_vision_forward(x, params, out_dim=out_dim)
    out = jax.block_until_ready(out)

    ref = reference_forward(x, params, out_dim)
    err = float(jnp.max(jnp.abs(out - ref)))
    scale = float(jnp.max(jnp.abs(ref))) + 1e-6
    assert out.shape == (N, out_dim), out.shape
    # All matmuls (convs, pool selector, FC) use bf16 operands with f32
    # accumulation; the reference is full f32, so allow a few percent.
    assert err / scale < 5e-2, f"mismatch vs reference: {err} (scale {scale})"

    print("KERNEL_OK")
</pallas_src>

<mosaic_0001>
module attributes {stable_mosaic.version = 11 : i64} {
  func.func @kernel(%arg0: i32, %arg1: memref<1x8x896xbf16, #tpu.memory_space<vmem>>, %arg2: memref<16x72xbf16, #tpu.memory_space<vmem>>, %arg3: memref<16x1xf32, #tpu.memory_space<vmem>>, %arg4: memref<32x144xbf16, #tpu.memory_space<vmem>>, %arg5: memref<32x1xf32, #tpu.memory_space<vmem>>, %arg6: memref<64x288xbf16, #tpu.memory_space<vmem>>, %arg7: memref<64x1xf32, #tpu.memory_space<vmem>>, %arg8: memref<512x8xbf16, #tpu.memory_space<vmem>>, %arg9: memref<256x128xbf16, #tpu.memory_space<vmem>>, %arg10: memref<1x128xf32, #tpu.memory_space<vmem>>, %arg11: memref<1x2x128xf32, #tpu.memory_space<vmem>>) attributes {dimension_semantics = [#tpu.dimension_semantics<parallel>], iteration_bounds = array<i64: 1>, scalar_prefetch = 0 : i64, scratch_operands = 0 : i64, tpu.core_type = #tpu.core_type<tc>, window_params = [{transform_indices = @transform_0, window_bounds = array<i64: 1, 8, 896>}, {pipeline_mode = #tpu.pipeline_mode<synchronous>, transform_indices = @transform_1, window_bounds = array<i64: 16, 72>}, {pipeline_mode = #tpu.pipeline_mode<synchronous>, transform_indices = @transform_2, window_bounds = array<i64: 16, 1>}, {pipeline_mode = #tpu.pipeline_mode<synchronous>, transform_indices = @transform_3, window_bounds = array<i64: 32, 144>}, {pipeline_mode = #tpu.pipeline_mode<synchronous>, transform_indices = @transform_4, window_bounds = array<i64: 32, 1>}, {pipeline_mode = #tpu.pipeline_mode<synchronous>, transform_indices = @transform_5, window_bounds = array<i64: 64, 288>}, {pipeline_mode = #tpu.pipeline_mode<synchronous>, transform_indices = @transform_6, window_bounds = array<i64: 64, 1>}, {pipeline_mode = #tpu.pipeline_mode<synchronous>, transform_indices = @transform_7, window_bounds = array<i64: 512, 8>}, {pipeline_mode = #tpu.pipeline_mode<synchronous>, transform_indices = @transform_8, window_bounds = array<i64: 256, 128>}, {pipeline_mode = #tpu.pipeline_mode<synchronous>, transform_indices = @transform_9, window_bounds = array<i64: 1, 128>}, {transform_indices = @transform_10, window_bounds = array<i64: 1, 2, 128>}]} {
    %c0 = arith.constant 0 : index
    %c0_0 = arith.constant 0 : index
    %c0_1 = arith.constant 0 : index
    %0 = vector.load %arg1[%c0, %c0_0, %c0_1] : memref<1x8x896xbf16, #tpu.memory_space<vmem>>, vector<1x8x896xbf16>
    %1 = vector.shape_cast %0 : vector<1x8x896xbf16> to vector<8x896xbf16>
    %2 = vector.extract_strided_slice %1 {offsets = [0, 0], sizes = [8, 768], strides = [1, 1]} : vector<8x896xbf16> to vector<8x768xbf16>
    %3 = vector.extract_strided_slice %1 {offsets = [0, 1], sizes = [8, 768], strides = [1, 1]} : vector<8x896xbf16> to vector<8x768xbf16>
    %4 = vector.extract_strided_slice %1 {offsets = [0, 2], sizes = [8, 768], strides = [1, 1]} : vector<8x896xbf16> to vector<8x768xbf16>
    %5 = vector.extract_strided_slice %1 {offsets = [0, 16], sizes = [8, 768], strides = [1, 1]} : vector<8x896xbf16> to vector<8x768xbf16>
    %6 = vector.extract_strided_slice %1 {offsets = [0, 17], sizes = [8, 768], strides = [1, 1]} : vector<8x896xbf16> to vector<8x768xbf16>
    %7 = vector.extract_strided_slice %1 {offsets = [0, 18], sizes = [8, 768], strides = [1, 1]} : vector<8x896xbf16> to vector<8x768xbf16>
    %8 = vector.extract_strided_slice %1 {offsets = [0, 32], sizes = [8, 768], strides = [1, 1]} : vector<8x896xbf16> to vector<8x768xbf16>
    %9 = vector.extract_strided_slice %1 {offsets = [0, 33], sizes = [8, 768], strides = [1, 1]} : vector<8x896xbf16> to vector<8x768xbf16>
    %10 = vector.extract_strided_slice %1 {offsets = [0, 34], sizes = [8, 768], strides = [1, 1]} : vector<8x896xbf16> to vector<8x768xbf16>
    %11 = tpu.concatenate %2, %3, %4, %5, %6, %7, %8, %9, %10 in 0 : vector<8x768xbf16>, vector<8x768xbf16>, vector<8x768xbf16>, vector<8x768xbf16>, vector<8x768xbf16>, vector<8x768xbf16>, vector<8x768xbf16>, vector<8x768xbf16>, vector<8x768xbf16> -> vector<72x768xbf16>
    %c0_2 = arith.constant 0 : index
    %c0_3 = arith.constant 0 : index
    %12 = vector.load %arg2[%c0_2, %c0_3] : memref<16x72xbf16, #tpu.memory_space<vmem>>, vector<16x72xbf16>
    %cst = arith.constant dense<0.000000e+00> : vector<16x768xf32>
    %13 = tpu.matmul %12, %11, %cst {dimension_numbers = #tpu.dot_dimension_numbers<[1], [0], [0], [1], [0, 0, 1, 1], [], []>} : vector<16x72xbf16>, vector<72x768xbf16>, vector<16x768xf32> -> vector<16x768xf32>
    %c0_4 = arith.constant 0 : index
    %c0_5 = arith.constant 0 : index
    %14 = vector.load %arg3[%c0_4, %c0_5] : memref<16x1xf32, #tpu.memory_space<vmem>>, vector<16x1xf32>
    %15 = vector.broadcast %14 : vector<16x1xf32> to vector<16x768xf32>
    %16 = arith.addf %13, %15 : vector<16x768xf32>
    %cst_6 = arith.constant 0.000000e+00 : f32
    %17 = vector.broadcast %cst_6 : f32 to vector<16x768xf32>
    %18 = arith.cmpf ogt, %16, %17 : vector<16x768xf32>
    %cst_7 = arith.constant 2.000000e-01 : f32
    %19 = vector.broadcast %cst_7 : f32 to vector<16x768xf32>
    %20 = arith.mulf %19, %16 : vector<16x768xf32>
    %21 = arith.select %18, %16, %20 : vector<16x768xi1>, vector<16x768xf32>
    %22 = arith.truncf %21 : vector<16x768xf32> to vector<16x768xbf16>
    %23 = vector.extract_strided_slice %22 {offsets = [0, 0], sizes = [16, 640], strides = [1, 1]} : vector<16x768xbf16> to vector<16x640xbf16>
    %24 = vector.extract_strided_slice %22 {offsets = [0, 1], sizes = [16, 640], strides = [1, 1]} : vector<16x768xbf16> to vector<16x640xbf16>
    %25 = vector.extract_strided_slice %22 {offsets = [0, 2], sizes = [16, 640], strides = [1, 1]} : vector<16x768xbf16> to vector<16x640xbf16>
    %26 = vector.extract_strided_slice %22 {offsets = [0, 16], sizes = [16, 640], strides = [1, 1]} : vector<16x768xbf16> to vector<16x640xbf16>
    %27 = vector.extract_strided_slice %22 {offsets = [0, 17], sizes = [16, 640], strides = [1, 1]} : vector<16x768xbf16> to vector<16x640xbf16>
    %28 = vector.extract_strided_slice %22 {offsets = [0, 18], sizes = [16, 640], strides = [1, 1]} : vector<16x768xbf16> to vector<16x640xbf16>
    %29 = vector.extract_strided_slice %22 {offsets = [0, 32], sizes = [16, 640], strides = [1, 1]} : vector<16x768xbf16> to vector<16x640xbf16>
    %30 = vector.extract_strided_slice %22 {offsets = [0, 33], sizes = [16, 640], strides = [1, 1]} : vector<16x768xbf16> to vector<16x640xbf16>
    %31 = vector.extract_strided_slice %22 {offsets = [0, 34], sizes = [16, 640], strides = [1, 1]} : vector<16x768xbf16> to vector<16x640xbf16>
    %32 = tpu.concatenate %23, %24, %25, %26, %27, %28, %29, %30, %31 in 0 : vector<16x640xbf16>, vector<16x640xbf16>, vector<16x640xbf16>, vector<16x640xbf16>, vector<16x640xbf16>, vector<16x640xbf16>, vector<16x640xbf16>, vector<16x640xbf16>, vector<16x640xbf16> -> vector<144x640xbf16>
    %c0_8 = arith.constant 0 : index
    %c0_9 = arith.constant 0 : index
    %33 = vector.load %arg4[%c0_8, %c0_9] : memref<32x144xbf16, #tpu.memory_space<vmem>>, vector<32x144xbf16>
    %cst_10 = arith.constant dense<0.000000e+00> : vector<32x640xf32>
    %34 = tpu.matmul %33, %32, %cst_10 {dimension_numbers = #tpu.dot_dimension_numbers<[1], [0], [0], [1], [0, 0, 1, 1], [], []>} : vector<32x144xbf16>, vector<144x640xbf16>, vector<32x640xf32> -> vector<32x640xf32>
    %c0_11 = arith.constant 0 : index
    %c0_12 = arith.constant 0 : index
    %35 = vector.load %arg5[%c0_11, %c0_12] : memref<32x1xf32, #tpu.memory_space<vmem>>, vector<32x1xf32>
    %36 = vector.broadcast %35 : vector<32x1xf32> to vector<32x640xf32>
    %37 = arith.addf %34, %36 : vector<32x640xf32>
    %cst_13 = arith.constant 0.000000e+00 : f32
    %38 = vector.broadcast %cst_13 : f32 to vector<32x640xf32>
    %39 = arith.cmpf ogt, %37, %38 : vector<32x640xf32>
    %cst_14 = arith.constant 2.000000e-01 : f32
    %40 = vector.broadcast %cst_14 : f32 to vector<32x640xf32>
    %41 = arith.mulf %40, %37 : vector<32x640xf32>
    %42 = arith.select %39, %37, %41 : vector<32x640xi1>, vector<32x640xf32>
    %43 = arith.truncf %42 : vector<32x640xf32> to vector<32x640xbf16>
    %44 = vector.extract_strided_slice %43 {offsets = [0, 0], sizes = [32, 512], strides = [1, 1]} : vector<32x640xbf16> to vector<32x512xbf16>
    %45 = vector.extract_strided_slice %43 {offsets = [0, 1], sizes = [32, 512], strides = [1, 1]} : vector<32x640xbf16> to vector<32x512xbf16>
    %46 = vector.extract_strided_slice %43 {offsets = [0, 2], sizes = [32, 512], strides = [1, 1]} : vector<32x640xbf16> to vector<32x512xbf16>
    %47 = vector.extract_strided_slice %43 {offsets = [0, 16], sizes = [32, 512], strides = [1, 1]} : vector<32x640xbf16> to vector<32x512xbf16>
    %48 = vector.extract_strided_slice %43 {offsets = [0, 17], sizes = [32, 512], strides = [1, 1]} : vector<32x640xbf16> to vector<32x512xbf16>
    %49 = vector.extract_strided_slice %43 {offsets = [0, 18], sizes = [32, 512], strides = [1, 1]} : vector<32x640xbf16> to vector<32x512xbf16>
    %50 = vector.extract_strided_slice %43 {offsets = [0, 32], sizes = [32, 512], strides = [1, 1]} : vector<32x640xbf16> to vector<32x512xbf16>
    %51 = vector.extract_strided_slice %43 {offsets = [0, 33], sizes = [32, 512], strides = [1, 1]} : vector<32x640xbf16> to vector<32x512xbf16>
    %52 = vector.extract_strided_slice %43 {offsets = [0, 34], sizes = [32, 512], strides = [1, 1]} : vector<32x640xbf16> to vector<32x512xbf16>
    %53 = tpu.concatenate %44, %45, %46, %47, %48, %49, %50, %51, %52 in 0 : vector<32x512xbf16>, vector<32x512xbf16>, vector<32x512xbf16>, vector<32x512xbf16>, vector<32x512xbf16>, vector<32x512xbf16>, vector<32x512xbf16>, vector<32x512xbf16>, vector<32x512xbf16> -> vector<288x512xbf16>
    %c0_15 = arith.constant 0 : index
    %c0_16 = arith.constant 0 : index
    %54 = vector.load %arg6[%c0_15, %c0_16] : memref<64x288xbf16, #tpu.memory_space<vmem>>, vector<64x288xbf16>
    %cst_17 = arith.constant dense<0.000000e+00> : vector<64x512xf32>
    %55 = tpu.matmul %54, %53, %cst_17 {dimension_numbers = #tpu.dot_dimension_numbers<[1], [0], [0], [1], [0, 0, 1, 1], [], []>} : vector<64x288xbf16>, vector<288x512xbf16>, vector<64x512xf32> -> vector<64x512xf32>
    %c0_18 = arith.constant 0 : index
    %c0_19 = arith.constant 0 : index
    %56 = vector.load %arg7[%c0_18, %c0_19] : memref<64x1xf32, #tpu.memory_space<vmem>>, vector<64x1xf32>
    %57 = vector.broadcast %56 : vector<64x1xf32> to vector<64x512xf32>
    %58 = arith.addf %55, %57 : vector<64x512xf32>
    %cst_20 = arith.constant 0.000000e+00 : f32
    %59 = vector.broadcast %cst_20 : f32 to vector<64x512xf32>
    %60 = arith.cmpf ogt, %58, %59 : vector<64x512xf32>
    %cst_21 = arith.constant 2.000000e-01 : f32
    %61 = vector.broadcast %cst_21 : f32 to vector<64x512xf32>
    %62 = arith.mulf %61, %58 : vector<64x512xf32>
    %63 = arith.select %60, %58, %62 : vector<64x512xi1>, vector<64x512xf32>
    %64 = arith.truncf %63 : vector<64x512xf32> to vector<64x512xbf16>
    %c0_22 = arith.constant 0 : index
    %c0_23 = arith.constant 0 : index
    %65 = vector.load %arg8[%c0_22, %c0_23] : memref<512x8xbf16, #tpu.memory_space<vmem>>, vector<512x8xbf16>
    %cst_24 = arith.constant dense<0.000000e+00> : vector<64x8xf32>
    %66 = tpu.matmul %64, %65, %cst_24 {dimension_numbers = #tpu.dot_dimension_numbers<[1], [0], [0], [1], [0, 0, 1, 1], [], []>} : vector<64x512xbf16>, vector<512x8xbf16>, vector<64x8xf32> -> vector<64x8xf32>
    %cst_25 = arith.constant 4.000000e-02 : f32
    %67 = vector.broadcast %cst_25 : f32 to vector<64x8xf32>
    %68 = arith.mulf %66, %67 : vector<64x8xf32>
    %69 = vector.extract_strided_slice %68 {offsets = [0, 0], sizes = [64, 2], strides = [1, 1]} : vector<64x8xf32> to vector<64x2xf32>
    %70 = vector.extract_strided_slice %68 {offsets = [0, 2], sizes = [64, 2], strides = [1, 1]} : vector<64x8xf32> to vector<64x2xf32>
    %71 = vector.extract_strided_slice %68 {offsets = [0, 4], sizes = [64, 2], strides = [1, 1]} : vector<64x8xf32> to vector<64x2xf32>
    %72 = vector.extract_strided_slice %68 {offsets = [0, 6], sizes = [64, 2], strides = [1, 1]} : vector<64x8xf32> to vector<64x2xf32>
    %73 = tpu.concatenate %69, %70, %71, %72 in 0 : vector<64x2xf32>, vector<64x2xf32>, vector<64x2xf32>, vector<64x2xf32> -> vector<256x2xf32>
    %74 = arith.truncf %73 : vector<256x2xf32> to vector<256x2xbf16>
    %c0_26 = arith.constant 0 : index
    %c0_27 = arith.constant 0 : index
    %75 = vector.load %arg9[%c0_26, %c0_27] : memref<256x128xbf16, #tpu.memory_space<vmem>>, vector<256x128xbf16>
    %cst_28 = arith.constant dense<0.000000e+00> : vector<2x128xf32>
    %76 = tpu.matmul %74, %75, %cst_28 {dimension_numbers = #tpu.dot_dimension_numbers<[0], [0], [1], [1], [0, 1, 1, 1], [], []>} : vector<256x2xbf16>, vector<256x128xbf16>, vector<2x128xf32> -> vector<2x128xf32>
    %c0_29 = arith.constant 0 : index
    %c0_30 = arith.constant 0 : index
    %77 = vector.load %arg10[%c0_29, %c0_30] : memref<1x128xf32, #tpu.memory_space<vmem>>, vector<1x128xf32>
    %78 = vector.broadcast %77 : vector<1x128xf32> to vector<2x128xf32>
    %79 = arith.addf %76, %78 : vector<2x128xf32>
    %cst_31 = arith.constant 0.000000e+00 : f32
    %80 = vector.broadcast %cst_31 : f32 to vector<2x128xf32>
    %81 = arith.cmpf ogt, %79, %80 : vector<2x128xf32>
    %cst_32 = arith.constant 2.000000e-01 : f32
    %82 = vector.broadcast %cst_32 : f32 to vector<2x128xf32>
    %83 = arith.mulf %82, %79 : vector<2x128xf32>
    %84 = arith.select %81, %79, %83 : vector<2x128xi1>, vector<2x128xf32>
    %c0_33 = arith.constant 0 : index
    %c0_34 = arith.constant 0 : index
    %c0_35 = arith.constant 0 : index
    %85 = vector.load %arg11[%c0_33, %c0_34, %c0_35] : memref<1x2x128xf32, #tpu.memory_space<vmem>>, vector<1x2x128xf32>
    %86 = vector.shape_cast %85 : vector<1x2x128xf32> to vector<2x128xf32>
    %87 = vector.shape_cast %84 : vector<2x128xf32> to vector<1x2x128xf32>
    tpu.vector_store %arg11[%c0_33, %c0_34, %c0_35], %87 {strides = array<i32>} : memref<1x2x128xf32, #tpu.memory_space<vmem>>, vector<1x2x128xf32>,
    return
  }
  func.func @transform_0(%arg0: i32) -> (i32, i32, i32) {
    %c0_i32 = arith.constant 0 : i32
    %c0_i32_0 = arith.constant 0 : i32
    %c0_i32_1 = arith.constant 0 : i32
    return %arg0, %c0_i32, %c0_i32_0 : i32, i32, i32
  }
  func.func @transform_1(%arg0: i32) -> (i32, i32) {
    %c0_i32 = arith.constant 0 : i32
    %c0_i32_0 = arith.constant 0 : i32
    %c0_i32_1 = arith.constant 0 : i32
    return %c0_i32, %c0_i32_0 : i32, i32
  }
  func.func @transform_2(%arg0: i32) -> (i32, i32) {
    %c0_i32 = arith.constant 0 : i32
    %c0_i32_0 = arith.constant 0 : i32
    %c0_i32_1 = arith.constant 0 : i32
    return %c0_i32, %c0_i32_0 : i32, i32
  }
  func.func @transform_3(%arg0: i32) -> (i32, i32) {
    %c0_i32 = arith.constant 0 : i32
    %c0_i32_0 = arith.constant 0 : i32
    %c0_i32_1 = arith.constant 0 : i32
    return %c0_i32, %c0_i32_0 : i32, i32
  }
  func.func @transform_4(%arg0: i32) -> (i32, i32) {
    %c0_i32 = arith.constant 0 : i32
    %c0_i32_0 = arith.constant 0 : i32
    %c0_i32_1 = arith.constant 0 : i32
    return %c0_i32, %c0_i32_0 : i32, i32
  }
  func.func @transform_5(%arg0: i32) -> (i32, i32) {
    %c0_i32 = arith.constant 0 : i32
    %c0_i32_0 = arith.constant 0 : i32
    %c0_i32_1 = arith.constant 0 : i32
    return %c0_i32, %c0_i32_0 : i32, i32
  }
  func.func @transform_6(%arg0: i32) -> (i32, i32) {
    %c0_i32 = arith.constant 0 : i32
    %c0_i32_0 = arith.constant 0 : i32
    %c0_i32_1 = arith.constant 0 : i32
    return %c0_i32, %c0_i32_0 : i32, i32
  }
  func.func @transform_7(%arg0: i32) -> (i32, i32) {
    %c0_i32 = arith.constant 0 : i32
    %c0_i32_0 = arith.constant 0 : i32
    %c0_i32_1 = arith.constant 0 : i32
    return %c0_i32, %c0_i32_0 : i32, i32
  }
  func.func @transform_8(%arg0: i32) -> (i32, i32) {
    %c0_i32 = arith.constant 0 : i32
    %c0_i32_0 = arith.constant 0 : i32
    %c0_i32_1 = arith.constant 0 : i32
    return %c0_i32, %c0_i32_0 : i32, i32
  }
  func.func @transform_9(%arg0: i32) -> (i32, i32) {
    %c0_i32 = arith.constant 0 : i32
    %c0_i32_0 = arith.constant 0 : i32
    %c0_i32_1 = arith.constant 0 : i32
    return %c0_i32, %c0_i32_0 : i32, i32
  }
  func.func @transform_10(%arg0: i32) -> (i32, i32, i32) {
    %c0_i32 = arith.constant 0 : i32
    %c0_i32_0 = arith.constant 0 : i32
    %c0_i32_1 = arith.constant 0 : i32
    return %arg0, %c0_i32, %c0_i32_0 : i32, i32, i32
  }
}

module attributes {stable_mosaic.version = 11 : i64} {
  func.func @kernel(%arg0: i32, %arg1: memref<1x8x896xbf16, #tpu.memory_space<vmem>>, %arg2: memref<16x72xbf16, #tpu.memory_space<vmem>>, %arg3: memref<16x1xf32, #tpu.memory_space<vmem>>, %arg4: memref<32x144xbf16, #tpu.memory_space<vmem>>, %arg5: memref<32x1xf32, #tpu.memory_space<vmem>>, %arg6: memref<64x288xbf16, #tpu.memory_space<vmem>>, %arg7: memref<64x1xf32, #tpu.memory_space<vmem>>, %arg8: memref<512x8xbf16, #tpu.memory_space<vmem>>, %arg9: memref<256x128xbf16, #tpu.memory_space<vmem>>, %arg10: memref<1x128xf32, #tpu.memory_space<vmem>>, %arg11: memref<1x2x128xf32, #tpu.memory_space<vmem>>) attributes {dimension_semantics = [#tpu.dimension_semantics<parallel>], iteration_bounds = array<i64: 1>, scalar_prefetch = 0 : i64, scratch_operands = 0 : i64, tpu.core_type = #tpu.core_type<tc>, window_params = [{transform_indices = @transform_0, window_bounds = array<i64: 1, 8, 896>}, {pipeline_mode = #tpu.pipeline_mode<synchronous>, transform_indices = @transform_1, window_bounds = array<i64: 16, 72>}, {pipeline_mode = #tpu.pipeline_mode<synchronous>, transform_indices = @transform_2, window_bounds = array<i64: 16, 1>}, {pipeline_mode = #tpu.pipeline_mode<synchronous>, transform_indices = @transform_3, window_bounds = array<i64: 32, 144>}, {pipeline_mode = #tpu.pipeline_mode<synchronous>, transform_indices = @transform_4, window_bounds = array<i64: 32, 1>}, {pipeline_mode = #tpu.pipeline_mode<synchronous>, transform_indices = @transform_5, window_bounds = array<i64: 64, 288>}, {pipeline_mode = #tpu.pipeline_mode<synchronous>, transform_indices = @transform_6, window_bounds = array<i64: 64, 1>}, {pipeline_mode = #tpu.pipeline_mode<synchronous>, transform_indices = @transform_7, window_bounds = array<i64: 512, 8>}, {pipeline_mode = #tpu.pipeline_mode<synchronous>, transform_indices = @transform_8, window_bounds = array<i64: 256, 128>}, {pipeline_mode = #tpu.pipeline_mode<synchronous>, transform_indices = @transform_9, window_bounds = array<i64: 1, 128>}, {transform_indices = @transform_10, window_bounds = array<i64: 1, 2, 128>}]} {
    %c0 = arith.constant 0 : index
    %c0_0 = arith.constant 0 : index
    %c0_1 = arith.constant 0 : index
    %0 = vector.load %arg1[%c0, %c0_0, %c0_1] : memref<1x8x896xbf16, #tpu.memory_space<vmem>>, vector<1x8x896xbf16>
    %1 = vector.shape_cast %0 : vector<1x8x896xbf16> to vector<8x896xbf16>
    %2 = vector.extract_strided_slice %1 {offsets = [0, 0], sizes = [8, 768], strides = [1, 1]} : vector<8x896xbf16> to vector<8x768xbf16>
    %3 = vector.extract_strided_slice %1 {offsets = [0, 1], sizes = [8, 768], strides = [1, 1]} : vector<8x896xbf16> to vector<8x768xbf16>
    %4 = vector.extract_strided_slice %1 {offsets = [0, 2], sizes = [8, 768], strides = [1, 1]} : vector<8x896xbf16> to vector<8x768xbf16>
    %5 = vector.extract_strided_slice %1 {offsets = [0, 16], sizes = [8, 768], strides = [1, 1]} : vector<8x896xbf16> to vector<8x768xbf16>
    %6 = vector.extract_strided_slice %1 {offsets = [0, 17], sizes = [8, 768], strides = [1, 1]} : vector<8x896xbf16> to vector<8x768xbf16>
    %7 = vector.extract_strided_slice %1 {offsets = [0, 18], sizes = [8, 768], strides = [1, 1]} : vector<8x896xbf16> to vector<8x768xbf16>
    %8 = vector.extract_strided_slice %1 {offsets = [0, 32], sizes = [8, 768], strides = [1, 1]} : vector<8x896xbf16> to vector<8x768xbf16>
    %9 = vector.extract_strided_slice %1 {offsets = [0, 33], sizes = [8, 768], strides = [1, 1]} : vector<8x896xbf16> to vector<8x768xbf16>
    %10 = vector.extract_strided_slice %1 {offsets = [0, 34], sizes = [8, 768], strides = [1, 1]} : vector<8x896xbf16> to vector<8x768xbf16>
    %11 = tpu.concatenate %2, %3, %4, %5, %6, %7, %8, %9, %10 in 0 : vector<8x768xbf16>, vector<8x768xbf16>, vector<8x768xbf16>, vector<8x768xbf16>, vector<8x768xbf16>, vector<8x768xbf16>, vector<8x768xbf16>, vector<8x768xbf16>, vector<8x768xbf16> -> vector<72x768xbf16>
    %c0_2 = arith.constant 0 : index
    %c0_3 = arith.constant 0 : index
    %12 = vector.load %arg2[%c0_2, %c0_3] : memref<16x72xbf16, #tpu.memory_space<vmem>>, vector<16x72xbf16>
    %cst = arith.constant dense<0.000000e+00> : vector<16x768xf32>
    %13 = tpu.matmul %12, %11, %cst {dimension_numbers = #tpu.dot_dimension_numbers<[1], [0], [0], [1], [0, 0, 1, 1], [], []>} : vector<16x72xbf16>, vector<72x768xbf16>, vector<16x768xf32> -> vector<16x768xf32>
    %c0_4 = arith.constant 0 : index
    %c0_5 = arith.constant 0 : index
    %14 = vector.load %arg3[%c0_4, %c0_5] : memref<16x1xf32, #tpu.memory_space<vmem>>, vector<16x1xf32>
    %15 = vector.broadcast %14 : vector<16x1xf32> to vector<16x768xf32>
    %16 = arith.addf %13, %15 : vector<16x768xf32>
    %cst_6 = arith.constant 0.000000e+00 : f32
    %17 = vector.broadcast %cst_6 : f32 to vector<16x768xf32>
    %18 = arith.cmpf ogt, %16, %17 : vector<16x768xf32>
    %cst_7 = arith.constant 2.000000e-01 : f32
    %19 = vector.broadcast %cst_7 : f32 to vector<16x768xf32>
    %20 = arith.mulf %19, %16 : vector<16x768xf32>
    %21 = arith.select %18, %16, %20 : vector<16x768xi1>, vector<16x768xf32>
    %22 = arith.truncf %21 : vector<16x768xf32> to vector<16x768xbf16>
    %23 = vector.extract_strided_slice %22 {offsets = [0, 0], sizes = [16, 640], strides = [1, 1]} : vector<16x768xbf16> to vector<16x640xbf16>
    %24 = vector.extract_strided_slice %22 {offsets = [0, 1], sizes = [16, 640], strides = [1, 1]} : vector<16x768xbf16> to vector<16x640xbf16>
    %25 = vector.extract_strided_slice %22 {offsets = [0, 2], sizes = [16, 640], strides = [1, 1]} : vector<16x768xbf16> to vector<16x640xbf16>
    %26 = vector.extract_strided_slice %22 {offsets = [0, 16], sizes = [16, 640], strides = [1, 1]} : vector<16x768xbf16> to vector<16x640xbf16>
    %27 = vector.extract_strided_slice %22 {offsets = [0, 17], sizes = [16, 640], strides = [1, 1]} : vector<16x768xbf16> to vector<16x640xbf16>
    %28 = vector.extract_strided_slice %22 {offsets = [0, 18], sizes = [16, 640], strides = [1, 1]} : vector<16x768xbf16> to vector<16x640xbf16>
    %29 = vector.extract_strided_slice %22 {offsets = [0, 32], sizes = [16, 640], strides = [1, 1]} : vector<16x768xbf16> to vector<16x640xbf16>
    %30 = vector.extract_strided_slice %22 {offsets = [0, 33], sizes = [16, 640], strides = [1, 1]} : vector<16x768xbf16> to vector<16x640xbf16>
    %31 = vector.extract_strided_slice %22 {offsets = [0, 34], sizes = [16, 640], strides = [1, 1]} : vector<16x768xbf16> to vector<16x640xbf16>
    %32 = tpu.concatenate %23, %24, %25, %26, %27, %28, %29, %30, %31 in 0 : vector<16x640xbf16>, vector<16x640xbf16>, vector<16x640xbf16>, vector<16x640xbf16>, vector<16x640xbf16>, vector<16x640xbf16>, vector<16x640xbf16>, vector<16x640xbf16>, vector<16x640xbf16> -> vector<144x640xbf16>
    %c0_8 = arith.constant 0 : index
    %c0_9 = arith.constant 0 : index
    %33 = vector.load %arg4[%c0_8, %c0_9] : memref<32x144xbf16, #tpu.memory_space<vmem>>, vector<32x144xbf16>
    %cst_10 = arith.constant dense<0.000000e+00> : vector<32x640xf32>
    %34 = tpu.matmul %33, %32, %cst_10 {dimension_numbers = #tpu.dot_dimension_numbers<[1], [0], [0], [1], [0, 0, 1, 1], [], []>} : vector<32x144xbf16>, vector<144x640xbf16>, vector<32x640xf32> -> vector<32x640xf32>
    %c0_11 = arith.constant 0 : index
    %c0_12 = arith.constant 0 : index
    %35 = vector.load %arg5[%c0_11, %c0_12] : memref<32x1xf32, #tpu.memory_space<vmem>>, vector<32x1xf32>
    %36 = vector.broadcast %35 : vector<32x1xf32> to vector<32x640xf32>
    %37 = arith.addf %34, %36 : vector<32x640xf32>
    %cst_13 = arith.constant 0.000000e+00 : f32
    %38 = vector.broadcast %cst_13 : f32 to vector<32x640xf32>
    %39 = arith.cmpf ogt, %37, %38 : vector<32x640xf32>
    %cst_14 = arith.constant 2.000000e-01 : f32
    %40 = vector.broadcast %cst_14 : f32 to vector<32x640xf32>
    %41 = arith.mulf %40, %37 : vector<32x640xf32>
    %42 = arith.select %39, %37, %41 : vector<32x640xi1>, vector<32x640xf32>
    %43 = arith.truncf %42 : vector<32x640xf32> to vector<32x640xbf16>
    %44 = vector.extract_strided_slice %43 {offsets = [0, 0], sizes = [32, 512], strides = [1, 1]} : vector<32x640xbf16> to vector<32x512xbf16>
    %45 = vector.extract_strided_slice %43 {offsets = [0, 1], sizes = [32, 512], strides = [1, 1]} : vector<32x640xbf16> to vector<32x512xbf16>
    %46 = vector.extract_strided_slice %43 {offsets = [0, 2], sizes = [32, 512], strides = [1, 1]} : vector<32x640xbf16> to vector<32x512xbf16>
    %47 = vector.extract_strided_slice %43 {offsets = [0, 16], sizes = [32, 512], strides = [1, 1]} : vector<32x640xbf16> to vector<32x512xbf16>
    %48 = vector.extract_strided_slice %43 {offsets = [0, 17], sizes = [32, 512], strides = [1, 1]} : vector<32x640xbf16> to vector<32x512xbf16>
    %49 = vector.extract_strided_slice %43 {offsets = [0, 18], sizes = [32, 512], strides = [1, 1]} : vector<32x640xbf16> to vector<32x512xbf16>
    %50 = vector.extract_strided_slice %43 {offsets = [0, 32], sizes = [32, 512], strides = [1, 1]} : vector<32x640xbf16> to vector<32x512xbf16>
    %51 = vector.extract_strided_slice %43 {offsets = [0, 33], sizes = [32, 512], strides = [1, 1]} : vector<32x640xbf16> to vector<32x512xbf16>
    %52 = vector.extract_strided_slice %43 {offsets = [0, 34], sizes = [32, 512], strides = [1, 1]} : vector<32x640xbf16> to vector<32x512xbf16>
    %53 = tpu.concatenate %44, %45, %46, %47, %48, %49, %50, %51, %52 in 0 : vector<32x512xbf16>, vector<32x512xbf16>, vector<32x512xbf16>, vector<32x512xbf16>, vector<32x512xbf16>, vector<32x512xbf16>, vector<32x512xbf16>, vector<32x512xbf16>, vector<32x512xbf16> -> vector<288x512xbf16>
    %c0_15 = arith.constant 0 : index
    %c0_16 = arith.constant 0 : index
    %54 = vector.load %arg6[%c0_15, %c0_16] : memref<64x288xbf16, #tpu.memory_space<vmem>>, vector<64x288xbf16>
    %cst_17 = arith.constant dense<0.000000e+00> : vector<64x512xf32>
    %55 = tpu.matmul %54, %53, %cst_17 {dimension_numbers = #tpu.dot_dimension_numbers<[1], [0], [0], [1], [0, 0, 1, 1], [], []>} : vector<64x288xbf16>, vector<288x512xbf16>, vector<64x512xf32> -> vector<64x512xf32>
    %c0_18 = arith.constant 0 : index
    %c0_19 = arith.constant 0 : index
    %56 = vector.load %arg7[%c0_18, %c0_19] : memref<64x1xf32, #tpu.memory_space<vmem>>, vector<64x1xf32>
    %57 = vector.broadcast %56 : vector<64x1xf32> to vector<64x512xf32>
    %58 = arith.addf %55, %57 : vector<64x512xf32>
    %cst_20 = arith.constant 0.000000e+00 : f32
    %59 = vector.broadcast %cst_20 : f32 to vector<64x512xf32>
    %60 = arith.cmpf ogt, %58, %59 : vector<64x512xf32>
    %cst_21 = arith.constant 2.000000e-01 : f32
    %61 = vector.broadcast %cst_21 : f32 to vector<64x512xf32>
    %62 = arith.mulf %61, %58 : vector<64x512xf32>
    %63 = arith.select %60, %58, %62 : vector<64x512xi1>, vector<64x512xf32>
    %64 = arith.truncf %63 : vector<64x512xf32> to vector<64x512xbf16>
    %c0_22 = arith.constant 0 : index
    %c0_23 = arith.constant 0 : index
    %65 = vector.load %arg8[%c0_22, %c0_23] : memref<512x8xbf16, #tpu.memory_space<vmem>>, vector<512x8xbf16>
    %cst_24 = arith.constant dense<0.000000e+00> : vector<64x8xf32>
    %66 = tpu.matmul %64, %65, %cst_24 {dimension_numbers = #tpu.dot_dimension_numbers<[1], [0], [0], [1], [0, 0, 1, 1], [], []>} : vector<64x512xbf16>, vector<512x8xbf16>, vector<64x8xf32> -> vector<64x8xf32>
    %cst_25 = arith.constant 4.000000e-02 : f32
    %67 = vector.broadcast %cst_25 : f32 to vector<64x8xf32>
    %68 = arith.mulf %66, %67 : vector<64x8xf32>
    %69 = vector.extract_strided_slice %68 {offsets = [0, 0], sizes = [64, 2], strides = [1, 1]} : vector<64x8xf32> to vector<64x2xf32>
    %70 = vector.extract_strided_slice %68 {offsets = [0, 2], sizes = [64, 2], strides = [1, 1]} : vector<64x8xf32> to vector<64x2xf32>
    %71 = vector.extract_strided_slice %68 {offsets = [0, 4], sizes = [64, 2], strides = [1, 1]} : vector<64x8xf32> to vector<64x2xf32>
    %72 = vector.extract_strided_slice %68 {offsets = [0, 6], sizes = [64, 2], strides = [1, 1]} : vector<64x8xf32> to vector<64x2xf32>
    %73 = tpu.concatenate %69, %70, %71, %72 in 0 : vector<64x2xf32>, vector<64x2xf32>, vector<64x2xf32>, vector<64x2xf32> -> vector<256x2xf32>
    %74 = arith.truncf %73 : vector<256x2xf32> to vector<256x2xbf16>
    %c0_26 = arith.constant 0 : index
    %c0_27 = arith.constant 0 : index
    %75 = vector.load %arg9[%c0_26, %c0_27] : memref<256x128xbf16, #tpu.memory_space<vmem>>, vector<256x128xbf16>
    %cst_28 = arith.constant dense<0.000000e+00> : vector<2x128xf32>
    %76 = tpu.matmul %74, %75, %cst_28 {dimension_numbers = #tpu.dot_dimension_numbers<[0], [0], [1], [1], [0, 1, 1, 1], [], []>} : vector<256x2xbf16>, vector<256x128xbf16>, vector<2x128xf32> -> vector<2x128xf32>
    %c0_29 = arith.constant 0 : index
    %c0_30 = arith.constant 0 : index
    %77 = vector.load %arg10[%c0_29, %c0_30] : memref<1x128xf32, #tpu.memory_space<vmem>>, vector<1x128xf32>
    %78 = vector.broadcast %77 : vector<1x128xf32> to vector<2x128xf32>
    %79 = arith.addf %76, %78 : vector<2x128xf32>
    %cst_31 = arith.constant 0.000000e+00 : f32
    %80 = vector.broadcast %cst_31 : f32 to vector<2x128xf32>
    %81 = arith.cmpf ogt, %79, %80 : vector<2x128xf32>
    %cst_32 = arith.constant 2.000000e-01 : f32
    %82 = vector.broadcast %cst_32 : f32 to vector<2x128xf32>
    %83 = arith.mulf %82, %79 : vector<2x128xf32>
    %84 = arith.select %81, %79, %83 : vector<2x128xi1>, vector<2x128xf32>
    %c0_33 = arith.constant 0 : index
    %c0_34 = arith.constant 0 : index
    %c0_35 = arith.constant 0 : index
    %85 = vector.load %arg11[%c0_33, %c0_34, %c0_35] : memref<1x2x128xf32, #tpu.memory_space<vmem>>, vector<1x2x128xf32>
    %86 = vector.shape_cast %85 : vector<1x2x128xf32> to vector<2x128xf32>
    %87 = vector.shape_cast %84 : vector<2x128xf32> to vector<1x2x128xf32>
    tpu.vector_store %arg11[%c0_33, %c0_34, %c0_35], %87 {strides = array<i32>} : memref<1x2x128xf32, #tpu.memory_space<vmem>>, vector<1x2x128xf32>,
    return
  }
  func.func @transform_0(%arg0: i32) -> (i32, i32, i32) {
    %c0_i32 = arith.constant 0 : i32
    %c0_i32_0 = arith.constant 0 : i32
    %c0_i32_1 = arith.constant 0 : i32
    return %arg0, %c0_i32, %c0_i32_0 : i32, i32, i32
  }
  func.func @transform_1(%arg0: i32) -> (i32, i32) {
    %c0_i32 = arith.constant 0 : i32
    %c0_i32_0 = arith.constant 0 : i32
    %c0_i32_1 = arith.constant 0 : i32
    return %c0_i32, %c0_i32_0 : i32, i32
  }
  func.func @transform_2(%arg0: i32) -> (i32, i32) {
    %c0_i32 = arith.constant 0 : i32
    %c0_i32_0 = arith.constant 0 : i32
    %c0_i32_1 = arith.constant 0 : i32
    return %c0_i32, %c0_i32_0 : i32, i32
  }
  func.func @transform_3(%arg0: i32) -> (i32, i32) {
    %c0_i32 = arith.constant 0 : i32
    %c0_i32_0 = arith.constant 0 : i32
    %c0_i32_1 = arith.constant 0 : i32
    return %c0_i32, %c0_i32_0 : i32, i32
  }
  func.func @transform_4(%arg0: i32) -> (i32, i32) {
    %c0_i32 = arith.constant 0 : i32
    %c0_i32_0 = arith.constant 0 : i32
    %c0_i32_1 = arith.constant 0 : i32
    return %c0_i32, %c0_i32_0 : i32, i32
  }
  func.func @transform_5(%arg0: i32) -> (i32, i32) {
    %c0_i32 = arith.constant 0 : i32
    %c0_i32_0 = arith.constant 0 : i32
    %c0_i32_1 = arith.constant 0 : i32
    return %c0_i32, %c0_i32_0 : i32, i32
  }
  func.func @transform_6(%arg0: i32) -> (i32, i32) {
    %c0_i32 = arith.constant 0 : i32
    %c0_i32_0 = arith.constant 0 : i32
    %c0_i32_1 = arith.constant 0 : i32
    return %c0_i32, %c0_i32_0 : i32, i32
  }
  func.func @transform_7(%arg0: i32) -> (i32, i32) {
    %c0_i32 = arith.constant 0 : i32
    %c0_i32_0 = arith.constant 0 : i32
    %c0_i32_1 = arith.constant 0 : i32
    return %c0_i32, %c0_i32_0 : i32, i32
  }
  func.func @transform_8(%arg0: i32) -> (i32, i32) {
    %c0_i32 = arith.constant 0 : i32
    %c0_i32_0 = arith.constant 0 : i32
    %c0_i32_1 = arith.constant 0 : i32
    return %c0_i32, %c0_i32_0 : i32, i32
  }
  func.func @transform_9(%arg0: i32) -> (i32, i32) {
    %c0_i32 = arith.constant 0 : i32
    %c0_i32_0 = arith.constant 0 : i32
    %c0_i32_1 = arith.constant 0 : i32
    return %c0_i32, %c0_i32_0 : i32, i32
  }
  func.func @transform_10(%arg0: i32) -> (i32, i32, i32) {
    %c0_i32 = arith.constant 0 : i32
    %c0_i32_0 = arith.constant 0 : i32
    %c0_i32_1 = arith.constant 0 : i32
    return %arg0, %c0_i32, %c0_i32_0 : i32, i32, i32
  }
}

</mosaic_0001>

<bundles_post_ra>
// kernel: tpu_custom_call.1
= control target key start
LH: loop header
LB: loop body
LE: loop exit
PB: predicated region body
PF: predicated region fallthrough
CT: control target
= control target key end

     0   :  { %s2985_s19 = smov 127   ;;  %s2986_s20 = smov 126   ;;  %s4291_s0 = inlined_call_operand.vmem [shape: bf16[1,8,896], index: 0, kind: input, shape index: {}]   ;;  %s4292_s1 = inlined_call_operand.vmem [shape: bf16[16,72], index: 1, kind: input, shape index: {}]   ;;  %s4293_s2 = inlined_call_operand.vmem [shape: f32[16,1], index: 2, kind: input, shape index: {}]   ;;  %s4294_s3 = inlined_call_operand.vmem [shape: bf16[32,144], index: 3, kind: input, shape index: {}]   ;;  %s4295_s4 = inlined_call_operand.vmem [shape: f32[32,1], index: 4, kind: input, shape index: {}]   ;;  %s4296_s5 = inlined_call_operand.vmem [shape: bf16[64,288], index: 5, kind: input, shape index: {}]   ;;  %s4297_s6 = inlined_call_operand.vmem [shape: f32[64,1], index: 6, kind: input, shape index: {}]   ;;  %s4298_s7 = inlined_call_operand.vmem [shape: bf16[512,8], index: 7, kind: input, shape index: {}]   ;;  %s4299_s8 = inlined_call_operand.vmem [shape: bf16[256,128], index: 8, kind: input, shape index: {}]   ;;  %s4300_s9 = inlined_call_operand.vmem [shape: f32[1,128], index: 9, kind: input, shape index: {}]   ;;  %s4301_s10 = inlined_call_operand.hbm [shape: f32[1,2,128], index: 10, kind: output, shape index: {}]  }
   0x1   :  { %v37_v0 = vld [vmem:[%s4291_s0] sm:$0xff]  ;;  %v38_v1 = vld [vmem:[%s4291_s0 + $0x8] sm:$0xff]  ;;  %v39_v4 = vld [vmem:[%s4291_s0 + $0x10] sm:$0xff]  ;;  %s2987_s21 = smov 112   ;;  %s2988_s22 = smov 111  }
   0x2   :  { %v3058_v2 = vcombine.high %v37_v0, %v37_v0  ;;  %v3060_v3 = vcombine.low %v37_v0, %v37_v0  ;;  %v3069_v5 = vcombine.low %v38_v1, %v38_v1  ;;  %v3071_v6 = vcombine.high %v38_v1, %v38_v1  ;;  %s2989_s23 = smov 110  }
   0x3   :  { %v3077_v7 = vcombine.low %v39_v4, %v39_v4 }
   0x4   :  { %61 = vrot.lane.b32.xlu0 %v3058_v2, %s2985_s19  ;;  %59 = vrot.lane.b32.xlu1 %v3060_v3, %s2985_s19 }
   0x8   :  { %63 = vrot.lane.b32.xlu0 %v3069_v5, %s2985_s19  ;;  %65 = vrot.lane.b32.xlu1 %v3071_v6, %s2985_s19 }
   0xc   :  { %67 = vrot.lane.b32.xlu0 %v3077_v7, %s2985_s19  ;;  %82 = vrot.lane.b32.xlu1 %v3058_v2, %s2986_s20 }
  0x10   :  { %84 = vrot.lane.b32.xlu0 %v3069_v5, %s2986_s20  ;;  %103 = vrot.lane.b32.xlu1 %v3058_v2, %s2987_s21 }
  0x14   :  { %105 = vrot.lane.b32.xlu0 %v3069_v5, %s2987_s21  ;;  %80 = vrot.lane.b32.xlu1 %v3060_v3, %s2986_s20 }
  0x18   :  { %86 = vrot.lane.b32.xlu0 %v3071_v6, %s2986_s20  ;;  %88 = vrot.lane.b32.xlu1 %v3077_v7, %s2986_s20 }
  0x1c   :  { %101 = vrot.lane.b32.xlu0 %v3060_v3, %s2987_s21  ;;  %107 = vrot.lane.b32.xlu1 %v3071_v6, %s2987_s21 }
  0x20   :  { %109 = vrot.lane.b32.xlu0 %v3077_v7, %s2987_s21  ;;  %124 = vrot.lane.b32.xlu1 %v3058_v2, %s2988_s22 }
  0x24   :  { %126 = vrot.lane.b32.xlu0 %v3069_v5, %s2988_s22  ;;  %145 = vrot.lane.b32.xlu1 %v3058_v2, %s2989_s23 }
  0x28   :  { %147 = vrot.lane.b32.xlu0 %v3069_v5, %s2989_s23  ;;  %122 = vrot.lane.b32.xlu1 %v3060_v3, %s2988_s22 }
  0x2c   :  { %128 = vrot.lane.b32.xlu0 %v3071_v6, %s2988_s22  ;;  %130 = vrot.lane.b32.xlu1 %v3077_v7, %s2988_s22 }
  0x30   :  { %143 = vrot.lane.b32.xlu0 %v3060_v3, %s2989_s23  ;;  %149 = vrot.lane.b32.xlu1 %v3071_v6, %s2989_s23 }
  0x31   :  { %15 = vsyncpa [#allocation3], 0  ;;  %s2990_s24 = smov 96   ;;  %s2991_s25 = smov 95   ;;  %v2992_v8 = vmov 0   ;;  %v3155_v9 = vcombine.high %v39_v4, %v39_v4  ;;  %v326_v11 = vld [vmem:[%s4293_s2] sm:$0xff] }
  0x32   :  { %397 = vmatprep.mubr.bf16.mxu0 %v2992_v8  ;;  %440 = vmatprep.mubr.bf16.mxu1 %v2992_v8  ;;  %s2993_s26 = smov 94   ;;  %v2889_v10 = vld [vmem:[%s4291_s0 + $0x18] ss:$0 sps:$4 sm:$0xff]   ;;  %v327_v12 = vld [vmem:[%s4293_s2 + $0x8] sm:$0xff]  ;;  %vm73_vm0 = vcmask 1039360   ;;  %vm227_vm1 = vcmask 1043456  }
  0x33   :  { %2821 = vset.pattern.permute.xlu0 %v2992_v8  ;;  %2822 = vset.pattern.permute.xlu1 %v2992_v8  ;;  %vm94_vm2 = vcmask 1031168   ;;  %vm115_vm3 = vcmask 916480   ;;  %vm136_vm4 = vcmask 908288   ;;  %vm157_vm5 = vcmask 900096  }
  0x34   :  { %151 = vrot.lane.b32.xlu0 %v3077_v7, %s2989_s23  ;;  %166 = vrot.lane.b32.xlu1 %v3058_v2, %s2990_s24  ;;  %vm178_vm6 = vcmask 785408   ;;  %vm199_vm7 = vcmask 777216   ;;  %vm220_vm8 = vcmask 769024   ;;  %vm343_vm9 = vcmask 588800  }
  0x38   :  { %168 = vrot.lane.b32.xlu0 %v3069_v5, %s2990_s24  ;;  %187 = vrot.lane.b32.xlu1 %v3058_v2, %s2991_s25 }
  0x3c   :  { %189 = vrot.lane.b32.xlu0 %v3069_v5, %s2991_s25  ;;  %164 = vrot.lane.b32.xlu1 %v3060_v3, %s2990_s24 }
  0x40   :  { %170 = vrot.lane.b32.xlu0 %v3071_v6, %s2990_s24  ;;  %172 = vrot.lane.b32.xlu1 %v3077_v7, %s2990_s24 }
  0x44   :  { %185 = vrot.lane.b32.xlu0 %v3060_v3, %s2991_s25  ;;  %191 = vrot.lane.b32.xlu1 %v3071_v6, %s2991_s25 }
  0x48   :  { %193 = vrot.lane.b32.xlu0 %v3077_v7, %s2991_s25  ;;  %206 = vrot.lane.b32.xlu1 %v3060_v3, %s2993_s26 }
  0x4c   :  { %208 = vrot.lane.b32.xlu0 %v3058_v2, %s2993_s26  ;;  %210 = vrot.lane.b32.xlu1 %v3069_v5, %s2993_s26 }
  0x50   :  { %212 = vrot.lane.b32.xlu0 %v3071_v6, %s2993_s26  ;;  %214 = vrot.lane.b32.xlu1 %v3077_v7, %s2993_s26 }
  0x54   :  { %69 = vrot.lane.b32.xlu0 %v3155_v9, %s2985_s19  ;;  %71 = vrot.lane.b32.xlu1 %v2889_v10, %s2985_s19 }
  0x58   :  { %90 = vrot.lane.b32.xlu0 %v3155_v9, %s2986_s20  ;;  %92 = vrot.lane.b32.xlu1 %v2889_v10, %s2986_s20 }
  0x5c   :  { %111 = vrot.lane.b32.xlu0 %v3155_v9, %s2987_s21  ;;  %113 = vrot.lane.b32.xlu1 %v2889_v10, %s2987_s21 }
  0x60   :  { %132 = vrot.lane.b32.xlu0 %v3155_v9, %s2988_s22  ;;  %134 = vrot.lane.b32.xlu1 %v2889_v10, %s2988_s22 }
  0x64   :  { %153 = vrot.lane.b32.xlu0 %v3155_v9, %s2989_s23  ;;  %155 = vrot.lane.b32.xlu1 %v2889_v10, %s2989_s23 }
  0x68   :  { %174 = vrot.lane.b32.xlu0 %v3155_v9, %s2990_s24  ;;  %176 = vrot.lane.b32.xlu1 %v2889_v10, %s2990_s24 }
  0x6c   :  { %195 = vrot.lane.b32.xlu0 %v3155_v9, %s2991_s25  ;;  %197 = vrot.lane.b32.xlu1 %v2889_v10, %s2991_s25 }
  0x70   :  { %216 = vrot.lane.b32.xlu0 %v3155_v9, %s2993_s26  ;;  %218 = vrot.lane.b32.xlu1 %v2889_v10, %s2993_s26 }
  0x74   :  { %330 = vperm.xlu0 %2821, %v326_v11   ;;  %335 = vperm.xlu1 %2822, %v327_v12  }
  0x76   :  { %v62_v13 = vpop.permute.xlu0 %61  ;;  %v60_v14 = vpop.permute.xlu1 %59 }
  0x77   :  { %v74_v15 = vsel %vm73_vm0, %v60_v14, %v62_v13 }
  0x78   :  { %v230_v20 = vsel %vm227_vm1, %v3060_v3, %v74_v15 }
  0x7a   :  { %v64_v16 = vpop.permute.xlu0 %63  ;;  %v66_v17 = vpop.permute.xlu1 %65 }
  0x7b   :  { %v75_v18 = vsel %vm73_vm0, %v62_v13, %v64_v16  ;;  %v76_v23 = vsel %vm73_vm0, %v64_v16, %v66_v17 }
  0x7c   :  { %v234_v19 = vsel %vm227_vm1, %v3058_v2, %v75_v18  ;;  %v238_v26 = vsel %vm227_vm1, %v3069_v5, %v76_v23 }
  0x7d   :  { %365 = vmatprep.subr.bf16.mxu0 %v234_v19 }
  0x7e   :  { %v3196_v21 = vpop.permute.xlu0 %67  ;;  %366 = vmatpush1.bf16.msra.mxu0 %v230_v20  ;;  %v83_v22 = vpop.permute.xlu1 %82 }
  0x7f   :  { %v77_v24 = vsel %vm73_vm0, %v66_v17, %v3196_v21 }
  0x80   :  { %v242_v25 = vsel %vm227_vm1, %v3071_v6, %v77_v24 }
  0x81   :  { %408 = vmatprep.subr.bf16.mxu1 %v242_v25 }
  0x82   :  { %v85_v27 = vpop.permute.xlu0 %84  ;;  %409 = vmatpush1.bf16.msra.mxu1 %v238_v26  ;;  %v104_v28 = vpop.permute.xlu1 %103 }
  0x83   :  { %v96_v31 = vsel %vm94_vm2, %v83_v22, %v85_v27 }
  0x86   :  { %v106_v29 = vpop.permute.xlu0 %105  ;;  %v81_v30 = vpop.permute.xlu1 %80 }
  0x87   :  { %v117_v32 = vsel %vm115_vm3, %v104_v28, %v106_v29  ;;  %v95_v38 = vsel %vm94_vm2, %v81_v30, %v83_v22 }
  0x88   :  { %v258_v33 = vsel %vm227_vm1, %v96_v31, %v117_v32 }
  0x89   :  { %367 = vmatprep.subr.bf16.mxu0 %v258_v33 }
  0x8a   :  { %v87_v34 = vpop.permute.xlu0 %86  ;;  %v3208_v35 = vpop.permute.xlu1 %88 }
  0x8b   :  { %v98_v44 = vsel %vm94_vm2, %v87_v34, %v3208_v35  ;;  %v97_v46 = vsel %vm94_vm2, %v85_v27, %v87_v34 }
  0x8e   :  { %v102_v36 = vpop.permute.xlu0 %101  ;;  %v108_v37 = vpop.permute.xlu1 %107 }
  0x8f   :  { %v116_v39 = vsel %vm115_vm3, %v102_v36, %v104_v28  ;;  %v118_v41 = vsel %vm115_vm3, %v106_v29, %v108_v37 }
  0x90   :  { %v254_v40 = vsel %vm227_vm1, %v95_v38, %v116_v39  ;;  %v262_v48 = vsel %vm227_vm1, %v97_v46, %v118_v41  ;;  %v3266_v39 = vld [vmem:[%s4292_s1] sm:$0xff]  }
  0x91   :  { %368 = vmatpush1.bf16.msra.mxu0 %v254_v40 }
  0x92   :  { %v3214_v42 = vpop.permute.xlu0 %109  ;;  %v125_v43 = vpop.permute.xlu1 %124 }
  0x93   :  { %v119_v45 = vsel %vm115_vm3, %v108_v37, %v3214_v42 }
  0x94   :  { %v266_v47 = vsel %vm227_vm1, %v98_v44, %v119_v45 }
  0x95   :  { %410 = vmatprep.subr.bf16.mxu1 %v266_v47 }
  0x96   :  { %v127_v49 = vpop.permute.xlu0 %126  ;;  %411 = vmatpush1.bf16.msra.mxu1 %v262_v48  ;;  %v146_v50 = vpop.permute.xlu1 %145 }
  0x97   :  { %v138_v53 = vsel %vm136_vm4, %v125_v43, %v127_v49 }
  0x9a   :  { %v148_v51 = vpop.permute.xlu0 %147  ;;  %v123_v52 = vpop.permute.xlu1 %122 }
  0x9b   :  { %v159_v54 = vsel %vm157_vm5, %v146_v50, %v148_v51  ;;  %v137_v60 = vsel %vm136_vm4, %v123_v52, %v125_v43 }
  0x9c   :  { %v282_v55 = vsel %vm227_vm1, %v138_v53, %v159_v54 }
  0x9d   :  { %369 = vmatprep.subr.bf16.mxu0 %v282_v55 }
  0x9e   :  { %v129_v56 = vpop.permute.xlu0 %128  ;;  %v3226_v57 = vpop.permute.xlu1 %130 }
  0x9f   :  { %v140_v2 = vsel %vm136_vm4, %v129_v56, %v3226_v57  ;;  %v139_v4 = vsel %vm136_vm4, %v127_v49, %v129_v56 }
  0xa2   :  { %v144_v58 = vpop.permute.xlu0 %143  ;;  %v150_v59 = vpop.permute.xlu1 %149 }
  0xa3   :  { %v158_v61 = vsel %vm157_vm5, %v144_v58, %v146_v50  ;;  %v160_v63 = vsel %vm157_vm5, %v148_v51, %v150_v59 }
  0xa4   :  { %v278_v62 = vsel %vm227_vm1, %v137_v60, %v158_v61  ;;  %v286_v6 = vsel %vm227_vm1, %v139_v4, %v160_v63 }
  0xa5   :  { %370 = vmatpush1.bf16.msra.mxu0 %v278_v62 }
  0xa6   :  { %v3232_v0 = vpop.permute.xlu0 %151  ;;  %v167_v1 = vpop.permute.xlu1 %166 }
  0xa7   :  { %v161_v3 = vsel %vm157_vm5, %v150_v59, %v3232_v0 }
  0xa8   :  { %v290_v5 = vsel %vm227_vm1, %v140_v2, %v161_v3 }
  0xa9   :  { %412 = vmatprep.subr.bf16.mxu1 %v290_v5 }
  0xaa   :  { %v169_v10 = vpop.permute.xlu0 %168  ;;  %413 = vmatpush1.bf16.msra.mxu1 %v286_v6  ;;  %v188_v11 = vpop.permute.xlu1 %187 }
  0xab   :  { %v180_v14 = vsel %vm178_vm6, %v167_v1, %v169_v10 }
  0xae   :  { %v190_v12 = vpop.permute.xlu0 %189  ;;  %v165_v13 = vpop.permute.xlu1 %164 }
  0xaf   :  { %v201_v15 = vsel %vm199_vm7, %v188_v11, %v190_v12  ;;  %v179_v22 = vsel %vm178_vm6, %v165_v13, %v167_v1 }
  0xb0   :  { %v306_v16 = vsel %vm227_vm1, %v180_v14, %v201_v15 }
  0xb1   :  { %371 = vmatprep.subr.bf16.mxu0 %v306_v16 }
  0xb2   :  { %v171_v17 = vpop.permute.xlu0 %170  ;;  %v3244_v18 = vpop.permute.xlu1 %172 }
  0xb3   :  { %v182_v28 = vsel %vm178_vm6, %v171_v17, %v3244_v18  ;;  %v181_v30 = vsel %vm178_vm6, %v169_v10, %v171_v17 }
  0xb6   :  { %v186_v19 = vpop.permute.xlu0 %185  ;;  %v192_v20 = vpop.permute.xlu1 %191 }
  0xb7   :  { %v200_v23 = vsel %vm199_vm7, %v186_v19, %v188_v11  ;;  %v202_v25 = vsel %vm199_vm7, %v190_v12, %v192_v20 }
  0xb8   :  { %v302_v24 = vsel %vm227_vm1, %v179_v22, %v200_v23  ;;  %v310_v32 = vsel %vm227_vm1, %v181_v30, %v202_v25 }
  0xb9   :  { %372 = vmatpush1.bf16.msra.mxu0 %v302_v24 }
  0xba   :  { %v3250_v26 = vpop.permute.xlu0 %193  ;;  %v207_v27 = vpop.permute.xlu1 %206 }
  0xbb   :  { %v203_v29 = vsel %vm199_vm7, %v192_v20, %v3250_v26 }
  0xbc   :  { %v314_v31 = vsel %vm227_vm1, %v182_v28, %v203_v29 }
  0xbd   :  { %414 = vmatprep.subr.bf16.mxu1 %v314_v31 }
  0xbe   :  { %v209_v33 = vpop.permute.xlu0 %208  ;;  %415 = vmatpush1.bf16.msra.mxu1 %v310_v32  ;;  %v211_v34 = vpop.permute.xlu1 %210 }
  0xbf   :  { %v222_v36 = vsel %vm220_vm8, %v209_v33, %v211_v34  ;;  %v221_v37 = vsel %vm220_vm8, %v207_v27, %v209_v33 }
  0xc0   :  { %2558 = vmatprep.subr.msk.bf16.mxu0 %vm227_vm1, %v222_v36  ;;  %v348_v38 = vsel %vm227_vm1, %v221_v37, 0 }
  0xc1   :  { %374 = vmatpush1.bf16.msra.mxu0 %v348_v38 }
  0xc2   :  { %v213_v40 = vpop.permute.xlu0 %212  ;;  %v215_v41 = vpop.permute.xlu1 %214 }
  0xc3   :  { %v224_v43 = vsel %vm220_vm8, %v213_v40, %v215_v41  ;;  %v223_v44 = vsel %vm220_vm8, %v211_v34, %v213_v40 }
  0xc4   :  { %2559 = vmatmul.mubr.msk.bf16.vlgmr.msra.gmra.mrb[0].mxu0 %vm343_vm9, %v3266_v39  ;;  %2560 = vmatprep.subr.msk.bf16.mxu1 %vm227_vm1, %v224_v43  ;;  %v354_v45 = vsel %vm227_vm1, %v223_v44, 0 }
  0xc5   :  { %417 = vmatpush1.bf16.msra.mxu1 %v354_v45  ;;  %483 = vmatprep.mubr.bf16.mxu0 %v2992_v8 }
  0xc6   :  { %v70_v46 = vpop.permute.xlu0 %69  ;;  %v72_v47 = vpop.permute.xlu1 %71 }
  0xc7   :  { %v78_v48 = vsel %vm73_vm0, %v3196_v21, %v70_v46  ;;  %v79_v49 = vsel %vm73_vm0, %v70_v46, %v72_v47 }
  0xc8   :  { %2561 = vmatmul.mubr.msk.bf16.vlgmr.msra.gmra.mrb[0].mxu1 %vm343_vm9, %v3266_v39  ;;  %v250_v50 = vsel %vm227_vm1, %v3155_v9, %v79_v49  ;;  %v246_v51 = vsel %vm227_vm1, %v3077_v7, %v78_v48 }
  0xc9   :  { %451 = vmatprep.subr.bf16.mxu0 %v250_v50 }
  0xca   :  { %v91_v52 = vpop.permute.xlu0 %90  ;;  %452 = vmatpush1.bf16.msra.mxu0 %v246_v51  ;;  %v93_v53 = vpop.permute.xlu1 %92 }
  0xcb   :  { %v100_v54 = vsel %vm94_vm2, %v91_v52, %v93_v53  ;;  %v99_v21 = vsel %vm94_vm2, %v3208_v35, %v91_v52 }
  0xce   :  { %v112_v55 = vpop.permute.xlu0 %111  ;;  %v114_v56 = vpop.permute.xlu1 %113 }
  0xcf   :  { %v120_v58 = vsel %vm115_vm3, %v3214_v42, %v112_v55  ;;  %v121_v59 = vsel %vm115_vm3, %v112_v55, %v114_v56 }
  0xd0   :  { %v274_v9 = vsel %vm227_vm1, %v100_v54, %v121_v59  ;;  %v270_v7 = vsel %vm227_vm1, %v99_v21, %v120_v58 }
  0xd1   :  { %453 = vmatprep.subr.bf16.mxu0 %v274_v9 }
  0xd2   :  { %v133_v60 = vpop.permute.xlu0 %132  ;;  %454 = vmatpush1.bf16.msra.mxu0 %v270_v7  ;;  %v135_v61 = vpop.permute.xlu1 %134 }
  0xd3   :  { %v142_v62 = vsel %vm136_vm4, %v133_v60, %v135_v61  ;;  %v141_v35 = vsel %vm136_vm4, %v3226_v57, %v133_v60 }
  0xd6   :  { %v154_v63 = vpop.permute.xlu0 %153  ;;  %v156_v1 = vpop.permute.xlu1 %155 }
  0xd7   :  { %v162_v42 = vsel %vm157_vm5, %v3232_v0, %v154_v63  ;;  %v163_v2 = vsel %vm157_vm5, %v154_v63, %v156_v1 }
  0xd8   :  { %v298_v3 = vsel %vm227_vm1, %v142_v62, %v163_v2  ;;  %v294_v4 = vsel %vm227_vm1, %v141_v35, %v162_v42 }
  0xd9   :  { %455 = vmatprep.subr.bf16.mxu0 %v298_v3 }
  0xda   :  { %v175_v5 = vpop.permute.xlu0 %174  ;;  %456 = vmatpush1.bf16.msra.mxu0 %v294_v4  ;;  %v177_v6 = vpop.permute.xlu1 %176 }
  0xdb   :  { %v184_v10 = vsel %vm178_vm6, %v175_v5, %v177_v6  ;;  %v183_v57 = vsel %vm178_vm6, %v3244_v18, %v175_v5 }
  0xde   :  { %v196_v11 = vpop.permute.xlu0 %195  ;;  %v198_v12 = vpop.permute.xlu1 %197 }
  0xdf   :  { %v204_v0 = vsel %vm199_vm7, %v3250_v26, %v196_v11  ;;  %v205_v13 = vsel %vm199_vm7, %v196_v11, %v198_v12 }
  0xe0   :  { %v322_v14 = vsel %vm227_vm1, %v184_v10, %v205_v13  ;;  %v318_v15 = vsel %vm227_vm1, %v183_v57, %v204_v0 }
  0xe1   :  { %457 = vmatprep.subr.bf16.mxu0 %v322_v14  ;;  %v3371_v14 = vld [vmem:[%s4294_s3 + $0x4] ss:$8 sps:$4 sm:$0xff]  }
  0xe2   :  { %v217_v16 = vpop.permute.xlu0 %216  ;;  %458 = vmatpush1.bf16.msra.mxu0 %v318_v15  ;;  %v219_v17 = vpop.permute.xlu1 %218  ;;  %v722_v15 = vld [vmem:[%s4295_s4] sm:$0xff] }
  0xe3   :  { %v225_v19 = vsel %vm220_vm8, %v215_v41, %v217_v16  ;;  %v226_v20 = vsel %vm220_vm8, %v217_v16, %v219_v17  ;;  %v723_v16 = vld [vmem:[%s4295_s4 + $0x8] sm:$0xff]  ;;  %v724_v17 = vld [vmem:[%s4295_s4 + $0x10] sm:$0xff] }
  0xe4   :  { %2562 = vmatprep.subr.msk.bf16.mxu0 %vm227_vm1, %v226_v20  ;;  %v360_v18 = vsel %vm227_vm1, %v225_v19, 0  ;;  %v725_v19 = vld [vmem:[%s4295_s4 + $0x18] sm:$0xff] }
  0xe6   :  { %460 = vmatpush1.bf16.msra.mxu0 %v360_v18 }
  0xe9   :  { %2563 = vmatmul.mubr.msk.bf16.vlgmr.msra.gmra.mrb[4].mxu0 %vm343_vm9, %v3266_v39 }
  0xf3   :  { %v3314_v22 = vpop.permute.xlu0 %330  ;;  %v3316_v24 = vpop.permute.xlu1 %335 }
 0x197   :  { %v399_v23 = vpop.f32.mrb[0].mxu0 }
 0x198   :  { %v400_v25 = vadd.f32 %v399_v23, %v3314_v22  ;;  %v401_v26 = vpop.f32.mrb[1].mxu0 }
 0x199   :  { %v402_v27 = vadd.f32 %v401_v26, %v3314_v22  ;;  %v403_v28 = vpop.f32.mrb[2].mxu0 }
 0x19a   :  { %v506_v29 = vmul.f32 0.2, %v400_v25  ;;  %v404_v30 = vadd.f32 %v403_v28, %v3316_v24  ;;  %v405_v31 = vpop.f32.mrb[3].mxu0  ;;  %vm494_vm10 = vcmp.gt.f32.partialorder %v400_v25, 0.0 }
 0x19b   :  { %v507_v32 = vmul.f32 0.2, %v402_v27  ;;  %v406_v33 = vadd.f32 %v405_v31, %v3316_v24  ;;  %v442_v34 = vpop.f32.mrb[0].mxu1  ;;  %vm495_vm11 = vcmp.gt.f32.partialorder %v402_v27, 0.0 }
 0x19c   :  { %vm500_vm12 = vcmp.gt.f32.partialorder %v404_v30, 0.0  ;;  %v512_v36 = vmul.f32 0.2, %v404_v30  ;;  %v443_v37 = vadd.f32 %v442_v34, %v3314_v22  ;;  %v444_v38 = vpop.f32.mrb[1].mxu1  ;;  %v518_v43 = vsel %vm494_vm10, %v400_v25, %v506_v29 }
 0x19d   :  { %vm501_vm13 = vcmp.gt.f32.partialorder %v406_v33, 0.0  ;;  %v513_v39 = vmul.f32 0.2, %v406_v33  ;;  %v445_v40 = vadd.f32 %v444_v38, %v3314_v22  ;;  %v446_v41 = vpop.f32.mrb[2].mxu1  ;;  %v519_v48 = vsel %vm495_vm11, %v402_v27, %v507_v32 }
 0x19e   :  { %v524_v44 = vsel %vm500_vm12, %v404_v30, %v512_v36  ;;  %v508_v45 = vmul.f32 0.2, %v443_v37  ;;  %v447_v46 = vadd.f32 %v446_v41, %v3316_v24  ;;  %v448_v47 = vpop.f32.mrb[3].mxu1  ;;  %vm496_vm14 = vcmp.gt.f32.partialorder %v443_v37, 0.0 }
 0x19f   :  { %v530_v49 = vpack.c.bf16 %v524_v44, %v518_v43  ;;  %v525_v50 = vsel %vm501_vm13, %v406_v33, %v513_v39  ;;  %v509_v53 = vmul.f32 0.2, %v445_v40  ;;  %v449_v54 = vadd.f32 %v448_v47, %v3316_v24 }
 0x1a0   :  { %v3325_v51 = vpack.c.bf16 %v525_v50, %v519_v48  ;;  %vm502_vm15 = vcmp.gt.f32.partialorder %v447_v46, 0.0  ;;  %v514_v52 = vmul.f32 0.2, %v447_v46  ;;  %v520_v55 = vsel %vm496_vm14, %v443_v37, %v508_v45 }
 0x1a1   :  { %542 = vrot.lane.b32.xlu1 %v530_v49, %s2985_s19  ;;  %vm497_vm1 = vcmp.gt.f32.partialorder %v445_v40, 0.0  ;;  %vm503_vm9 = vcmp.gt.f32.partialorder %v449_v54, 0.0  ;;  %v515_v58 = vmul.f32 0.2, %v449_v54  ;;  %vm764_vm14 = vcmask 130048  }
 0x1a2   :  { %v526_v56 = vsel %vm502_vm15, %v447_v46, %v514_v52  ;;  %771 = vmatprep.subr.bf16.mxu1 %v3325_v51  ;;  %v521_v59 = vsel %vm497_vm1, %v445_v40, %v509_v53  ;;  %2568 = vmatprep.mubr.msk.bf16.mxu1 %vm764_vm14, %v3371_v14 }
 0x1a3   :  { %v532_v21 = vpack.c.bf16 %v526_v56, %v520_v55  ;;  %772 = vmatpush1.bf16.msra.mxu1 %v530_v49  ;;  %v527_v9 = vsel %vm503_vm9, %v449_v54, %v515_v58  ;;  %2570 = vmatprep.mubr.msk.bf16.mxu0 %vm764_vm14, %v3371_v14 }
 0x1a4   :  { %v3332_v7 = vpack.c.bf16 %v527_v9, %v521_v59 }
 0x1a5   :  { %546 = vrot.lane.b32.xlu0 %v532_v21, %s2985_s19  ;;  %568 = vrot.lane.b32.xlu1 %v532_v21, %s2986_s20 }
 0x1a6   :  { %824 = vmatprep.subr.bf16.mxu0 %v3332_v7 }
 0x1a7   :  { %825 = vmatpush1.bf16.msra.mxu0 %v532_v21 }
 0x1a9   :  { %564 = vrot.lane.b32.xlu0 %v530_v49, %s2986_s20  ;;  %586 = vrot.lane.b32.xlu1 %v530_v49, %s2987_s21 }
 0x1ad   :  { %590 = vrot.lane.b32.xlu0 %v532_v21, %s2987_s21  ;;  %612 = vrot.lane.b32.xlu1 %v532_v21, %s2988_s22 }
 0x1b1   :  { %608 = vrot.lane.b32.xlu0 %v530_v49, %s2988_s22  ;;  %630 = vrot.lane.b32.xlu1 %v530_v49, %s2989_s23 }
 0x1b5   :  { %634 = vrot.lane.b32.xlu0 %v532_v21, %s2989_s23  ;;  %656 = vrot.lane.b32.xlu1 %v532_v21, %s2990_s24 }
 0x1b9   :  { %652 = vrot.lane.b32.xlu0 %v530_v49, %s2990_s24  ;;  %674 = vrot.lane.b32.xlu1 %v530_v49, %s2991_s25 }
 0x1bc   :  { %v485_v60 = vpop.f32.mrb[4].mxu0 }
 0x1bd   :  { %v486_v61 = vadd.f32 %v485_v60, %v3314_v22  ;;  %v487_v62 = vpop.f32.mrb[5].mxu0  ;;  %678 = vrot.lane.b32.xlu0 %v532_v21, %s2991_s25  ;;  %544 = vrot.lane.b32.xlu1 %v3325_v51, %s2985_s19 }
 0x1be   :  { %v488_v63 = vadd.f32 %v487_v62, %v3314_v22  ;;  %v489_v1 = vpop.f32.mrb[6].mxu0 }
 0x1bf   :  { %v510_v35 = vmul.f32 0.2, %v486_v61  ;;  %v490_v42 = vadd.f32 %v489_v1, %v3316_v24  ;;  %v491_v2 = vpop.f32.mrb[7].mxu0  ;;  %vm498_vm10 = vcmp.gt.f32.partialorder %v486_v61, 0.0 }
 0x1c0   :  { %v511_v3 = vmul.f32 0.2, %v488_v63  ;;  %v492_v4 = vadd.f32 %v491_v2, %v3316_v24  ;;  %vm499_vm11 = vcmp.gt.f32.partialorder %v488_v63, 0.0 }
 0x1c1   :  { %vm504_vm12 = vcmp.gt.f32.partialorder %v490_v42, 0.0  ;;  %v516_v5 = vmul.f32 0.2, %v490_v42  ;;  %566 = vrot.lane.b32.xlu0 %v3325_v51, %s2986_s20  ;;  %700 = vrot.lane.b32.xlu1 %v532_v21, %s2993_s26  ;;  %v522_v10 = vsel %vm498_vm10, %v486_v61, %v510_v35  ;;  %v3474_v35 = vld [vmem:[%s4294_s3] ss:$8 sps:$4 sm:$0xff]  }
 0x1c2   :  { %vm505_vm13 = vcmp.gt.f32.partialorder %v492_v4, 0.0  ;;  %v517_v6 = vmul.f32 0.2, %v492_v4  ;;  %v523_v12 = vsel %vm499_vm11, %v488_v63, %v511_v3 }
 0x1c3   :  { %v528_v11 = vsel %vm504_vm12, %v490_v42, %v516_v5 }
 0x1c4   :  { %v3355_v57 = vpack.c.bf16 %v528_v11, %v522_v10  ;;  %v529_v0 = vsel %vm505_vm13, %v492_v4, %v517_v6  ;;  %v3481_v4 = vld [vmem:[%s4294_s3 + $0x14] ss:$8 sps:$4 sm:$0xff]  }
 0x1c5   :  { %v535_v13 = vpack.c.bf16 %v529_v0, %v523_v12  ;;  %696 = vrot.lane.b32.xlu0 %v530_v49, %s2993_s26  ;;  %588 = vrot.lane.b32.xlu1 %v3325_v51, %s2987_s21 }
 0x1c9   :  { %610 = vrot.lane.b32.xlu0 %v3325_v51, %s2988_s22  ;;  %632 = vrot.lane.b32.xlu1 %v3325_v51, %s2989_s23 }
 0x1cd   :  { %654 = vrot.lane.b32.xlu0 %v3325_v51, %s2990_s24  ;;  %676 = vrot.lane.b32.xlu1 %v3325_v51, %s2991_s25 }
 0x1d1   :  { %698 = vrot.lane.b32.xlu0 %v3325_v51, %s2993_s26  ;;  %548 = vrot.lane.b32.xlu1 %v3332_v7, %s2985_s19 }
 0x1d5   :  { %570 = vrot.lane.b32.xlu0 %v3332_v7, %s2986_s20  ;;  %592 = vrot.lane.b32.xlu1 %v3332_v7, %s2987_s21 }
 0x1d9   :  { %614 = vrot.lane.b32.xlu0 %v3332_v7, %s2988_s22  ;;  %572 = vrot.lane.b32.xlu1 %v3355_v57, %s2986_s20 }
 0x1dd   :  { %550 = vrot.lane.b32.xlu0 %v3355_v57, %s2985_s19  ;;  %616 = vrot.lane.b32.xlu1 %v3355_v57, %s2988_s22 }
 0x1e1   :  { %594 = vrot.lane.b32.xlu0 %v3355_v57, %s2987_s21  ;;  %552 = vrot.lane.b32.xlu1 %v535_v13, %s2985_s19 }
 0x1e5   :  { %638 = vrot.lane.b32.xlu0 %v3355_v57, %s2989_s23  ;;  %636 = vrot.lane.b32.xlu1 %v3332_v7, %s2989_s23 }
 0x1e9   :  { %574 = vrot.lane.b32.xlu0 %v535_v13, %s2986_s20  ;;  %596 = vrot.lane.b32.xlu1 %v535_v13, %s2987_s21 }
 0x1ed   :  { %658 = vrot.lane.b32.xlu0 %v3332_v7, %s2990_s24  ;;  %660 = vrot.lane.b32.xlu1 %v3355_v57, %s2990_s24 }
 0x1f1   :  { %618 = vrot.lane.b32.xlu0 %v535_v13, %s2988_s22  ;;  %640 = vrot.lane.b32.xlu1 %v535_v13, %s2989_s23 }
 0x1f5   :  { %682 = vrot.lane.b32.xlu0 %v3355_v57, %s2991_s25  ;;  %680 = vrot.lane.b32.xlu1 %v3332_v7, %s2991_s25 }
 0x1f9   :  { %662 = vrot.lane.b32.xlu0 %v535_v13, %s2990_s24  ;;  %684 = vrot.lane.b32.xlu1 %v535_v13, %s2991_s25 }
 0x1fd   :  { %702 = vrot.lane.b32.xlu0 %v3332_v7, %s2993_s26  ;;  %704 = vrot.lane.b32.xlu1 %v3355_v57, %s2993_s26 }
 0x201   :  { %706 = vrot.lane.b32.xlu0 %v535_v13, %s2993_s26  ;;  %728 = vperm.xlu1 %2822, %v722_v15  }
 0x205   :  { %733 = vperm.xlu0 %2821, %v723_v16   ;;  %738 = vperm.xlu1 %2822, %v724_v17  }
 0x209   :  { %743 = vperm.xlu0 %2821, %v725_v19  }
 0x213   :  { %v543_v20 = vpop.permute.xlu1 %542 }
 0x217   :  { %v3431_v18 = vpop.permute.xlu0 %546  ;;  %v3433_v22 = vpop.permute.xlu1 %568 }
 0x21b   :  { %v565_v23 = vpop.permute.xlu0 %564  ;;  %v587_v24 = vpop.permute.xlu1 %586 }
 0x21f   :  { %v3435_v25 = vpop.permute.xlu0 %590  ;;  %v3437_v26 = vpop.permute.xlu1 %612 }
 0x223   :  { %v609_v27 = vpop.permute.xlu0 %608  ;;  %v631_v28 = vpop.permute.xlu1 %630 }
 0x227   :  { %v3439_v29 = vpop.permute.xlu0 %634  ;;  %v3441_v30 = vpop.permute.xlu1 %656 }
 0x22b   :  { %v653_v31 = vpop.permute.xlu0 %652  ;;  %v675_v32 = vpop.permute.xlu1 %674 }
 0x22f   :  { %v3443_v33 = vpop.permute.xlu0 %678  ;;  %v545_v34 = vpop.permute.xlu1 %544 }
 0x230   :  { %v555_v36 = vsel %vm73_vm0, %v545_v34, %v3431_v18  ;;  %v554_v37 = vsel %vm73_vm0, %v543_v20, %v545_v34 }
 0x231   :  { %773 = vmatprep.subr.bf16.mxu1 %v555_v36 }
 0x232   :  { %774 = vmatpush1.bf16.msra.mxu1 %v554_v37 }
 0x233   :  { %v567_v38 = vpop.permute.xlu0 %566  ;;  %v3448_v39 = vpop.permute.xlu1 %700 }
 0x234   :  { %v577_v40 = vsel %vm94_vm2, %v567_v38, %v3433_v22  ;;  %v576_v41 = vsel %vm94_vm2, %v565_v23, %v567_v38 }
 0x235   :  { %775 = vmatprep.subr.bf16.mxu1 %v577_v40 }
 0x236   :  { %776 = vmatpush1.bf16.msra.mxu1 %v576_v41 }
 0x237   :  { %v697_v43 = vpop.permute.xlu0 %696  ;;  %v589_v44 = vpop.permute.xlu1 %588 }
 0x238   :  { %v599_v45 = vsel %vm115_vm3, %v589_v44, %v3435_v25  ;;  %v598_v46 = vsel %vm115_vm3, %v587_v24, %v589_v44 }
 0x239   :  { %777 = vmatprep.subr.bf16.mxu1 %v599_v45 }
 0x23a   :  { %778 = vmatpush1.bf16.msra.mxu1 %v598_v46 }
 0x23b   :  { %v611_v47 = vpop.permute.xlu0 %610  ;;  %v633_v48 = vpop.permute.xlu1 %632 }
 0x23c   :  { %v621_v49 = vsel %vm136_vm4, %v611_v47, %v3437_v26  ;;  %v620_v50 = vsel %vm136_vm4, %v609_v27, %v611_v47  ;;  %v643_v52 = vsel %vm157_vm5, %v633_v48, %v3439_v29  ;;  %v642_v54 = vsel %vm157_vm5, %v631_v28, %v633_v48 }
 0x23d   :  { %779 = vmatprep.subr.bf16.mxu1 %v621_v49 }
 0x23e   :  { %780 = vmatpush1.bf16.msra.mxu1 %v620_v50 }
 0x23f   :  { %v655_v51 = vpop.permute.xlu0 %654  ;;  %v677_v53 = vpop.permute.xlu1 %676  ;;  %781 = vmatprep.subr.bf16.mxu1 %v643_v52 }
 0x240   :  { %v665_v56 = vsel %vm178_vm6, %v655_v51, %v3441_v30  ;;  %v664_v58 = vsel %vm178_vm6, %v653_v31, %v655_v51  ;;  %v687_v9 = vsel %vm199_vm7, %v677_v53, %v3443_v33  ;;  %v686_v60 = vsel %vm199_vm7, %v675_v32, %v677_v53 }
 0x242   :  { %782 = vmatpush1.bf16.msra.mxu1 %v642_v54 }
 0x243   :  { %v699_v55 = vpop.permute.xlu0 %698  ;;  %v549_v21 = vpop.permute.xlu1 %548  ;;  %783 = vmatprep.subr.bf16.mxu1 %v665_v56 }
 0x244   :  { %v709_v62 = vsel %vm220_vm8, %v699_v55, %v3448_v39  ;;  %v708_v1 = vsel %vm220_vm8, %v697_v43, %v699_v55  ;;  %v556_v5 = vsel %vm73_vm0, %v3431_v18, %v549_v21 }
 0x246   :  { %784 = vmatpush1.bf16.msra.mxu1 %v664_v58 }
 0x247   :  { %v571_v59 = vpop.permute.xlu0 %570  ;;  %v593_v7 = vpop.permute.xlu1 %592  ;;  %785 = vmatprep.subr.bf16.mxu1 %v687_v9 }
 0x248   :  { %v578_v0 = vsel %vm94_vm2, %v3433_v22, %v571_v59  ;;  %v600_v17 = vsel %vm115_vm3, %v3435_v25, %v593_v7 }
 0x24a   :  { %786 = vmatpush1.bf16.msra.mxu1 %v686_v60 }
 0x24b   :  { %v615_v61 = vpop.permute.xlu0 %614  ;;  %v573_v63 = vpop.permute.xlu1 %572  ;;  %787 = vmatprep.subr.bf16.mxu1 %v709_v62 }
 0x24c   :  { %v579_v6 = vsel %vm94_vm2, %v571_v59, %v573_v63  ;;  %v622_v23 = vsel %vm136_vm4, %v3437_v26, %v615_v61 }
 0x24e   :  { %788 = vmatpush1.bf16.msra.mxu1 %v708_v1 }
 0x24f   :  { %v551_v42 = vpop.permute.xlu0 %550  ;;  %v617_v2 = vpop.permute.xlu1 %616  ;;  %877 = vmatprep.subr.bf16.mxu1 %v2992_v8 }
 0x250   :  { %v557_v3 = vsel %vm73_vm0, %v549_v21, %v551_v42  ;;  %v623_v19 = vsel %vm136_vm4, %v615_v61, %v617_v2 }
 0x251   :  { %826 = vmatprep.subr.bf16.mxu0 %v557_v3  ;;  %804 = vmatmul.mubr.bf16.vlgmr.msra.gmra.mrb[4].mxu1 %v3474_v35 }
 0x252   :  { %827 = vmatpush1.bf16.msra.mxu0 %v556_v5  ;;  %878 = vmatpush1.bf16.msra.mxu1 %v3355_v57  ;;  %v3498_v57 = vld [vmem:[%s4294_s3 + $0x10] ss:$8 sps:$4 sm:$0xff]  }
 0x253   :  { %v595_v10 = vpop.permute.xlu0 %594  ;;  %828 = vmatprep.subr.bf16.mxu0 %v579_v6  ;;  %v553_v11 = vpop.permute.xlu1 %552  ;;  %879 = vmatprep.subr.bf16.mxu1 %v2992_v8 }
 0x254   :  { %2569 = vmatprep.mubr.msk.bf16.mxu1 %vm764_vm14, %v3481_v4  ;;  %v558_v12 = vsel %vm73_vm0, %v551_v42, %v553_v11  ;;  %v601_v13 = vsel %vm115_vm3, %v593_v7, %v595_v10 }
 0x256   :  { %829 = vmatpush1.bf16.msra.mxu0 %v578_v0  ;;  %880 = vmatpush1.bf16.msra.mxu1 %v558_v12 }
 0x257   :  { %v639_v15 = vpop.permute.xlu0 %638  ;;  %830 = vmatprep.subr.bf16.mxu0 %v601_v13  ;;  %v637_v16 = vpop.permute.xlu1 %636  ;;  %881 = vmatprep.subr.bf16.mxu1 %v2992_v8 }
 0x258   :  { %v645_v24 = vsel %vm157_vm5, %v637_v16, %v639_v15 }
 0x259   :  { %814 = vmatmul.mubr.bf16.gmra.mrb[8].mxu1 %v3498_v57 }
 0x25a   :  { %831 = vmatpush1.bf16.msra.mxu0 %v600_v17  ;;  %2572 = vmatprep.mubr.msk.bf16.mxu1 %vm764_vm14, %v3371_v14  ;;  %v644_v14 = vsel %vm157_vm5, %v3439_v29, %v637_v16 }
 0x25b   :  { %v575_v20 = vpop.permute.xlu0 %574  ;;  %832 = vmatprep.subr.bf16.mxu0 %v623_v19  ;;  %v597_v22 = vpop.permute.xlu1 %596 }
 0x25c   :  { %v580_v18 = vsel %vm94_vm2, %v573_v63, %v575_v20  ;;  %v602_v27 = vsel %vm115_vm3, %v595_v10, %v597_v22 }
 0x25d   :  { %882 = vmatpush1.bf16.msra.mxu1 %v580_v18 }
 0x25e   :  { %833 = vmatpush1.bf16.msra.mxu0 %v622_v23  ;;  %883 = vmatprep.subr.bf16.mxu1 %v2992_v8 }
 0x25f   :  { %v659_v25 = vpop.permute.xlu0 %658  ;;  %834 = vmatprep.subr.bf16.mxu0 %v645_v24  ;;  %v661_v28 = vpop.permute.xlu1 %660 }
 0x260   :  { %v667_v31 = vsel %vm178_vm6, %v659_v25, %v661_v28  ;;  %v666_v36 = vsel %vm178_vm6, %v3441_v30, %v659_v25 }
 0x261   :  { %884 = vmatpush1.bf16.msra.mxu1 %v602_v27 }
 0x262   :  { %835 = vmatpush1.bf16.msra.mxu0 %v644_v14  ;;  %885 = vmatprep.subr.bf16.mxu1 %v2992_v8 }
 0x263   :  { %v619_v26 = vpop.permute.xlu0 %618  ;;  %836 = vmatprep.subr.bf16.mxu0 %v667_v31  ;;  %v641_v34 = vpop.permute.xlu1 %640 }
 0x264   :  { %v624_v32 = vsel %vm136_vm4, %v617_v2, %v619_v26  ;;  %v646_v29 = vsel %vm157_vm5, %v639_v15, %v641_v34 }
 0x265   :  { %886 = vmatpush1.bf16.msra.mxu1 %v624_v32 }
 0x266   :  { %837 = vmatpush1.bf16.msra.mxu0 %v666_v36  ;;  %887 = vmatprep.subr.bf16.mxu1 %v2992_v8 }
 0x267   :  { %v683_v37 = vpop.permute.xlu0 %682  ;;  %v681_v38 = vpop.permute.xlu1 %680 }
 0x268   :  { %v689_v40 = vsel %vm199_vm7, %v681_v38, %v683_v37  ;;  %v688_v41 = vsel %vm199_vm7, %v3443_v33, %v681_v38 }
 0x269   :  { %888 = vmatpush1.bf16.msra.mxu1 %v646_v29  ;;  %838 = vmatprep.subr.bf16.mxu0 %v689_v40 }
 0x26a   :  { %889 = vmatprep.subr.bf16.mxu1 %v2992_v8  ;;  %839 = vmatpush1.bf16.msra.mxu0 %v688_v41 }
 0x26b   :  { %v663_v43 = vpop.permute.xlu0 %662  ;;  %v685_v44 = vpop.permute.xlu1 %684 }
 0x26c   :  { %v668_v30 = vsel %vm178_vm6, %v661_v28, %v663_v43  ;;  %v690_v46 = vsel %vm199_vm7, %v683_v37, %v685_v44 }
 0x26d   :  { %890 = vmatpush1.bf16.msra.mxu1 %v668_v30 }
 0x26e   :  { %891 = vmatprep.subr.bf16.mxu1 %v2992_v8 }
 0x26f   :  { %v703_v45 = vpop.permute.xlu0 %702  ;;  %v705_v47 = vpop.permute.xlu1 %704 }
 0x270   :  { %v710_v48 = vsel %vm220_vm8, %v3448_v39, %v703_v45  ;;  %v711_v33 = vsel %vm220_vm8, %v703_v45, %v705_v47 }
 0x271   :  { %892 = vmatpush1.bf16.msra.mxu1 %v690_v46  ;;  %840 = vmatprep.subr.bf16.mxu0 %v711_v33 }
 0x272   :  { %893 = vmatprep.subr.bf16.mxu1 %v2992_v8  ;;  %841 = vmatpush1.bf16.msra.mxu0 %v710_v48 }
 0x273   :  { %v707_v49 = vpop.permute.xlu0 %706 }
 0x274   :  { %v712_v50 = vsel %vm220_vm8, %v705_v47, %v707_v49 }
 0x275   :  { %894 = vmatpush1.bf16.msra.mxu1 %v712_v50  ;;  %857 = vmatmul.mubr.bf16.vlgmr.msra.gmra.mrb[8].mxu0 %v3474_v35 }
 0x276   :  { %2571 = vmatprep.mubr.msk.bf16.mxu0 %vm764_vm14, %v3481_v4 }
 0x278   :  { %910 = vmatmul.mubr.bf16.vlgmr.msra.gmra.mrb[12].mxu1 %v3474_v35 }
 0x279   :  { %2573 = vmatprep.mubr.msk.bf16.mxu1 %vm764_vm14, %v3481_v4 }
 0x27d   :  { %867 = vmatmul.mubr.bf16.gmra.mrb[12].mxu0 %v3498_v57 }
 0x280   :  { %918 = vmatmul.mubr.bf16.gmra.mrb[16].mxu1 %v3498_v57  ;;  %v3542_v39 = vpop.permute.xlu1 %728 }
 0x284   :  { %v3545_v54 = vpop.permute.xlu0 %733  ;;  %v3550_v1 = vpop.permute.xlu1 %738 }
 0x288   :  { %v3557_v10 = vpop.permute.xlu0 %743 }
 0x324   :  { %v805_v51 = vpop.f32.mrb[4].mxu1 }
 0x325   :  { %v806_v52 = vadd.f32 %v805_v51, %v3542_v39  ;;  %v807_v53 = vpop.f32.mrb[5].mxu1 }
 0x326   :  { %v808_v55 = vadd.f32 %v807_v53, %v3542_v39  ;;  %v809_v56 = vpop.f32.mrb[6].mxu1 }
 0x327   :  { %v946_v21 = vmul.f32 0.2, %v806_v52  ;;  %v810_v58 = vadd.f32 %v809_v56, %v3545_v54  ;;  %v811_v59 = vpop.f32.mrb[7].mxu1  ;;  %vm926_vm15 = vcmp.gt.f32.partialorder %v806_v52, 0.0 }
 0x328   :  { %v947_v9 = vmul.f32 0.2, %v808_v55  ;;  %v812_v7 = vadd.f32 %v811_v59, %v3545_v54  ;;  %vm927_vm1 = vcmp.gt.f32.partialorder %v808_v55, 0.0 }
 0x329   :  { %vm931_vm9 = vcmp.gt.f32.partialorder %v810_v58, 0.0  ;;  %v951_v60 = vmul.f32 0.2, %v810_v58  ;;  %v966_v62 = vsel %vm926_vm15, %v806_v52, %v946_v21 }
 0x32a   :  { %vm932_vm10 = vcmp.gt.f32.partialorder %v812_v7, 0.0  ;;  %v952_v61 = vmul.f32 0.2, %v812_v7  ;;  %v967_v35 = vsel %vm927_vm1, %v808_v55, %v947_v9 }
 0x32b   :  { %v971_v63 = vsel %vm931_vm9, %v810_v58, %v951_v60 }
 0x32c   :  { %v3552_v42 = vpack.c.bf16 %v971_v63, %v966_v62  ;;  %v972_v2 = vsel %vm932_vm10, %v812_v7, %v952_v61  ;;  %v815_v3 = vpop.f32.mrb[8].mxu1 }
 0x32d   :  { %v3554_v4 = vpack.c.bf16 %v972_v2, %v967_v35  ;;  %v816_v5 = vadd.f32 %v815_v3, %v3550_v1  ;;  %v817_v6 = vpop.f32.mrb[9].mxu1 }
 0x32e   :  { %v818_v11 = vadd.f32 %v817_v6, %v3550_v1  ;;  %v819_v12 = vpop.f32.mrb[10].mxu1  ;;  %1006 = vrot.lane.b32.xlu1 %v3552_v42, %s2985_s19 }
 0x32f   :  { %v956_v0 = vmul.f32 0.2, %v816_v5  ;;  %v820_v13 = vadd.f32 %v819_v12, %v3557_v10  ;;  %v821_v57 = vpop.f32.mrb[11].mxu1  ;;  %1431 = vmatprep.subr.bf16.mxu0 %v3554_v4  ;;  %vm936_vm11 = vcmp.gt.f32.partialorder %v816_v5, 0.0 }
 0x330   :  { %v957_v15 = vmul.f32 0.2, %v818_v11  ;;  %v822_v16 = vadd.f32 %v821_v57, %v3557_v10  ;;  %1432 = vmatpush1.bf16.msra.mxu0 %v3552_v42  ;;  %vm937_vm12 = vcmp.gt.f32.partialorder %v818_v11, 0.0 }
 0x331   :  { %vm941_vm13 = vcmp.gt.f32.partialorder %v820_v13, 0.0  ;;  %v961_v17 = vmul.f32 0.2, %v820_v13  ;;  %v976_v20 = vsel %vm936_vm11, %v816_v5, %v956_v0 }
 0x332   :  { %vm942_vm14 = vcmp.gt.f32.partialorder %v822_v16, 0.0  ;;  %v962_v19 = vmul.f32 0.2, %v822_v16  ;;  %1042 = vrot.lane.b32.xlu1 %v3552_v42, %s2986_s20  ;;  %v977_v22 = vsel %vm937_vm12, %v818_v11, %v957_v15 }
 0x333   :  { %v981_v18 = vsel %vm941_vm13, %v820_v13, %v961_v17 }
 0x334   :  { %v3568_v23 = vpack.c.bf16 %v981_v18, %v976_v20  ;;  %v982_v24 = vsel %vm942_vm14, %v822_v16, %v962_v19 }
 0x335   :  { %v3570_v25 = vpack.c.bf16 %v982_v24, %v977_v22 }
 0x336   :  { %1016 = vrot.lane.b32.xlu0 %v3568_v23, %s2985_s19  ;;  %1078 = vrot.lane.b32.xlu1 %v3552_v42, %s2987_s21 }
 0x337   :  { %1433 = vmatprep.subr.bf16.mxu0 %v3570_v25 }
 0x338   :  { %1434 = vmatpush1.bf16.msra.mxu0 %v3568_v23 }
 0x33a   :  { %1052 = vrot.lane.b32.xlu0 %v3568_v23, %s2986_s20  ;;  %1114 = vrot.lane.b32.xlu1 %v3552_v42, %s2988_s22 }
 0x33e   :  { %1088 = vrot.lane.b32.xlu0 %v3568_v23, %s2987_s21  ;;  %1150 = vrot.lane.b32.xlu1 %v3552_v42, %s2989_s23 }
 0x342   :  { %1124 = vrot.lane.b32.xlu0 %v3568_v23, %s2988_s22  ;;  %1008 = vrot.lane.b32.xlu1 %v3554_v4, %s2985_s19 }
 0x346   :  { %1160 = vrot.lane.b32.xlu0 %v3568_v23, %s2989_s23  ;;  %1044 = vrot.lane.b32.xlu1 %v3554_v4, %s2986_s20 }
 0x348   :  { %v858_v27 = vpop.f32.mrb[8].mxu0 }
 0x349   :  { %v859_v28 = vadd.f32 %v858_v27, %v3542_v39  ;;  %v860_v14 = vpop.f32.mrb[9].mxu0 }
 0x34a   :  { %v861_v31 = vadd.f32 %v860_v14, %v3542_v39  ;;  %v862_v26 = vpop.f32.mrb[10].mxu0  ;;  %1018 = vrot.lane.b32.xlu0 %v3570_v25, %s2985_s19  ;;  %1080 = vrot.lane.b32.xlu1 %v3554_v4, %s2987_s21 }
 0x34b   :  { %v911_v32 = vpop.f32.mrb[12].mxu1  ;;  %v948_v34 = vmul.f32 0.2, %v859_v28  ;;  %v863_v36 = vadd.f32 %v862_v26, %v3545_v54  ;;  %v864_v37 = vpop.f32.mrb[11].mxu0  ;;  %vm928_vm15 = vcmp.gt.f32.partialorder %v859_v28, 0.0 }
 0x34c   :  { %v912_v29 = vadd.f32 %v911_v32, %v3542_v39  ;;  %v913_v38 = vpop.f32.mrb[13].mxu1  ;;  %v949_v40 = vmul.f32 0.2, %v861_v31  ;;  %v865_v41 = vadd.f32 %v864_v37, %v3545_v54  ;;  %vm929_vm1 = vcmp.gt.f32.partialorder %v861_v31, 0.0 }
 0x34d   :  { %v914_v43 = vpop.f32.mrb[14].mxu1  ;;  %vm933_vm9 = vcmp.gt.f32.partialorder %v863_v36, 0.0  ;;  %v953_v30 = vmul.f32 0.2, %v863_v36  ;;  %v968_v47 = vsel %vm928_vm15, %v859_v28, %v948_v34 }
 0x34e   :  { %v916_v44 = vpop.f32.mrb[15].mxu1  ;;  %vm934_vm10 = vcmp.gt.f32.partialorder %v865_v41, 0.0  ;;  %v954_v45 = vmul.f32 0.2, %v865_v41  ;;  %v950_v46 = vmul.f32 0.2, %v912_v29  ;;  %1054 = vrot.lane.b32.xlu0 %v3570_v25, %s2986_s20  ;;  %1116 = vrot.lane.b32.xlu1 %v3554_v4, %s2988_s22  ;;  %v915_v33 = vadd.f32 %v914_v43, %v3545_v54 }
 0x34f   :  { %v973_v48 = vsel %vm933_vm9, %v863_v36, %v953_v30  ;;  %vm930_vm11 = vcmp.gt.f32.partialorder %v912_v29, 0.0  ;;  %v969_v49 = vsel %vm929_vm1, %v861_v31, %v949_v40  ;;  %v2899_v36 = vld [vmem:[%s4296_s5 + $0x4] ss:$12 sps:$4 sm:$0xff]  }
 0x350   :  { %v3608_v50 = vpack.c.bf16 %v973_v48, %v968_v47  ;;  %v974_v39 = vsel %vm934_vm10, %v865_v41, %v954_v45  ;;  %v868_v51 = vpop.f32.mrb[12].mxu0  ;;  %vm935_vm12 = vcmp.gt.f32.partialorder %v915_v33, 0.0  ;;  %v955_v53 = vmul.f32 0.2, %v915_v33  ;;  %1609 = vmatprep.mubr.bf16.mxu1 %v2899_v36  ;;  %1463 = vmatprep.mubr.bf16.mxu0 %v2899_v36 }
 0x351   :  { %v3610_v52 = vpack.c.bf16 %v974_v39, %v969_v49  ;;  %v869_v55 = vadd.f32 %v868_v51, %v3550_v1  ;;  %v870_v56 = vpop.f32.mrb[13].mxu0  ;;  %v970_v21 = vsel %vm930_vm11, %v912_v29, %v950_v46  ;;  %v1312_v49 = vld [vmem:[%s4297_s6 + $0x10] sm:$0xff] }
 0x352   :  { %v871_v58 = vadd.f32 %v870_v56, %v3550_v1  ;;  %v872_v59 = vpop.f32.mrb[14].mxu0  ;;  %1090 = vrot.lane.b32.xlu0 %v3570_v25, %s2987_s21  ;;  %1152 = vrot.lane.b32.xlu1 %v3554_v4, %s2989_s23  ;;  %v975_v9 = vsel %vm935_vm12, %v915_v33, %v955_v53  ;;  %v1314_v53 = vld [vmem:[%s4297_s6 + $0x20] sm:$0xff] }
 0x353   :  { %v919_v54 = vpop.f32.mrb[16].mxu1  ;;  %vm938_vm13 = vcmp.gt.f32.partialorder %v869_v55, 0.0  ;;  %v958_v7 = vmul.f32 0.2, %v869_v55  ;;  %v873_v60 = vadd.f32 %v872_v59, %v3557_v10  ;;  %v874_v61 = vpop.f32.mrb[15].mxu0  ;;  %1577 = vmatprep.subr.bf16.mxu1 %v3610_v52  ;;  %v3620_v63 = vpack.c.bf16 %v975_v9, %v970_v21  ;;  %v1316_v21 = vld [vmem:[%s4297_s6 + $0x30] sm:$0xff] }
 0x354   :  { %v921_v62 = vpop.f32.mrb[17].mxu1  ;;  %vm939_vm14 = vcmp.gt.f32.partialorder %v871_v58, 0.0  ;;  %v959_v35 = vmul.f32 0.2, %v871_v58  ;;  %v875_v2 = vadd.f32 %v874_v61, %v3557_v10  ;;  %1578 = vmatpush1.bf16.msra.mxu1 %v3608_v50  ;;  %v920_v6 = vadd.f32 %v919_v54, %v3550_v1  ;;  %v1315_v54 = vld [vmem:[%s4297_s6 + $0x28] sm:$0xff] }
 0x355   :  { %v922_v3 = vpop.f32.mrb[18].mxu1  ;;  %vm943_vm15 = vcmp.gt.f32.partialorder %v873_v60, 0.0  ;;  %v963_v5 = vmul.f32 0.2, %v873_v60  ;;  %v978_v12 = vsel %vm938_vm13, %v869_v55, %v958_v7 }
 0x356   :  { %v924_v11 = vpop.f32.mrb[19].mxu1  ;;  %vm944_vm1 = vcmp.gt.f32.partialorder %v875_v2, 0.0  ;;  %v964_v0 = vmul.f32 0.2, %v875_v2  ;;  %v923_v13 = vadd.f32 %v922_v3, %v3557_v10  ;;  %1126 = vrot.lane.b32.xlu0 %v3570_v25, %s2988_s22  ;;  %1188 = vrot.lane.b32.xlu1 %v3554_v4, %s2990_s24  ;;  %v979_v57 = vsel %vm939_vm14, %v871_v58, %v959_v35 }
 0x357   :  { %v983_v15 = vsel %vm943_vm15, %v873_v60, %v963_v5  ;;  %vm940_vm9 = vcmp.gt.f32.partialorder %v920_v6, 0.0  ;;  %v960_v16 = vmul.f32 0.2, %v920_v6  ;;  %v1317_v60 = vld [vmem:[%s4297_s6 + $0x38] sm:$0xff] }
 0x358   :  { %v3631_v17 = vpack.c.bf16 %v983_v15, %v978_v12  ;;  %v984_v1 = vsel %vm944_vm1, %v875_v2, %v964_v0  ;;  %vm945_vm10 = vcmp.gt.f32.partialorder %v923_v13, 0.0  ;;  %v965_v19 = vmul.f32 0.2, %v923_v13 }
 0x359   :  { %v3633_v20 = vpack.c.bf16 %v984_v1, %v979_v57  ;;  %v980_v18 = vsel %vm940_vm9, %v920_v6, %v960_v16 }
 0x35a   :  { %v985_v22 = vsel %vm945_vm10, %v923_v13, %v965_v19  ;;  %1162 = vrot.lane.b32.xlu0 %v3570_v25, %s2989_s23  ;;  %1012 = vrot.lane.b32.xlu1 %v3610_v52, %s2985_s19 }
 0x35b   :  { %v3639_v10 = vpack.c.bf16 %v985_v22, %v980_v18  ;;  %1579 = vmatprep.subr.bf16.mxu1 %v3633_v20 }
 0x35c   :  { %1580 = vmatpush1.bf16.msra.mxu1 %v3631_v17 }
 0x35e   :  { %1010 = vrot.lane.b32.xlu0 %v3608_v50, %s2985_s19  ;;  %1048 = vrot.lane.b32.xlu1 %v3610_v52, %s2986_s20 }
 0x362   :  { %1046 = vrot.lane.b32.xlu0 %v3608_v50, %s2986_s20  ;;  %1084 = vrot.lane.b32.xlu1 %v3610_v52, %s2987_s21 }
 0x366   :  { %1082 = vrot.lane.b32.xlu0 %v3608_v50, %s2987_s21  ;;  %1120 = vrot.lane.b32.xlu1 %v3610_v52, %s2988_s22 }
 0x36a   :  { %1118 = vrot.lane.b32.xlu0 %v3608_v50, %s2988_s22  ;;  %1156 = vrot.lane.b32.xlu1 %v3610_v52, %s2989_s23 }
 0x36e   :  { %1154 = vrot.lane.b32.xlu0 %v3608_v50, %s2989_s23  ;;  %1020 = vrot.lane.b32.xlu1 %v3631_v17, %s2985_s19 }
 0x372   :  { %1022 = vrot.lane.b32.xlu0 %v3633_v20, %s2985_s19  ;;  %1056 = vrot.lane.b32.xlu1 %v3631_v17, %s2986_s20 }
 0x376   :  { %1058 = vrot.lane.b32.xlu0 %v3633_v20, %s2986_s20  ;;  %1092 = vrot.lane.b32.xlu1 %v3631_v17, %s2987_s21 }
 0x37a   :  { %1094 = vrot.lane.b32.xlu0 %v3633_v20, %s2987_s21  ;;  %1128 = vrot.lane.b32.xlu1 %v3631_v17, %s2988_s22 }
 0x37e   :  { %1130 = vrot.lane.b32.xlu0 %v3633_v20, %s2988_s22  ;;  %1164 = vrot.lane.b32.xlu1 %v3631_v17, %s2989_s23 }
 0x382   :  { %1166 = vrot.lane.b32.xlu0 %v3633_v20, %s2989_s23  ;;  %1192 = vrot.lane.b32.xlu1 %v3610_v52, %s2990_s24 }
 0x386   :  { %1014 = vrot.lane.b32.xlu0 %v3620_v63, %s2985_s19  ;;  %1024 = vrot.lane.b32.xlu1 %v3639_v10, %s2985_s19 }
 0x38a   :  { %1190 = vrot.lane.b32.xlu0 %v3608_v50, %s2990_s24  ;;  %1186 = vrot.lane.b32.xlu1 %v3552_v42, %s2990_s24 }
 0x38e   :  { %1050 = vrot.lane.b32.xlu0 %v3620_v63, %s2986_s20  ;;  %1060 = vrot.lane.b32.xlu1 %v3639_v10, %s2986_s20 }
 0x392   :  { %1086 = vrot.lane.b32.xlu0 %v3620_v63, %s2987_s21  ;;  %1200 = vrot.lane.b32.xlu1 %v3631_v17, %s2990_s24 }
 0x396   :  { %1122 = vrot.lane.b32.xlu0 %v3620_v63, %s2988_s22  ;;  %1096 = vrot.lane.b32.xlu1 %v3639_v10, %s2987_s21 }
 0x39a   :  { %1158 = vrot.lane.b32.xlu0 %v3620_v63, %s2989_s23  ;;  %1224 = vrot.lane.b32.xlu1 %v3554_v4, %s2991_s25 }
 0x39e   :  { %1194 = vrot.lane.b32.xlu0 %v3620_v63, %s2990_s24  ;;  %1132 = vrot.lane.b32.xlu1 %v3639_v10, %s2988_s22  ;;  %s2995_s22 = smov 122  }
 0x3a0   :  { %v1007_v24 = vpop.permute.xlu1 %1006 }
 0x3a2   :  { %1198 = vrot.lane.b32.xlu0 %v3570_v25, %s2990_s24  ;;  %1228 = vrot.lane.b32.xlu1 %v3610_v52, %s2991_s25 }
 0x3a4   :  { %v3715_v27 = vpop.permute.xlu1 %1042 }
 0x3a6   :  { %1202 = vrot.lane.b32.xlu0 %v3633_v20, %s2990_s24  ;;  %1168 = vrot.lane.b32.xlu1 %v3639_v10, %s2989_s23 }
 0x3a8   :  { %v3721_v28 = vpop.permute.xlu0 %1016  ;;  %v3723_v14 = vpop.permute.xlu1 %1078 }
 0x3aa   :  { %1196 = vrot.lane.b32.xlu0 %v3568_v23, %s2990_s24  ;;  %1222 = vrot.lane.b32.xlu1 %v3552_v42, %s2991_s25 }
 0x3ac   :  { %v3729_v31 = vpop.permute.xlu0 %1052  ;;  %v3731_v26 = vpop.permute.xlu1 %1114 }
 0x3ae   :  { %1226 = vrot.lane.b32.xlu0 %v3608_v50, %s2991_s25  ;;  %1204 = vrot.lane.b32.xlu1 %v3639_v10, %s2990_s24 }
 0x3b0   :  { %v3737_v32 = vpop.permute.xlu0 %1088  ;;  %v3739_v34 = vpop.permute.xlu1 %1150 }
 0x3b2   :  { %1230 = vrot.lane.b32.xlu0 %v3620_v63, %s2991_s25  ;;  %1236 = vrot.lane.b32.xlu1 %v3631_v17, %s2991_s25 }
 0x3b4   :  { %v3748_v37 = vpop.permute.xlu0 %1124  ;;  %v1009_v29 = vpop.permute.xlu1 %1008 }
 0x3b5   :  { %v1026_v51 = vsel %vm73_vm0, %v1007_v24, %v1009_v29 }
 0x3b6   :  { %1234 = vrot.lane.b32.xlu0 %v3570_v25, %s2991_s25  ;;  %1240 = vrot.lane.b32.xlu1 %v3639_v10, %s2991_s25 }
 0x3b8   :  { %v3754_v38 = vpop.permute.xlu0 %1160  ;;  %v1045_v40 = vpop.permute.xlu1 %1044 }
 0x3b9   :  { %v1062_v6 = vsel %vm94_vm2, %v3715_v27, %v1045_v40 }
 0x3ba   :  { %1238 = vrot.lane.b32.xlu0 %v3633_v20, %s2991_s25  ;;  %1260 = vrot.lane.b32.xlu1 %v3554_v4, %s2993_s26 }
 0x3bc   :  { %v1019_v41 = vpop.permute.xlu0 %1018  ;;  %v3760_v43 = vpop.permute.xlu1 %1080 }
 0x3bd   :  { %v1030_v35 = vsel %vm73_vm0, %v3721_v28, %v1019_v41 }
 0x3be   :  { %1232 = vrot.lane.b32.xlu0 %v3568_v23, %s2991_s25  ;;  %1264 = vrot.lane.b32.xlu1 %v3610_v52, %s2993_s26  ;;  %v1311_v52 = vld [vmem:[%s4297_s6 + $0x8] sm:$0xff] }
 0x3c0   :  { %v1055_v30 = vpop.permute.xlu0 %1054  ;;  %v3766_v44 = vpop.permute.xlu1 %1116 }
 0x3c1   :  { %v1066_v13 = vsel %vm94_vm2, %v3729_v31, %v1055_v30  ;;  %v1134_v27 = vsel %vm136_vm4, %v3731_v26, %v3766_v44 }
 0x3c2   :  { %1262 = vrot.lane.b32.xlu0 %v3608_v50, %s2993_s26  ;;  %1258 = vrot.lane.b32.xlu1 %v3552_v42, %s2993_s26  ;;  %v1310_v42 = vld [vmem:[%s4297_s6] sm:$0xff] }
 0x3c4   :  { %v3772_v45 = vpop.permute.xlu0 %1090  ;;  %v3774_v4 = vpop.permute.xlu1 %1152 }
 0x3c5   :  { %v1102_v18 = vsel %vm115_vm3, %v3737_v32, %v3772_v45 }
 0x3c6   :  { %1266 = vrot.lane.b32.xlu0 %v3620_v63, %s2993_s26  ;;  %1272 = vrot.lane.b32.xlu1 %v3631_v17, %s2993_s26  ;;  %v1098_v17 = vsel %vm115_vm3, %v3723_v14, %v3760_v43 }
 0x3c8   :  { %v3780_v46 = vpop.permute.xlu0 %1126  ;;  %v3782_v47 = vpop.permute.xlu1 %1188 }
 0x3c9   :  { %v1138_v36 = vsel %vm136_vm4, %v3748_v37, %v3780_v46  ;;  %v1170_v37 = vsel %vm157_vm5, %v3739_v34, %v3774_v4 }
 0x3ca   :  { %1270 = vrot.lane.b32.xlu0 %v3570_v25, %s2993_s26  ;;  %1276 = vrot.lane.b32.xlu1 %v3639_v10, %s2993_s26 }
 0x3cc   :  { %v3791_v48 = vpop.permute.xlu0 %1162  ;;  %v3793_v33 = vpop.permute.xlu1 %1012 }
 0x3ce   :  { %1274 = vrot.lane.b32.xlu0 %v3633_v20, %s2993_s26  ;;  %1320 = vperm.xlu1 %2822, %v1310_v42  }
 0x3d0   :  { %v3800_v25 = vpop.permute.xlu0 %1010  ;;  %v3802_v50 = vpop.permute.xlu1 %1048 }
 0x3d1   :  { %v1027_v39 = vsel %vm73_vm0, %v1009_v29, %v3800_v25  ;;  %v1028_v29 = vsel %vm73_vm0, %v3800_v25, %v3793_v33 }
 0x3d2   :  { %1268 = vrot.lane.b32.xlu0 %v3568_v23, %s2993_s26  ;;  %1330 = vperm.xlu1 %2822, %v1312_v49   ;;  %v1313_v23 = vld [vmem:[%s4297_s6 + $0x18] sm:$0xff] }
 0x3d3   :  { %1435 = vmatprep.subr.bf16.mxu0 %v1027_v39 }
 0x3d4   :  { %1436 = vmatpush1.bf16.msra.mxu0 %v1026_v51  ;;  %v3815_v55 = vpop.permute.xlu0 %1046  ;;  %v3817_v56 = vpop.permute.xlu1 %1084 }
 0x3d5   :  { %v1063_v2 = vsel %vm94_vm2, %v1045_v40, %v3815_v55  ;;  %v1064_v34 = vsel %vm94_vm2, %v3815_v55, %v3802_v50 }
 0x3d6   :  { %1325 = vperm.xlu0 %2821, %v1311_v52   ;;  %1340 = vperm.xlu1 %2822, %v1314_v53  }
 0x3d8   :  { %v3825_v58 = vpop.permute.xlu0 %1082  ;;  %v3827_v59 = vpop.permute.xlu1 %1120 }
 0x3d9   :  { %v1099_v57 = vsel %vm115_vm3, %v3760_v43, %v3825_v58  ;;  %v1100_v53 = vsel %vm115_vm3, %v3825_v58, %v3817_v56 }
 0x3da   :  { %1335 = vperm.xlu0 %2821, %v1313_v23   ;;  %1350 = vperm.xlu1 %2822, %v1316_v21  }
 0x3dc   :  { %v3832_v9 = vpop.permute.xlu0 %1118  ;;  %v3834_v7 = vpop.permute.xlu1 %1156 }
 0x3dd   :  { %v1135_v22 = vsel %vm136_vm4, %v3766_v44, %v3832_v9 }
 0x3de   :  { %1345 = vperm.xlu0 %2821, %v1315_v54  }
 0x3e0   :  { %v3839_v61 = vpop.permute.xlu0 %1154  ;;  %v1021_v62 = vpop.permute.xlu1 %1020 }
 0x3e1   :  { %v1031_v63 = vsel %vm73_vm0, %v1019_v41, %v1021_v62  ;;  %v1171_v40 = vsel %vm157_vm5, %v3774_v4, %v3839_v61 }
 0x3e2   :  { %1355 = vperm.xlu0 %2821, %v1317_v60   ;;  %1437 = vmatprep.subr.bf16.mxu0 %v1031_v63 }
 0x3e3   :  { %1438 = vmatpush1.bf16.msra.mxu0 %v1030_v35 }
 0x3e4   :  { %v1023_v3 = vpop.permute.xlu0 %1022  ;;  %v3846_v5 = vpop.permute.xlu1 %1056  ;;  %1439 = vmatprep.subr.bf16.mxu0 %v1063_v2 }
 0x3e5   :  { %v1067_v11 = vsel %vm94_vm2, %v1055_v30, %v3846_v5  ;;  %v1032_v30 = vsel %vm73_vm0, %v1021_v62, %v1023_v3 }
 0x3e7   :  { %1440 = vmatpush1.bf16.msra.mxu0 %v1062_v6 }
 0x3e8   :  { %v1059_v12 = vpop.permute.xlu0 %1058  ;;  %v3852_v0 = vpop.permute.xlu1 %1092  ;;  %1441 = vmatprep.subr.bf16.mxu0 %v1067_v11 }
 0x3e9   :  { %v1103_v1 = vsel %vm115_vm3, %v3772_v45, %v3852_v0 }
 0x3eb   :  { %1442 = vmatpush1.bf16.msra.mxu0 %v1066_v13 }
 0x3ec   :  { %v3859_v15 = vpop.permute.xlu0 %1094  ;;  %v3861_v16 = vpop.permute.xlu1 %1128  ;;  %1443 = vmatprep.subr.bf16.mxu0 %v1099_v57 }
 0x3ed   :  { %v1139_v28 = vsel %vm136_vm4, %v3780_v46, %v3861_v16 }
 0x3ef   :  { %1444 = vmatpush1.bf16.msra.mxu0 %v1098_v17 }
 0x3f0   :  { %v3869_v19 = vpop.permute.xlu0 %1130  ;;  %v3871_v20 = vpop.permute.xlu1 %1164  ;;  %1445 = vmatprep.subr.bf16.mxu0 %v1103_v1 }
 0x3f1   :  { %v1175_v44 = vsel %vm157_vm5, %v3791_v48, %v3871_v20 }
 0x3f3   :  { %1446 = vmatpush1.bf16.msra.mxu0 %v1102_v18 }
 0x3f4   :  { %v3879_v10 = vpop.permute.xlu0 %1166  ;;  %v3881_v24 = vpop.permute.xlu1 %1192  ;;  %1447 = vmatprep.subr.bf16.mxu0 %v1135_v22 }
 0x3f5   :  { %v1176_v57 = vsel %vm157_vm5, %v3871_v20, %v3879_v10 }
 0x3f7   :  { %1448 = vmatpush1.bf16.msra.mxu0 %v1134_v27 }
 0x3f8   :  { %v1015_v14 = vpop.permute.xlu0 %1014  ;;  %v1025_v31 = vpop.permute.xlu1 %1024  ;;  %1449 = vmatprep.subr.bf16.mxu0 %v1139_v28 }
 0x3f9   :  { %v1029_v32 = vsel %vm73_vm0, %v3793_v33, %v1015_v14  ;;  %v1033_v26 = vsel %vm73_vm0, %v1023_v3, %v1025_v31  ;;  %v1174_v33 = vsel %vm157_vm5, %v3754_v38, %v3791_v48  ;;  %v1068_v38 = vsel %vm94_vm2, %v3846_v5, %v1059_v12 }
 0x3fa   :  { %1581 = vmatprep.subr.bf16.mxu1 %v1029_v32  ;;  %v1140_v3 = vsel %vm136_vm4, %v3861_v16, %v3869_v19  ;;  %vm1418_vm0 = vcmask 261120  }
 0x3fb   :  { %1450 = vmatpush1.bf16.msra.mxu0 %v1138_v36  ;;  %1582 = vmatpush1.bf16.msra.mxu1 %v1028_v29 }
 0x3fc   :  { %v3901_v41 = vpop.permute.xlu0 %1190  ;;  %1583 = vmatprep.subr.bf16.mxu1 %v1033_v26  ;;  %v1187_v43 = vpop.permute.xlu1 %1186  ;;  %1451 = vmatprep.subr.bf16.mxu0 %v1171_v40  ;;  %v2897_v26 = vld [vmem:[%s4296_s5] ss:$12 sps:$4 sm:$0xff]   ;;  %v2900_v40 = vld [vmem:[%s4296_s5 + $0x1c] ss:$12 sps:$4 sm:$0xff]  }
 0x3fd   :  { %v1207_v49 = vsel %vm178_vm6, %v3782_v47, %v3901_v41  ;;  %v1206_v48 = vsel %vm178_vm6, %v1187_v43, %v3782_v47  ;;  %v1104_v47 = vsel %vm115_vm3, %v3852_v0, %v3859_v15  ;;  %v1208_v17 = vsel %vm178_vm6, %v3901_v41, %v3881_v24 }
 0x3ff   :  { %1452 = vmatpush1.bf16.msra.mxu0 %v1170_v37  ;;  %1584 = vmatpush1.bf16.msra.mxu1 %v1032_v30 }
 0x400   :  { %v1051_v45 = vpop.permute.xlu0 %1050  ;;  %v1061_v46 = vpop.permute.xlu1 %1060  ;;  %1453 = vmatprep.subr.bf16.mxu0 %v1175_v44 }
 0x401   :  { %v1065_v42 = vsel %vm94_vm2, %v3802_v50, %v1051_v45  ;;  %v1069_v4 = vsel %vm94_vm2, %v1059_v12, %v1061_v46 }
 0x402   :  { %1585 = vmatprep.subr.bf16.mxu1 %v1065_v42  ;;  %v2902_v42 = vld [vmem:[%s4296_s5 + $0x18] ss:$12 sps:$4 sm:$0xff]  }
 0x403   :  { %1454 = vmatpush1.bf16.msra.mxu0 %v1174_v33  ;;  %1586 = vmatpush1.bf16.msra.mxu1 %v1064_v34  ;;  %v2903_v33 = vld [vmem:[%s4296_s5 + $0x34] ss:$12 sps:$4 sm:$0xff]  }
 0x404   :  { %v1087_v25 = vpop.permute.xlu0 %1086  ;;  %1587 = vmatprep.subr.bf16.mxu1 %v1069_v4  ;;  %v1201_v39 = vpop.permute.xlu1 %1200  ;;  %1455 = vmatprep.subr.bf16.mxu0 %v1207_v49 }
 0x405   :  { %v1101_v50 = vsel %vm115_vm3, %v3817_v56, %v1087_v25  ;;  %v1136_v56 = vsel %vm136_vm4, %v3832_v9, %v3827_v59  ;;  %v1172_v9 = vsel %vm157_vm5, %v3839_v61, %v3834_v7 }
 0x407   :  { %1456 = vmatpush1.bf16.msra.mxu0 %v1206_v48  ;;  %1588 = vmatpush1.bf16.msra.mxu1 %v1068_v38  ;;  %v2905_v48 = vld [vmem:[%s4296_s5 + $0x30] ss:$12 sps:$4 sm:$0xff]  }
 0x408   :  { %v1123_v51 = vpop.permute.xlu0 %1122  ;;  %1589 = vmatprep.subr.bf16.mxu1 %v1101_v50  ;;  %v1097_v52 = vpop.permute.xlu1 %1096  ;;  %v2906_v50 = vld [vmem:[%s4296_s5 + $0x4c] ss:$12 sps:$4 sm:$0xff]  }
 0x409   :  { %v1105_v55 = vsel %vm115_vm3, %v3859_v15, %v1097_v52  ;;  %v1137_v54 = vsel %vm136_vm4, %v3827_v59, %v1123_v51 }
 0x40b   :  { %1590 = vmatpush1.bf16.msra.mxu1 %v1100_v53  ;;  %v2913_v53 = vld [vmem:[%s4298_s7 + $0xc0] sm:$0xff]  }
 0x40c   :  { %v1159_v23 = vpop.permute.xlu0 %1158  ;;  %1591 = vmatprep.subr.bf16.mxu1 %v1105_v55  ;;  %v1225_v21 = vpop.permute.xlu1 %1224 }
 0x40d   :  { %v1173_v5 = vsel %vm157_vm5, %v3834_v7, %v1159_v23 }
 0x40f   :  { %1592 = vmatpush1.bf16.msra.mxu1 %v1104_v47 }
 0x410   :  { %v1195_v60 = vpop.permute.xlu0 %1194  ;;  %1593 = vmatprep.subr.bf16.mxu1 %v1137_v54  ;;  %v1133_v62 = vpop.permute.xlu1 %1132 }
 0x411   :  { %v1141_v58 = vsel %vm136_vm4, %v3869_v19, %v1133_v62  ;;  %v1209_v15 = vsel %vm178_vm6, %v3881_v24, %v1195_v60  ;;  %v2908_v60 = vld [vmem:[%s4296_s5 + $0x48] ss:$12 sps:$4 sm:$0xff]  }
 0x412   :  { %v2909_v62 = vld [vmem:[%s4296_s5 + $0x8] ss:$12 sps:$4 sm:$0xff]  }
 0x413   :  { %1594 = vmatpush1.bf16.msra.mxu1 %v1136_v56  ;;  %v2914_v56 = vld [vmem:[%s4298_s7 + $0x80] sm:$0xff]  }
 0x414   :  { %v1199_v63 = vpop.permute.xlu0 %1198  ;;  %1595 = vmatprep.subr.bf16.mxu1 %v1141_v58  ;;  %v1229_v35 = vpop.permute.xlu1 %1228  ;;  %v2917_v58 = vld [vmem:[%s4298_s7 + $0xc8] sm:$0xff]  }
 0x415   :  { %v1211_v2 = vsel %vm178_vm6, %v1199_v63, %v1201_v39 }
 0x416   :  { %1457 = vmatprep.subr.bf16.mxu0 %v1211_v2  ;;  %v2919_v2 = vld [vmem:[%s4298_s7 + $0x48] sm:$0xff]  }
 0x417   :  { %1596 = vmatpush1.bf16.msra.mxu1 %v1140_v3  ;;  %v2921_v3 = vld [vmem:[%s4298_s7 + $0xd0] sm:$0xff]  }
 0x418   :  { %v1203_v6 = vpop.permute.xlu0 %1202  ;;  %1597 = vmatprep.subr.bf16.mxu1 %v1173_v5  ;;  %v1169_v59 = vpop.permute.xlu1 %1168  ;;  %v2910_v5 = vld [vmem:[%s4296_s5 + $0x20] ss:$12 sps:$4 sm:$0xff]  }
 0x419   :  { %v1177_v11 = vsel %vm157_vm5, %v3879_v10, %v1169_v59  ;;  %v1212_v22 = vsel %vm178_vm6, %v1201_v39, %v1203_v6  ;;  %v2922_v59 = vld [vmem:[%s4298_s7 + $0x90] sm:$0xff]  }
 0x41b   :  { %1598 = vmatpush1.bf16.msra.mxu1 %v1172_v9  ;;  %v2923_v9 = vld [vmem:[%s4298_s7 + $0x50] sm:$0xff]  }
 0x41c   :  { %v1197_v12 = vpop.permute.xlu0 %1196  ;;  %1599 = vmatprep.subr.bf16.mxu1 %v1177_v11  ;;  %v1223_v0 = vpop.permute.xlu1 %1222  ;;  %v2925_v11 = vld [vmem:[%s4298_s7 + $0xd8] sm:$0xff]  }
 0x41d   :  { %v1210_v13 = vsel %vm178_vm6, %v1197_v12, %v1199_v63  ;;  %v1242_v1 = vsel %vm199_vm7, %v1223_v0, %v1225_v21  ;;  %v2916_v63 = vld [vmem:[%s4298_s7] sm:$0xff]   ;;  %v2924_v12 = vld [vmem:[%s4298_s7 + $0x10] sm:$0xff]   ;;  %v2926_v0 = vld [vmem:[%s4298_s7 + $0x98] sm:$0xff]  }
 0x41e   :  { %1458 = vmatpush1.bf16.msra.mxu0 %v1210_v13  ;;  %v2927_v13 = vld [vmem:[%s4298_s7 + $0x58] sm:$0xff]  }
 0x41f   :  { %1600 = vmatpush1.bf16.msra.mxu1 %v1176_v57  ;;  %v2929_v57 = vld [vmem:[%s4298_s7 + $0xe0] sm:$0xff]  }
 0x420   :  { %v1227_v16 = vpop.permute.xlu0 %1226  ;;  %1601 = vmatprep.subr.bf16.mxu1 %v1209_v15  ;;  %v1205_v7 = vpop.permute.xlu1 %1204  ;;  %v2911_v15 = vld [vmem:[%s4296_s5 + $0x38] ss:$12 sps:$4 sm:$0xff]  }
 0x421   :  { %v1243_v61 = vsel %vm199_vm7, %v1225_v21, %v1227_v16  ;;  %v1213_v19 = vsel %vm178_vm6, %v1203_v6, %v1205_v7  ;;  %v1244_v14 = vsel %vm199_vm7, %v1227_v16, %v1229_v35  ;;  %v2915_v21 = vld [vmem:[%s4298_s7 + $0x40] sm:$0xff]   ;;  %v2920_v6 = vld [vmem:[%s4298_s7 + $0x8] sm:$0xff]   ;;  %v2928_v16 = vld [vmem:[%s4298_s7 + $0x18] sm:$0xff]  }
 0x422   :  { %1459 = vmatprep.subr.bf16.mxu0 %v1243_v61  ;;  %v2930_v7 = vld [vmem:[%s4298_s7 + $0xa0] sm:$0xff]  }
 0x423   :  { %1460 = vmatpush1.bf16.msra.mxu0 %v1242_v1  ;;  %1602 = vmatpush1.bf16.msra.mxu1 %v1208_v17  ;;  %v2931_v61 = vld [vmem:[%s4298_s7 + $0x60] sm:$0xff]   ;;  %v2912_v17 = vld [vmem:[%s4296_s5 + $0x50] ss:$12 sps:$4 sm:$0xff]   ;;  %s2996_s5 = smov [#allocation2]  }
 0x424   :  { %v1231_v20 = vpop.permute.xlu0 %1230  ;;  %1603 = vmatprep.subr.bf16.mxu1 %v1213_v19  ;;  %v1237_v18 = vpop.permute.xlu1 %1236  ;;  %v2932_v1 = vld [vmem:[%s4298_s7 + $0x20] sm:$0xff]   ;;  %v2933_v19 = vld [vmem:[%s4298_s7 + $0xe8] sm:$0xff]   ;;  %s2542_s14 = sshll.u32 %s2996_s5, 4  ;;  %s2543_s14 = int_to_ptr.vmem [resolvable:$true] %s2542_s14 }
 0x425   :  { %v1245_v10 = vsel %vm199_vm7, %v1229_v35, %v1231_v20  ;;  %v2918_v35 = vld [vmem:[%s4298_s7 + $0x88] sm:$0xff]   ;;  %s2961_s26 = scalar_lea.vmem %s2543_s14, 32  ;;  %p2966_p1 = scmp.lt.s32.totalorder %s2543_s14, %s2543_s14 }
 0x426   :  { %v2934_v20 = vld [vmem:[%s4298_s7 + $0xa8] sm:$0xff]   ;;  %p2962_p0 = scmp.ne.s32.totalorder %s2543_s14, %s2961_s26  ;;  %p2967_p2 = scmp.lt.s32.totalorder %s2961_s26, %s2961_s26 }
 0x427   :  { %1604 = vmatpush1.bf16.msra.mxu1 %v1212_v22  ;;  %v2937_v22 = vld [vmem:[%s4298_s7 + $0xf0] sm:$0xff]  }
 0x428   :  { %v1235_v27 = vpop.permute.xlu0 %1234  ;;  %1605 = vmatprep.subr.bf16.mxu1 %v1245_v10  ;;  %v1241_v28 = vpop.permute.xlu1 %1240  ;;  %v2938_v10 = vld [vmem:[%s4298_s7 + $0xb0] sm:$0xff]   ;;  %p2968_p3 = por %p2967_p2, %p2966_p1 }
 0x429   :  { %v1247_v24 = vsel %vm199_vm7, %v1235_v27, %v1237_v18 }
 0x42a   :  { %1461 = vmatprep.subr.bf16.mxu0 %v1247_v24  ;;  %v2941_v24 = vld [vmem:[%s4298_s7 + $0xf8] sm:$0xff]   ;;  %p2969_p4 = pnand %p2968_p3, %p2962_p0 }
 0x42b   :  { %1606 = vmatpush1.bf16.msra.mxu1 %v1244_v14  ;;  %v2942_v14 = vld [vmem:[%s4298_s7 + $0xb8] sm:$0xff]  }
 0x42c   :  { %v1239_v31 = vpop.permute.xlu0 %1238  ;;  %v1261_v32 = vpop.permute.xlu1 %1260 }
 0x42d   :  { %v1248_v36 = vsel %vm199_vm7, %v1237_v18, %v1239_v31  ;;  %v1249_v29 = vsel %vm199_vm7, %v1239_v31, %v1241_v28  ;;  %v2936_v18 = vld [vmem:[%s4298_s7 + $0x28] sm:$0xff]   ;;  %v2940_v28 = vld [vmem:[%s4298_s7 + $0x30] sm:$0xff]   ;;  %v2943_v31 = vld [vmem:[%s4298_s7 + $0x78] sm:$0xff]  }
 0x42e   :  { %1607 = vmatprep.subr.bf16.mxu1 %v1249_v29 }
 0x42f   :  { %1608 = vmatpush1.bf16.msra.mxu1 %v1248_v36 }
 0x430   :  { %v1233_v41 = vpop.permute.xlu0 %1232  ;;  %v1265_v43 = vpop.permute.xlu1 %1264 }
 0x431   :  { %v1246_v37 = vsel %vm199_vm7, %v1233_v41, %v1235_v27  ;;  %v2939_v27 = vld [vmem:[%s4298_s7 + $0x70] sm:$0xff]  }
 0x432   :  { %1462 = vmatpush1.bf16.msra.mxu0 %v1246_v37  ;;  %1610 = vmatmul.mubr.bf16.vlgmr.msra.gmra.mrb[20].mxu1 %v2897_v26 }
 0x433   :  { %1619 = vmatprep.mubr.bf16.mxu1 %v2900_v40 }
 0x434   :  { %v1263_v30 = vpop.permute.xlu0 %1262  ;;  %v1259_v44 = vpop.permute.xlu1 %1258 }
 0x435   :  { %v1278_v45 = vsel %vm220_vm8, %v1259_v44, %v1261_v32  ;;  %1464 = vmatmul.mubr.bf16.vlgmr.msra.gmra.mrb[16].mxu0 %v2897_v26  ;;  %v1279_v46 = vsel %vm220_vm8, %v1261_v32, %v1263_v30  ;;  %v1280_v49 = vsel %vm220_vm8, %v1263_v30, %v1265_v43  ;;  %v2944_v32 = vld [vmem:[%s4298_s7 + $0x38] sm:$0xff]  }
 0x436   :  { %1504 = vmatprep.subr.bf16.mxu0 %v1279_v46  ;;  %1473 = vmatprep.mubr.bf16.mxu0 %v2900_v40 }
 0x437   :  { %1505 = vmatpush1.bf16.msra.mxu0 %v1278_v45 }
 0x438   :  { %v1267_v34 = vpop.permute.xlu0 %1266  ;;  %v1273_v25 = vpop.permute.xlu1 %1272 }
 0x439   :  { %v1281_v4 = vsel %vm220_vm8, %v1265_v43, %v1267_v34 }
 0x43a   :  { %1620 = vmatmul.mubr.bf16.gmra.mrb[24].mxu1 %v2902_v42  ;;  %1650 = vmatprep.subr.bf16.mxu1 %v1281_v4 }
 0x43b   :  { %1651 = vmatpush1.bf16.msra.mxu1 %v1280_v49  ;;  %1629 = vmatprep.mubr.bf16.mxu1 %v2903_v33 }
 0x43c   :  { %v1271_v39 = vpop.permute.xlu0 %1270  ;;  %v1277_v51 = vpop.permute.xlu1 %1276 }
 0x43d   :  { %1474 = vmatmul.mubr.bf16.gmra.mrb[20].mxu0 %v2902_v42  ;;  %v1283_v38 = vsel %vm220_vm8, %v1271_v39, %v1273_v25 }
 0x43e   :  { %1506 = vmatprep.subr.bf16.mxu0 %v1283_v38  ;;  %1483 = vmatprep.mubr.bf16.mxu0 %v2903_v33 }
 0x440   :  { %v1275_v52 = vpop.permute.xlu0 %1274 }
 0x441   :  { %v1284_v55 = vsel %vm220_vm8, %v1273_v25, %v1275_v52  ;;  %v1285_v23 = vsel %vm220_vm8, %v1275_v52, %v1277_v51 }
 0x442   :  { %1630 = vmatmul.mubr.bf16.gmra.mrb[28].mxu1 %v2905_v48  ;;  %1652 = vmatprep.subr.bf16.mxu1 %v1285_v23 }
 0x443   :  { %1653 = vmatpush1.bf16.msra.mxu1 %v1284_v55  ;;  %1639 = vmatprep.mubr.bf16.mxu1 %v2906_v50 }
 0x444   :  { %v1269_v47 = vpop.permute.xlu0 %1268  ;;  %2683 = vmatprep.subr.bf16.mxu1 %v2913_v53 }
 0x445   :  { %v1282_v54 = vsel %vm220_vm8, %v1269_v47, %v1271_v39  ;;  %1484 = vmatmul.mubr.bf16.gmra.mrb[24].mxu0 %v2905_v48 }
 0x446   :  { %1507 = vmatpush1.bf16.msra.mxu0 %v1282_v54  ;;  %1493 = vmatprep.mubr.bf16.mxu0 %v2906_v50 }
 0x447   :  { %2643 = vmatprep.subr.bf16.mxu0 %v2915_v21 }
 0x44a   :  { %1640 = vmatmul.mubr.bf16.gmra.mrb[32].mxu1 %v2908_v60 }
 0x44b   :  { %1682 = vmatprep.mubr.bf16.mxu1 %v2992_v8 }
 0x44d   :  { %1494 = vmatmul.mubr.bf16.gmra.mrb[28].mxu0 %v2908_v60  ;;  %v1321_v36 = vpop.permute.xlu1 %1320 }
 0x44e   :  { %1536 = vmatprep.mubr.bf16.mxu0 %v2992_v8 }
 0x451   :  { %v1331_v55 = vpop.permute.xlu1 %1330 }
 0x452   :  { %2590 = vmatmul.mubr.msk.bf16.vlgmr.msra.gmra.mrb[20].mxu1 %vm1418_vm0, %v2909_v62 }
 0x453   :  { %1692 = vmatprep.mubr.bf16.mxu1 %v2992_v8  ;;  %2684 = vmatpush3.bf16.msra.mxu1 %v2914_v56 }
 0x454   :  { %2685 = vmatprep.subr.bf16.mxu1 %v2917_v58 }
 0x455   :  { %2586 = vmatmul.mubr.msk.bf16.vlgmr.msra.gmra.mrb[16].mxu0 %vm1418_vm0, %v2909_v62  ;;  %v1326_v41 = vpop.permute.xlu0 %1325 }
 0x456   :  { %1546 = vmatprep.mubr.bf16.mxu0 %v2992_v8  ;;  %2644 = vmatpush3.bf16.msra.mxu0 %v2916_v63 }
 0x457   :  { %2686 = vmatpush3.bf16.msra.mxu1 %v2918_v35  ;;  %2645 = vmatprep.subr.bf16.mxu0 %v2919_v2 }
 0x458   :  { %2687 = vmatprep.subr.bf16.mxu1 %v2921_v3 }
 0x459   :  { %v1336_v63 = vpop.permute.xlu0 %1335 }
 0x45a   :  { %2591 = vmatmul.mubr.msk.bf16.gmra.mrb[24].mxu1 %vm1418_vm0, %v2910_v5  ;;  %2646 = vmatpush3.bf16.msra.mxu0 %v2920_v6 }
 0x45b   :  { %1702 = vmatprep.mubr.bf16.mxu1 %v2992_v8  ;;  %2688 = vmatpush3.bf16.msra.mxu1 %v2922_v59 }
 0x45c   :  { %2647 = vmatprep.subr.bf16.mxu0 %v2923_v9  ;;  %2689 = vmatprep.subr.bf16.mxu1 %v2925_v11 }
 0x45d   :  { %2587 = vmatmul.mubr.msk.bf16.gmra.mrb[20].mxu0 %vm1418_vm0, %v2910_v5 }
 0x45e   :  { %1556 = vmatprep.mubr.bf16.mxu0 %v2992_v8  ;;  %2648 = vmatpush3.bf16.msra.mxu0 %v2924_v12 }
 0x45f   :  { %2690 = vmatpush3.bf16.msra.mxu1 %v2926_v0  ;;  %2649 = vmatprep.subr.bf16.mxu0 %v2927_v13 }
 0x460   :  { %2691 = vmatprep.subr.bf16.mxu1 %v2929_v57 }
 0x462   :  { %2592 = vmatmul.mubr.msk.bf16.gmra.mrb[28].mxu1 %vm1418_vm0, %v2911_v15  ;;  %2650 = vmatpush3.bf16.msra.mxu0 %v2928_v16 }
 0x463   :  { %1712 = vmatprep.mubr.bf16.mxu1 %v2992_v8  ;;  %2692 = vmatpush3.bf16.msra.mxu1 %v2930_v7 }
 0x464   :  { %2651 = vmatprep.subr.bf16.mxu0 %v2931_v61  ;;  %2693 = vmatprep.subr.bf16.mxu1 %v2933_v19 }
 0x465   :  { %2588 = vmatmul.mubr.msk.bf16.gmra.mrb[24].mxu0 %vm1418_vm0, %v2911_v15 }
 0x466   :  { %1566 = vmatprep.mubr.bf16.mxu0 %v2992_v8  ;;  %2652 = vmatpush3.bf16.msra.mxu0 %v2932_v1  ;;  %v2935_v8 = vld [vmem:[%s4298_s7 + $0x68] sm:$0xff]   ;;  %s2994_s7 = smov 124  }
 0x467   :  { %2694 = vmatpush3.bf16.msra.mxu1 %v2934_v20  ;;  %2653 = vmatprep.subr.bf16.mxu0 %v2935_v8 }
 0x468   :  { %2695 = vmatprep.subr.bf16.mxu1 %v2937_v22 }
 0x46a   :  { %2593 = vmatmul.mubr.msk.bf16.gmra.mrb[32].mxu1 %vm1418_vm0, %v2912_v17  ;;  %2654 = vmatpush3.bf16.msra.mxu0 %v2936_v18 }
 0x46b   :  { %2696 = vmatpush3.bf16.msra.mxu1 %v2938_v10  ;;  %2655 = vmatprep.subr.bf16.mxu0 %v2939_v27  ;;  %v1341_v10 = vpop.permute.xlu1 %1340 }
 0x46c   :  { %2697 = vmatprep.subr.bf16.mxu1 %v2941_v24 }
 0x46d   :  { %2589 = vmatmul.mubr.msk.bf16.gmra.mrb[28].mxu0 %vm1418_vm0, %v2912_v17 }
 0x46e   :  { %2656 = vmatpush3.bf16.msra.mxu0 %v2940_v28 }
 0x46f   :  { %2698 = vmatpush3.bf16.msra.mxu1 %v2942_v14  ;;  %2657 = vmatprep.subr.bf16.mxu0 %v2943_v31 }
 0x472   :  { %2658 = vmatpush3.bf16.msra.mxu0 %v2944_v32 }
 0x525   :  { %v1684_v29 = vpop.f32.mrb[20].mxu1 }
 0x526   :  { %v2761_v26 = vadd.f32 %v1684_v29, %v1321_v36  ;;  %v1686_v40 = vpop.f32.mrb[21].mxu1 }
 0x527   :  { %v2762_v43 = vadd.f32 %v1686_v40, %v1321_v36  ;;  %v1688_v37 = vpop.f32.mrb[22].mxu1  ;;  %v1346_v40 = vpop.permute.xlu0 %1345 }
 0x528   :  { %v1757_v30 = vmul.f32 0.2, %v2761_v26  ;;  %v2763_v44 = vadd.f32 %v1688_v37, %v1326_v41  ;;  %v1538_v45 = vpop.f32.mrb[16].mxu0  ;;  %v1690_v46 = vpop.f32.mrb[23].mxu1  ;;  %vm1725_vm2 = vcmp.gt.f32.partialorder %v2761_v26, 0.0 }
 0x529   :  { %v1758_v42 = vmul.f32 0.2, %v2762_v43  ;;  %v2745_v33 = vadd.f32 %v1538_v45, %v1321_v36  ;;  %v2764_v34 = vadd.f32 %v1690_v46, %v1326_v41  ;;  %v1540_v4 = vpop.f32.mrb[17].mxu0  ;;  %vm1726_vm3 = vcmp.gt.f32.partialorder %v2762_v43, 0.0 }
 0x52a   :  { %vm1729_vm4 = vcmp.gt.f32.partialorder %v2763_v44, 0.0  ;;  %v1761_v49 = vmul.f32 0.2, %v2763_v44  ;;  %v1542_v25 = vpop.f32.mrb[18].mxu0  ;;  %v2746_v38 = vadd.f32 %v1540_v4, %v1321_v36  ;;  %v1789_v48 = vsel %vm1725_vm2, %v2761_v26, %v1757_v30 }
 0x52b   :  { %vm1730_vm5 = vcmp.gt.f32.partialorder %v2764_v34, 0.0  ;;  %v1762_v39 = vmul.f32 0.2, %v2764_v34  ;;  %v1755_v51 = vmul.f32 0.2, %v2745_v33  ;;  %v2747_v52 = vadd.f32 %v1542_v25, %v1326_v41  ;;  %v1544_v53 = vpop.f32.mrb[19].mxu0 }
 0x52c   :  { %v1793_v50 = vsel %vm1729_vm4, %v2763_v44, %v1761_v49  ;;  %vm1723_vm6 = vcmp.gt.f32.partialorder %v2745_v33, 0.0  ;;  %v2748_v21 = vadd.f32 %v1544_v53, %v1326_v41  ;;  %v1790_v54 = vsel %vm1726_vm3, %v2762_v43, %v1758_v42 }
 0x52d   :  { %v1821_v23 = vpack.c.bf16 %v1793_v50, %v1789_v48  ;;  %v1694_v47 = vpop.f32.mrb[24].mxu1  ;;  %vm1727_vm7 = vcmp.gt.f32.partialorder %v2747_v52, 0.0  ;;  %v1759_v60 = vmul.f32 0.2, %v2747_v52  ;;  %v1794_v58 = vsel %vm1730_vm5, %v2764_v34, %v1762_v39 }
 0x52e   :  { %v4127_v62 = vadd.f32 %v1694_v47, %v1331_v55  ;;  %v1696_v56 = vpop.f32.mrb[25].mxu1  ;;  %vm1724_vm8 = vcmp.gt.f32.partialorder %v2746_v38, 0.0  ;;  %v1756_v35 = vmul.f32 0.2, %v2746_v38  ;;  %v1822_v5 = vpack.c.bf16 %v1794_v58, %v1790_v54 }
 0x52f   :  { %v2766_v2 = vadd.f32 %v1696_v56, %v1331_v55  ;;  %v1698_v3 = vpop.f32.mrb[26].mxu1  ;;  %v1787_v6 = vsel %vm1723_vm6, %v2745_v33, %v1755_v51  ;;  %v1791_v59 = vsel %vm1727_vm7, %v2747_v52, %v1759_v60  ;;  %vm1728_vm11 = vcmp.gt.f32.partialorder %v2748_v21, 0.0 }
 0x530   :  { %v2767_v9 = vadd.f32 %v1698_v3, %v1336_v63  ;;  %v1548_v11 = vpop.f32.mrb[20].mxu0  ;;  %v1700_v12 = vpop.f32.mrb[27].mxu1  ;;  %v1819_v0 = vpack.c.bf16 %v1791_v59, %v1787_v6  ;;  %v1760_v13 = vmul.f32 0.2, %v2748_v21  ;;  %vm1733_vm12 = vcmp.gt.f32.partialorder %v4127_v62, 0.0  ;;  %2188 = vmatprep.mubr.bf16.mxu1 %v1822_v5 }
 0x531   :  { %v4131_v57 = vadd.f32 %v1548_v11, %v1331_v55  ;;  %v1550_v15 = vpop.f32.mrb[21].mxu0  ;;  %v1765_v16 = vmul.f32 0.2, %v4127_v62  ;;  %v1766_v7 = vmul.f32 0.2, %v2766_v2  ;;  %v2768_v61 = vadd.f32 %v1700_v12, %v1336_v63  ;;  %2189 = vmatmul.mubr.bf16.vlgmr.msra.gmra.mrb[36].mxu1 %v1821_v23  ;;  %v1356_v6 = vpop.permute.xlu0 %1355 }
 0x532   :  { %v2750_v17 = vadd.f32 %v1550_v15, %v1331_v55  ;;  %v1552_v1 = vpop.f32.mrb[22].mxu0  ;;  %vm1734_vm13 = vcmp.gt.f32.partialorder %v2766_v2, 0.0  ;;  %vm1737_vm14 = vcmp.gt.f32.partialorder %v2767_v9, 0.0  ;;  %v1769_v19 = vmul.f32 0.2, %v2767_v9 }
 0x533   :  { %v4134_v20 = vadd.f32 %v1552_v1, %v1336_v63  ;;  %v1554_v8 = vpop.f32.mrb[23].mxu0  ;;  %vm1731_vm15 = vcmp.gt.f32.partialorder %v4131_v57, 0.0  ;;  %v1763_v18 = vmul.f32 0.2, %v4131_v57  ;;  %vm1738_vm1 = vcmp.gt.f32.partialorder %v2768_v61, 0.0 }
 0x534   :  { %v1770_v22 = vmul.f32 0.2, %v2768_v61  ;;  %vm1732_vm9 = vcmp.gt.f32.partialorder %v2750_v17, 0.0  ;;  %v2752_v27 = vadd.f32 %v1554_v8, %v1336_v63  ;;  %v1788_v28 = vsel %vm1724_vm8, %v2746_v38, %v1756_v35  ;;  %v1351_v63 = vpop.permute.xlu1 %1350 }
 0x535   :  { %v1792_v24 = vsel %vm1728_vm11, %v2748_v21, %v1760_v13  ;;  %v1704_v14 = vpop.f32.mrb[28].mxu1  ;;  %v1798_v29 = vsel %vm1734_vm13, %v2766_v2, %v1766_v7  ;;  %v1764_v41 = vmul.f32 0.2, %v2750_v17  ;;  %v1767_v43 = vmul.f32 0.2, %v4134_v20 }
 0x536   :  { %v1820_v31 = vpack.c.bf16 %v1792_v24, %v1788_v28  ;;  %v4140_v32 = vadd.f32 %v1704_v14, %v1341_v10  ;;  %v1706_v36 = vpop.f32.mrb[29].mxu1  ;;  %v1802_v26 = vsel %vm1738_vm1, %v2768_v61, %v1770_v22  ;;  %vm1735_vm10 = vcmp.gt.f32.partialorder %v4134_v20, 0.0 }
 0x537   :  { %v2770_v37 = vadd.f32 %v1706_v36, %v1341_v10  ;;  %v1708_v30 = vpop.f32.mrb[30].mxu1  ;;  %v1826_v44 = vpack.c.bf16 %v1802_v26, %v1798_v29  ;;  %vm1736_vm0 = vcmp.gt.f32.partialorder %v2752_v27, 0.0  ;;  %v1768_v45 = vmul.f32 0.2, %v2752_v27 }
 0x538   :  { %2123 = vmatprep.mubr.bf16.mxu0 %v1820_v31  ;;  %v4145_v46 = vadd.f32 %v1708_v30, %v1346_v40  ;;  %v1558_v42 = vpop.f32.mrb[24].mxu0  ;;  %v1710_v33 = vpop.f32.mrb[31].mxu1  ;;  %vm1741_vm2 = vcmp.gt.f32.partialorder %v4140_v32, 0.0  ;;  %v4149_v34 = vmul.f32 0.2, %v4140_v32  ;;  %v1797_v39 = vsel %vm1733_vm12, %v4127_v62, %v1765_v16 }
 0x539   :  { %2124 = vmatmul.mubr.bf16.vlgmr.msra.gmra.mrb[32].mxu0 %v1819_v0  ;;  %v4151_v4 = vadd.f32 %v1558_v42, %v1341_v10  ;;  %v2772_v49 = vadd.f32 %v1710_v33, %v1346_v40  ;;  %2196 = vmatprep.mubr.bf16.mxu1 %v1826_v44  ;;  %v1560_v25 = vpop.f32.mrb[25].mxu0  ;;  %vm1742_vm3 = vcmp.gt.f32.partialorder %v2770_v37, 0.0  ;;  %v1774_v38 = vmul.f32 0.2, %v2770_v37 }
 0x53a   :  { %v2754_v48 = vadd.f32 %v1560_v25, %v1341_v10  ;;  %v1801_v50 = vsel %vm1737_vm14, %v2767_v9, %v1769_v19  ;;  %v1562_v51 = vpop.f32.mrb[26].mxu0  ;;  %vm1745_vm4 = vcmp.gt.f32.partialorder %v4145_v46, 0.0  ;;  %v1777_v52 = vmul.f32 0.2, %v4145_v46 }
 0x53b   :  { %v4160_v53 = vmul.f32 0.2, %v4151_v4  ;;  %vm1746_vm5 = vcmp.gt.f32.partialorder %v2772_v49, 0.0  ;;  %vm1739_vm6 = vcmp.gt.f32.partialorder %v4151_v4, 0.0  ;;  %v1778_v55 = vmul.f32 0.2, %v2772_v49 }
 0x53c   :  { %vm1740_vm7 = vcmp.gt.f32.partialorder %v2754_v48, 0.0  ;;  %v1825_v23 = vpack.c.bf16 %v1801_v50, %v1797_v39  ;;  %v2755_v21 = vadd.f32 %v1562_v51, %v1346_v40  ;;  %v1564_v47 = vpop.f32.mrb[27].mxu0  ;;  %v1772_v54 = vmul.f32 0.2, %v2754_v48 }
 0x53d   :  { %v2756_v60 = vadd.f32 %v1564_v47, %v1346_v40  ;;  %v1796_v62 = vsel %vm1732_vm9, %v2750_v17, %v1764_v41  ;;  %v1800_v56 = vsel %vm1736_vm0, %v2752_v27, %v1768_v45  ;;  %v1714_v58 = vpop.f32.mrb[32].mxu1  ;;  %v1795_v2 = vsel %vm1731_vm15, %v4131_v57, %v1763_v18 }
 0x53e   :  { %2197 = vmatmul.mubr.bf16.gmra.mrb[40].mxu1 %v1825_v23  ;;  %vm1743_vm8 = vcmp.gt.f32.partialorder %v2755_v21, 0.0  ;;  %v1824_v35 = vpack.c.bf16 %v1800_v56, %v1796_v62  ;;  %v1799_v3 = vsel %vm1735_vm10, %v4134_v20, %v1767_v43  ;;  %v1716_v5 = vpop.f32.mrb[33].mxu1  ;;  %v1775_v59 = vmul.f32 0.2, %v2755_v21 }
 0x53f   :  { %vm1744_vm11 = vcmp.gt.f32.partialorder %v2756_v60, 0.0  ;;  %v1823_v9 = vpack.c.bf16 %v1799_v3, %v1795_v2  ;;  %v2773_v11 = vadd.f32 %v1714_v58, %v1351_v63  ;;  %v1718_v12 = vpop.f32.mrb[34].mxu1  ;;  %v1776_v0 = vmul.f32 0.2, %v2756_v60 }
 0x540   :  { %2131 = vmatprep.mubr.bf16.mxu0 %v1824_v35  ;;  %v2774_v13 = vadd.f32 %v1716_v5, %v1351_v63  ;;  %v2775_v15 = vadd.f32 %v1718_v12, %v1356_v6  ;;  %v1568_v16 = vpop.f32.mrb[28].mxu0  ;;  %v1720_v7 = vpop.f32.mrb[35].mxu1  ;;  %v1806_v61 = vsel %vm1742_vm3, %v2770_v37, %v1774_v38  ;;  %v1810_v19 = vsel %vm1746_vm5, %v2772_v49, %v1778_v55 }
 0x541   :  { %2132 = vmatmul.mubr.bf16.gmra.mrb[36].mxu0 %v1823_v9  ;;  %v1781_v57 = vmul.f32 0.2, %v2773_v11  ;;  %v2757_v17 = vadd.f32 %v1568_v16, %v1351_v63  ;;  %v2776_v1 = vadd.f32 %v1720_v7, %v1356_v6  ;;  %v1570_v20 = vpop.f32.mrb[29].mxu0  ;;  %vm1749_vm12 = vcmp.gt.f32.partialorder %v2773_v11, 0.0 }
 0x542   :  { %vm1750_vm13 = vcmp.gt.f32.partialorder %v2774_v13, 0.0  ;;  %v1782_v8 = vmul.f32 0.2, %v2774_v13  ;;  %v1785_v18 = vmul.f32 0.2, %v2775_v15  ;;  %vm1753_vm14 = vcmp.gt.f32.partialorder %v2775_v15, 0.0 }
 0x543   :  { %vm1747_vm15 = vcmp.gt.f32.partialorder %v2757_v17, 0.0  ;;  %v1779_v22 = vmul.f32 0.2, %v2757_v17  ;;  %v1786_v10 = vmul.f32 0.2, %v2776_v1  ;;  %v1830_v27 = vpack.c.bf16 %v1810_v19, %v1806_v61  ;;  %v1572_v31 = vpop.f32.mrb[30].mxu0 }
 0x544   :  { %v2758_v28 = vadd.f32 %v1570_v20, %v1351_v63  ;;  %v1805_v24 = vsel %vm1741_vm2, %v4140_v32, %v4149_v34  ;;  %v1809_v14 = vsel %vm1745_vm4, %v4145_v46, %v1777_v52  ;;  %v2759_v29 = vadd.f32 %v1572_v31, %v1356_v6  ;;  %v1574_v26 = vpop.f32.mrb[31].mxu0 }
 0x545   :  { %v1829_v36 = vpack.c.bf16 %v1809_v14, %v1805_v24  ;;  %v1804_v40 = vsel %vm1740_vm7, %v2754_v48, %v1772_v54  ;;  %v1808_v41 = vsel %vm1744_vm11, %v2756_v60, %v1776_v0  ;;  %vm1754_vm1 = vcmp.gt.f32.partialorder %v2776_v1, 0.0  ;;  %2204 = vmatprep.mubr.bf16.mxu1 %v1830_v27 }
 0x546   :  { %v1780_v43 = vmul.f32 0.2, %v2758_v28  ;;  %v2760_v37 = vadd.f32 %v1574_v26, %v1356_v6  ;;  %v1828_v30 = vpack.c.bf16 %v1808_v41, %v1804_v40  ;;  %vm1748_vm9 = vcmp.gt.f32.partialorder %v2758_v28, 0.0 }
 0x547   :  { %2205 = vmatmul.mubr.bf16.gmra.mrb[44].mxu1 %v1829_v36  ;;  %v1783_v32 = vmul.f32 0.2, %v2759_v29  ;;  %v1803_v44 = vsel %vm1739_vm6, %v4151_v4, %v4160_v53  ;;  %v1807_v45 = vsel %vm1743_vm8, %v2755_v21, %v1775_v59  ;;  %vm1751_vm10 = vcmp.gt.f32.partialorder %v2759_v29, 0.0 }
 0x548   :  { %vm1752_vm0 = vcmp.gt.f32.partialorder %v2760_v37, 0.0  ;;  %v1784_v46 = vmul.f32 0.2, %v2760_v37  ;;  %2139 = vmatprep.mubr.bf16.mxu0 %v1828_v30  ;;  %v1827_v42 = vpack.c.bf16 %v1807_v45, %v1803_v44  ;;  %v1814_v33 = vsel %vm1750_vm13, %v2774_v13, %v1782_v8 }
 0x549   :  { %v1818_v34 = vsel %vm1754_vm1, %v2776_v1, %v1786_v10  ;;  %v1813_v49 = vsel %vm1749_vm12, %v2773_v11, %v1781_v57  ;;  %v1817_v25 = vsel %vm1753_vm14, %v2775_v15, %v1785_v18  ;;  %v1812_v4 = vsel %vm1748_vm9, %v2758_v28, %v1780_v43 }
 0x54a   :  { %2140 = vmatmul.mubr.bf16.gmra.mrb[40].mxu0 %v1827_v42  ;;  %v1834_v39 = vpack.c.bf16 %v1818_v34, %v1814_v33  ;;  %v1833_v38 = vpack.c.bf16 %v1817_v25, %v1813_v49  ;;  %v1816_v48 = vsel %vm1752_vm0, %v2760_v37, %v1784_v46  ;;  %v1811_v51 = vsel %vm1747_vm15, %v2757_v17, %v1779_v22 }
 0x54b   :  { %v1832_v50 = vpack.c.bf16 %v1816_v48, %v1812_v4  ;;  %v1815_v52 = vsel %vm1751_vm10, %v2759_v29, %v1783_v32 }
 0x54c   :  { %2212 = vmatprep.mubr.bf16.mxu1 %v1834_v39  ;;  %v1831_v53 = vpack.c.bf16 %v1815_v52, %v1811_v51 }
 0x54d   :  { %2147 = vmatprep.mubr.bf16.mxu0 %v1832_v50 }
 0x54f   :  { %2213 = vmatmul.mubr.bf16.gmra.mrb[48].mxu1 %v1833_v38 }
 0x552   :  { %2148 = vmatmul.mubr.bf16.gmra.mrb[44].mxu0 %v1831_v53 }
 0x604   :  { %v2699_v55 = vpop.f32.mrb[36].mxu1 }
 0x605   :  { %v2700_v23 = vpop.f32.mrb[37].mxu1 }
 0x606   :  { %v2701_v21 = vadd.f32 %v2700_v23, %v2699_v55  ;;  %v2702_v47 = vpop.f32.mrb[38].mxu1 }
 0x607   :  { %v2703_v54 = vpop.f32.mrb[39].mxu1 }
 0x608   :  { %v2704_v60 = vadd.f32 %v2703_v54, %v2702_v47 }
 0x60c   :  { %v2659_v62 = vpop.f32.mrb[32].mxu0 }
 0x60d   :  { %v2660_v56 = vpop.f32.mrb[33].mxu0 }
 0x60e   :  { %v2661_v58 = vadd.f32 %v2660_v56, %v2659_v62  ;;  %v2662_v63 = vpop.f32.mrb[34].mxu0 }
 0x60f   :  { %v2663_v35 = vpop.f32.mrb[35].mxu0 }
 0x610   :  { %v2191_v2 = vadd.f32 %v2701_v21, %v2661_v58  ;;  %v2664_v3 = vadd.f32 %v2663_v35, %v2662_v63  ;;  %v2945_v58 = vld [vmem:[%s4299_s8 + $0x40] sm:$0xff]   ;;  %v2947_v35 = vld [vmem:[%s4299_s8 + $0x48] sm:$0xff]  }
 0x611   :  { %v2705_v5 = vpop.f32.mrb[40].mxu1  ;;  %v2946_v63 = vld [vmem:[%s4299_s8] sm:$0xff]   ;;  %2723 = vmatprep.subr.bf16.mxu0 %v2945_v58 }
 0x612   :  { %v2194_v6 = vadd.f32 %v2704_v60, %v2664_v3  ;;  %v2706_v59 = vpop.f32.mrb[41].mxu1  ;;  %v4194_v12 = vmul.f32 0.04, %v2191_v2  ;;  %2724 = vmatpush3.bf16.msra.mxu0 %v2946_v63  ;;  %v2948_v2 = vld [vmem:[%s4299_s8 + $0x8] sm:$0xff]   ;;  %v2949_v3 = vld [vmem:[%s4299_s8 + $0x50] sm:$0xff]  }
 0x613   :  { %v2707_v9 = vadd.f32 %v2706_v59, %v2705_v5  ;;  %v2708_v11 = vpop.f32.mrb[42].mxu1  ;;  %2725 = vmatprep.subr.bf16.mxu0 %v2947_v35  ;;  %v2950_v5 = vld [vmem:[%s4299_s8 + $0x10] sm:$0xff]   ;;  %v2952_v59 = vld [vmem:[%s4299_s8 + $0x18] sm:$0xff]  }
 0x614   :  { %v4196_v0 = vmul.f32 0.04, %v2194_v6  ;;  %v2665_v13 = vpop.f32.mrb[36].mxu0  ;;  %v2709_v15 = vpop.f32.mrb[43].mxu1  ;;  %v2951_v6 = vld [vmem:[%s4299_s8 + $0x58] sm:$0xff]  }
 0x615   :  { %v2710_v16 = vadd.f32 %v2709_v15, %v2708_v11  ;;  %v2666_v7 = vpop.f32.mrb[37].mxu0  ;;  %v2954_v11 = vld [vmem:[%s4299_s8 + $0x20] sm:$0xff]   ;;  %v2956_v15 = vld [vmem:[%s4299_s8 + $0x28] sm:$0xff]  }
 0x616   :  { %v2667_v61 = vadd.f32 %v2666_v7, %v2665_v13  ;;  %v2668_v57 = vpop.f32.mrb[38].mxu0  ;;  %v2833_v17 = vpack.i.bf16 %v4196_v0, %v4194_v12  ;;  %v2309_v19 = vpack.c.bf16 %v4196_v0, %v4194_v12  ;;  %2726 = vmatpush3.bf16.msra.mxu0 %v2948_v2  ;;  %v2955_v13 = vld [vmem:[%s4299_s8 + $0x68] sm:$0xff]   ;;  %v2958_v7 = vld [vmem:[%s4299_s8 + $0x30] sm:$0xff]   ;;  %v2626_v2 = vld [vmem:[%s4300_s9] ss:$0 sm:$0xff] }
 0x617   :  { %v2669_v1 = vpop.f32.mrb[39].mxu0  ;;  %2727 = vmatprep.subr.bf16.mxu0 %v2949_v3 }
 0x618   :  { %v2199_v20 = vadd.f32 %v2707_v9, %v2667_v61  ;;  %v2670_v8 = vadd.f32 %v2669_v1, %v2668_v57  ;;  %2834 = vrot.lane.b32.xlu0 %v2833_v17, %s2986_s20  ;;  %2824 = vrot.lane.b32.xlu1 %v2833_v17, %s2994_s7  ;;  %v2953_v9 = vld [vmem:[%s4299_s8 + $0x60] sm:$0xff]   ;;  %v2959_v61 = vld [vmem:[%s4299_s8 + $0x78] sm:$0xff]  }
 0x619   :  { %v2960_v57 = vld [vmem:[%s4299_s8 + $0x38] sm:$0xff]  }
 0x61a   :  { %v2202_v18 = vadd.f32 %v2710_v16, %v2670_v8  ;;  %v2711_v22 = vpop.f32.mrb[44].mxu1  ;;  %v4204_v27 = vmul.f32 0.04, %v2199_v20  ;;  %2728 = vmatpush3.bf16.msra.mxu0 %v2950_v5  ;;  %v2957_v16 = vld [vmem:[%s4299_s8 + $0x70] sm:$0xff]  }
 0x61b   :  { %v2712_v10 = vpop.f32.mrb[45].mxu1  ;;  %2729 = vmatprep.subr.bf16.mxu0 %v2951_v6 }
 0x61c   :  { %v4206_v28 = vmul.f32 0.04, %v2202_v18  ;;  %v2713_v24 = vadd.f32 %v2712_v10, %v2711_v22  ;;  %v2714_v14 = vpop.f32.mrb[46].mxu1  ;;  %2829 = vrot.lane.b32.xlu1 %v2833_v17, %s2995_s22 }
 0x61d   :  { %v2671_v31 = vpop.f32.mrb[40].mxu0  ;;  %v2715_v36 = vpop.f32.mrb[47].mxu1 }
 0x61e   :  { %v2716_v29 = vadd.f32 %v2715_v36, %v2714_v14  ;;  %v2672_v26 = vpop.f32.mrb[41].mxu0  ;;  %v2838_v40 = vpack.i.bf16 %v4206_v28, %v4204_v27  ;;  %v2310_v37 = vpack.c.bf16 %v4206_v28, %v4204_v27  ;;  %2730 = vmatpush3.bf16.msra.mxu0 %v2952_v59 }
 0x61f   :  { %v2673_v41 = vadd.f32 %v2672_v26, %v2671_v31  ;;  %v2674_v43 = vpop.f32.mrb[42].mxu0  ;;  %2731 = vmatprep.subr.bf16.mxu0 %v2953_v9 }
 0x620   :  { %v2675_v30 = vpop.f32.mrb[43].mxu0  ;;  %2839 = vrot.lane.b32.xlu0 %v2838_v40, %s2994_s7  ;;  %2844 = vrot.lane.b32.xlu1 %v2838_v40, %s2995_s22 }
 0x621   :  { %v2207_v32 = vadd.f32 %v2713_v24, %v2673_v41  ;;  %v2676_v44 = vadd.f32 %v2675_v30, %v2674_v43 }
 0x622   :  { %v2717_v45 = vpop.f32.mrb[48].mxu1  ;;  %2732 = vmatpush3.bf16.msra.mxu0 %v2954_v11 }
 0x623   :  { %v2210_v46 = vadd.f32 %v2716_v29, %v2676_v44  ;;  %v2718_v42 = vpop.f32.mrb[49].mxu1  ;;  %v2225_v49 = vmul.f32 0.04, %v2207_v32  ;;  %2733 = vmatprep.subr.bf16.mxu0 %v2955_v13 }
 0x624   :  { %v2719_v33 = vadd.f32 %v2718_v42, %v2717_v45  ;;  %v2720_v34 = vpop.f32.mrb[50].mxu1 }
 0x625   :  { %v2226_v25 = vmul.f32 0.04, %v2210_v46  ;;  %v2677_v39 = vpop.f32.mrb[44].mxu0  ;;  %v2721_v38 = vpop.f32.mrb[51].mxu1 }
 0x626   :  { %v2722_v4 = vadd.f32 %v2721_v38, %v2720_v34  ;;  %v2678_v48 = vpop.f32.mrb[45].mxu0  ;;  %2734 = vmatpush3.bf16.msra.mxu0 %v2956_v15 }
 0x627   :  { %v2679_v50 = vadd.f32 %v2678_v48, %v2677_v39  ;;  %v2680_v51 = vpop.f32.mrb[46].mxu0  ;;  %v2848_v52 = vpack.i.bf16 %v2226_v25, %v2225_v49  ;;  %v2311_v55 = vpack.c.bf16 %v2226_v25, %v2225_v49  ;;  %2735 = vmatprep.subr.bf16.mxu0 %v2957_v16 }
 0x628   :  { %v2681_v53 = vpop.f32.mrb[47].mxu0 }
 0x629   :  { %v2215_v23 = vadd.f32 %v2719_v33, %v2679_v50  ;;  %v2682_v21 = vadd.f32 %v2681_v53, %v2680_v51  ;;  %2849 = vrot.lane.b32.xlu1 %v2848_v52, %s2994_s7 }
 0x62a   :  { %2736 = vmatpush3.bf16.msra.mxu0 %v2958_v7 }
 0x62b   :  { %v2218_v47 = vadd.f32 %v2722_v4, %v2682_v21  ;;  %v2227_v54 = vmul.f32 0.04, %v2215_v23  ;;  %2737 = vmatprep.subr.bf16.mxu0 %v2959_v61 }
 0x62d   :  { %v2228_v60 = vmul.f32 0.04, %v2218_v47  ;;  %2864 = vrot.lane.b32.xlu1 %v2848_v52, %s2995_s22 }
 0x62e   :  { %2738 = vmatpush3.bf16.msra.mxu0 %v2960_v57 }
 0x62f   :  { %v2853_v62 = vpack.i.bf16 %v2228_v60, %v2227_v54  ;;  %v2312_v56 = vpack.c.bf16 %v2228_v60, %v2227_v54 }
 0x631   :  { %2854 = vrot.lane.b32.xlu0 %v2853_v62, %s2994_s7  ;;  %2874 = vrot.lane.b32.xlu1 %v2853_v62, %s2995_s22 }
 0x635   :  { %2859 = vrot.lane.b32.xlu0 %v2838_v40, %s2986_s20 }
 0x639   :  { %2869 = vrot.lane.b32.xlu0 %v2848_v52, %s2986_s20 }
 0x63d   :  { %2879 = vrot.lane.b32.xlu0 %v2853_v62, %s2986_s20 }
 0x65b   :  { %2364 = vxpose.xlu0.c.b16.start [1/8] (narrow) %v2309_v19, 16 }
 0x65f   :  { %2365 = vxpose.xlu0.c.b16.cont [2/8] (narrow) %v2310_v37, 16 }
 0x663   :  { %2366 = vxpose.xlu0.c.b16.cont [3/8] (narrow) %v2311_v55, 16 }
 0x667   :  { %2367 = vxpose.xlu0.c.b16.cont [4/8] (narrow) %v2312_v56, 16 }
 0x68a   :  { %v2835_v17 = vpop.permute.xlu0 %2834  ;;  %v2825_v1 = vpop.permute.xlu1 %2824 }
 0x68b   :  { %v2837_v20 = vunpack.i.h.bf16 %v2835_v17  ;;  %v2836_v8 = vunpack.i.l.bf16 %v2835_v17  ;;  %v2827_v18 = vunpack.i.h.bf16 %v2825_v1  ;;  %v2826_v22 = vunpack.i.l.bf16 %v2825_v1 }
 0x68d   :  { %v2313_v10 = vpack.c.bf16 %v2837_v20, %v2836_v8  ;;  %v2317_v24 = vpack.c.bf16 %v2827_v18, %v2826_v22 }
 0x68e   :  { %v2830_v14 = vpop.permute.xlu1 %2829 }
 0x68f   :  { %2380 = vxpose.xlu1.c.b16.start [1/8] (narrow) %v2317_v24, 16  ;;  %2368 = vxpose.xlu0.c.b16.cont [5/8] (narrow) %v2313_v10, 16  ;;  %v2832_v37 = vunpack.i.h.bf16 %v2830_v14  ;;  %v2831_v30 = vunpack.i.l.bf16 %v2830_v14 }
 0x691   :  { %v2321_v33 = vpack.c.bf16 %v2832_v37, %v2831_v30 }
 0x692   :  { %v2840_v31 = vpop.permute.xlu0 %2839  ;;  %v2845_v36 = vpop.permute.xlu1 %2844 }
 0x693   :  { %v2842_v12 = vunpack.i.h.bf16 %v2840_v31  ;;  %v2841_v0 = vunpack.i.l.bf16 %v2840_v31  ;;  %v2847_v34 = vunpack.i.h.bf16 %v2845_v36  ;;  %v2846_v49 = vunpack.i.l.bf16 %v2845_v36 }
 0x695   :  { %v2318_v19 = vpack.c.bf16 %v2842_v12, %v2841_v0  ;;  %v2322_v48 = vpack.c.bf16 %v2847_v34, %v2846_v49 }
 0x697   :  { %2381 = vxpose.xlu1.c.b16.cont [2/8] (narrow) %v2318_v19, 16 }
 0x69b   :  { %v2850_v27 = vpop.permute.xlu1 %2849 }
 0x69c   :  { %v2852_v28 = vunpack.i.h.bf16 %v2850_v27  ;;  %v2851_v29 = vunpack.i.l.bf16 %v2850_v27 }
 0x69e   :  { %v2319_v26 = vpack.c.bf16 %v2852_v28, %v2851_v29 }
 0x69f   :  { %v2865_v42 = vpop.permute.xlu1 %2864 }
 0x6a0   :  { %2382 = vxpose.xlu1.c.b16.cont [3/8] (narrow) %v2319_v26, 16  ;;  %v2867_v50 = vunpack.i.h.bf16 %v2865_v42  ;;  %v2866_v51 = vunpack.i.l.bf16 %v2865_v42 }
 0x6a2   :  { %v2323_v47 = vpack.c.bf16 %v2867_v50, %v2866_v51 }
 0x6a3   :  { %v2855_v40 = vpop.permute.xlu0 %2854  ;;  %v2875_v53 = vpop.permute.xlu1 %2874 }
 0x6a4   :  { %v2857_v41 = vunpack.i.h.bf16 %v2855_v40  ;;  %v2856_v43 = vunpack.i.l.bf16 %v2855_v40  ;;  %v2877_v54 = vunpack.i.h.bf16 %v2875_v53  ;;  %v2876_v60 = vunpack.i.l.bf16 %v2875_v53 }
 0x6a6   :  { %v2320_v32 = vpack.c.bf16 %v2857_v41, %v2856_v43  ;;  %v2324_v56 = vpack.c.bf16 %v2877_v54, %v2876_v60 }
 0x6a7   :  { %v2860_v44 = vpop.permute.xlu0 %2859 }
 0x6a8   :  { %v2862_v45 = vunpack.i.h.bf16 %v2860_v44  ;;  %v2861_v46 = vunpack.i.l.bf16 %v2860_v44  ;;  %2383 = vxpose.xlu1.c.b16.cont [4/8] (narrow) %v2320_v32, 16 }
 0x6aa   :  { %v2314_v25 = vpack.c.bf16 %v2862_v45, %v2861_v46 }
 0x6ab   :  { %v2870_v39 = vpop.permute.xlu0 %2869 }
 0x6ac   :  { %v2872_v38 = vunpack.i.h.bf16 %v2870_v39  ;;  %v2871_v4 = vunpack.i.l.bf16 %v2870_v39  ;;  %2384 = vxpose.xlu1.c.b16.cont [5/8] (narrow) %v2321_v33, 16  ;;  %2369 = vxpose.xlu0.c.b16.cont [6/8] (narrow) %v2314_v25, 16 }
 0x6ae   :  { %v2315_v52 = vpack.c.bf16 %v2872_v38, %v2871_v4 }
 0x6af   :  { %v2880_v55 = vpop.permute.xlu0 %2879 }
 0x6b0   :  { %v2882_v23 = vunpack.i.h.bf16 %v2880_v55  ;;  %v2881_v21 = vunpack.i.l.bf16 %v2880_v55  ;;  %2385 = vxpose.xlu1.c.b16.cont [6/8] (narrow) %v2322_v48, 16  ;;  %2370 = vxpose.xlu0.c.b16.cont [7/8] (narrow) %v2315_v52, 16 }
 0x6b2   :  { %v2316_v62 = vpack.c.bf16 %v2882_v23, %v2881_v21 }
 0x6b4   :  { %2386 = vxpose.xlu1.c.b16.cont [7/8] (narrow) %v2323_v47, 16  ;;  %2371 = vxpose.xlu0.c.b16.end [8/8] (narrow) %v2316_v62, 16 }
 0x6b8   :  { %2387 = vxpose.xlu1.c.b16.end [8/8] (narrow) %v2324_v56, 16 }
 0x6fe   :  { %v2372_v58 = vpop.trf.xlu0 }
 0x702   :  { %v2388_v63 = vpop.trf.xlu1 }
 0x703   :  { %2524 = vmatprep.mubr.bf16.mxu0 %v2388_v63 }
 0x704   :  { %2525 = vmatmul.mubr.bf16.vlgmr.msra.gmra.mrb[48].mxu0 %v2372_v58 }
 0x7d7   :  { %v2739_v35 = vpop.f32.mrb[48].mxu0 }
 0x7d8   :  { %v2740_v3 = vpop.f32.mrb[49].mxu0 }
 0x7d9   :  { %v2741_v5 = vadd.f32 %v2740_v3, %v2739_v35  ;;  %v2742_v6 = vpop.f32.mrb[50].mxu0 }
 0x7da   :  { %v2743_v59 = vpop.f32.mrb[51].mxu0 }
 0x7db   :  { %v2527_v9 = vadd.f32 %v2741_v5, %v2626_v2 }
 0x7dd   :  { %vm2532_vm2 = vcmp.gt.f32.partialorder %v2527_v9, 0.0  ;;  %v2533_v11 = vmul.f32 0.2, %v2527_v9 }
 0x7df   :  { %v2534_v13 = vsel %vm2532_vm2, %v2527_v9, %v2533_v11 }
 0x7e0   :  { %2535 = vst [vmem:[#allocation2] sm:$0x3] %v2534_v13 }
 0x7e1   :  { %2972 = shalt.err (!%p2969_p4)
}
 0x7e2   :  { %s2973_s16 = scalar_lea.hbm %s4301_s10, 32 }
 0x7e3   :  { %p2974_p5 = scmp.ne.s32.totalorder %s4301_s10, %s2973_s16  ;;  %p2977_p6 = scmp.lt.u32.totalorder %s2973_s16, %s4301_s10 }
 0x7e5   :  { %p2979_p7 = pnand %p2977_p6, %p2974_p5 }
 0x7e7   :  { %2982 = shalt.err (!%p2979_p7)
}
 0x7e8   :  { %2545 = dma.vmem_to_hbm [thread:$0]  %s2543_s14, 32, %s4301_s10, [#allocation3]  }
 0x7e9   :  { %2983 = dma.done.wait [#allocation3], 32  }
 0x7ea   :  { %2984 = vsyncadd [#allocation3], 4294967264 }
 0x7eb   :  { %2549 = vsyncpa [#allocation3], 1 }

// kernel: tpu_custom_call.1
= control target key start
LH: loop header
LB: loop body
LE: loop exit
PB: predicated region body
PF: predicated region fallthrough
CT: control target
= control target key end

     0   :  { %s2985_s19 = smov 127   ;;  %s2986_s20 = smov 126   ;;  %s4291_s0 = inlined_call_operand.vmem [shape: bf16[1,8,896], index: 0, kind: input, shape index: {}]   ;;  %s4292_s1 = inlined_call_operand.vmem [shape: bf16[16,72], index: 1, kind: input, shape index: {}]   ;;  %s4293_s2 = inlined_call_operand.vmem [shape: f32[16,1], index: 2, kind: input, shape index: {}]   ;;  %s4294_s3 = inlined_call_operand.vmem [shape: bf16[32,144], index: 3, kind: input, shape index: {}]   ;;  %s4295_s4 = inlined_call_operand.vmem [shape: f32[32,1], index: 4, kind: input, shape index: {}]   ;;  %s4296_s5 = inlined_call_operand.vmem [shape: bf16[64,288], index: 5, kind: input, shape index: {}]   ;;  %s4297_s6 = inlined_call_operand.vmem [shape: f32[64,1], index: 6, kind: input, shape index: {}]   ;;  %s4298_s7 = inlined_call_operand.vmem [shape: bf16[512,8], index: 7, kind: input, shape index: {}]   ;;  %s4299_s8 = inlined_call_operand.vmem [shape: bf16[256,128], index: 8, kind: input, shape index: {}]   ;;  %s4300_s9 = inlined_call_operand.vmem [shape: f32[1,128], index: 9, kind: input, shape index: {}]   ;;  %s4301_s10 = inlined_call_operand.hbm [shape: f32[1,2,128], index: 10, kind: output, shape index: {}]  }
   0x1   :  { %v37_v0 = vld [vmem:[%s4291_s0] sm:$0xff]  ;;  %v38_v1 = vld [vmem:[%s4291_s0 + $0x8] sm:$0xff]  ;;  %v39_v4 = vld [vmem:[%s4291_s0 + $0x10] sm:$0xff]  ;;  %s2987_s21 = smov 112   ;;  %s2988_s22 = smov 111  }
   0x2   :  { %v3058_v2 = vcombine.high %v37_v0, %v37_v0  ;;  %v3060_v3 = vcombine.low %v37_v0, %v37_v0  ;;  %v3069_v5 = vcombine.low %v38_v1, %v38_v1  ;;  %v3071_v6 = vcombine.high %v38_v1, %v38_v1  ;;  %s2989_s23 = smov 110  }
   0x3   :  { %v3077_v7 = vcombine.low %v39_v4, %v39_v4 }
   0x4   :  { %61 = vrot.lane.b32.xlu0 %v3058_v2, %s2985_s19  ;;  %59 = vrot.lane.b32.xlu1 %v3060_v3, %s2985_s19 }
   0x8   :  { %63 = vrot.lane.b32.xlu0 %v3069_v5, %s2985_s19  ;;  %65 = vrot.lane.b32.xlu1 %v3071_v6, %s2985_s19 }
   0xc   :  { %67 = vrot.lane.b32.xlu0 %v3077_v7, %s2985_s19  ;;  %82 = vrot.lane.b32.xlu1 %v3058_v2, %s2986_s20 }
  0x10   :  { %84 = vrot.lane.b32.xlu0 %v3069_v5, %s2986_s20  ;;  %103 = vrot.lane.b32.xlu1 %v3058_v2, %s2987_s21 }
  0x14   :  { %105 = vrot.lane.b32.xlu0 %v3069_v5, %s2987_s21  ;;  %80 = vrot.lane.b32.xlu1 %v3060_v3, %s2986_s20 }
  0x18   :  { %86 = vrot.lane.b32.xlu0 %v3071_v6, %s2986_s20  ;;  %88 = vrot.lane.b32.xlu1 %v3077_v7, %s2986_s20 }
  0x1c   :  { %101 = vrot.lane.b32.xlu0 %v3060_v3, %s2987_s21  ;;  %107 = vrot.lane.b32.xlu1 %v3071_v6, %s2987_s21 }
  0x20   :  { %109 = vrot.lane.b32.xlu0 %v3077_v7, %s2987_s21  ;;  %124 = vrot.lane.b32.xlu1 %v3058_v2, %s2988_s22 }
  0x24   :  { %126 = vrot.lane.b32.xlu0 %v3069_v5, %s2988_s22  ;;  %145 = vrot.lane.b32.xlu1 %v3058_v2, %s2989_s23 }
  0x28   :  { %147 = vrot.lane.b32.xlu0 %v3069_v5, %s2989_s23  ;;  %122 = vrot.lane.b32.xlu1 %v3060_v3, %s2988_s22 }
  0x2c   :  { %128 = vrot.lane.b32.xlu0 %v3071_v6, %s2988_s22  ;;  %130 = vrot.lane.b32.xlu1 %v3077_v7, %s2988_s22 }
  0x30   :  { %143 = vrot.lane.b32.xlu0 %v3060_v3, %s2989_s23  ;;  %149 = vrot.lane.b32.xlu1 %v3071_v6, %s2989_s23 }
  0x31   :  { %15 = vsyncpa [#allocation3], 0  ;;  %s2990_s24 = smov 96   ;;  %s2991_s25 = smov 95   ;;  %v2992_v8 = vmov 0   ;;  %v3155_v9 = vcombine.high %v39_v4, %v39_v4  ;;  %v326_v11 = vld [vmem:[%s4293_s2] sm:$0xff] }
  0x32   :  { %397 = vmatprep.mubr.bf16.mxu0 %v2992_v8  ;;  %440 = vmatprep.mubr.bf16.mxu1 %v2992_v8  ;;  %s2993_s26 = smov 94   ;;  %v2889_v10 = vld [vmem:[%s4291_s0 + $0x18] ss:$0 sps:$4 sm:$0xff]   ;;  %v327_v12 = vld [vmem:[%s4293_s2 + $0x8] sm:$0xff]  ;;  %vm73_vm0 = vcmask 1039360   ;;  %vm227_vm1 = vcmask 1043456  }
  0x33   :  { %2821 = vset.pattern.permute.xlu0 %v2992_v8  ;;  %2822 = vset.pattern.permute.xlu1 %v2992_v8  ;;  %vm94_vm2 = vcmask 1031168   ;;  %vm115_vm3 = vcmask 916480   ;;  %vm136_vm4 = vcmask 908288   ;;  %vm157_vm5 = vcmask 900096  }
  0x34   :  { %151 = vrot.lane.b32.xlu0 %v3077_v7, %s2989_s23  ;;  %166 = vrot.lane.b32.xlu1 %v3058_v2, %s2990_s24  ;;  %vm178_vm6 = vcmask 785408   ;;  %vm199_vm7 = vcmask 777216   ;;  %vm220_vm8 = vcmask 769024   ;;  %vm343_vm9 = vcmask 588800  }
  0x38   :  { %168 = vrot.lane.b32.xlu0 %v3069_v5, %s2990_s24  ;;  %187 = vrot.lane.b32.xlu1 %v3058_v2, %s2991_s25 }
  0x3c   :  { %189 = vrot.lane.b32.xlu0 %v3069_v5, %s2991_s25  ;;  %164 = vrot.lane.b32.xlu1 %v3060_v3, %s2990_s24 }
  0x40   :  { %170 = vrot.lane.b32.xlu0 %v3071_v6, %s2990_s24  ;;  %172 = vrot.lane.b32.xlu1 %v3077_v7, %s2990_s24 }
  0x44   :  { %185 = vrot.lane.b32.xlu0 %v3060_v3, %s2991_s25  ;;  %191 = vrot.lane.b32.xlu1 %v3071_v6, %s2991_s25 }
  0x48   :  { %193 = vrot.lane.b32.xlu0 %v3077_v7, %s2991_s25  ;;  %206 = vrot.lane.b32.xlu1 %v3060_v3, %s2993_s26 }
  0x4c   :  { %208 = vrot.lane.b32.xlu0 %v3058_v2, %s2993_s26  ;;  %210 = vrot.lane.b32.xlu1 %v3069_v5, %s2993_s26 }
  0x50   :  { %212 = vrot.lane.b32.xlu0 %v3071_v6, %s2993_s26  ;;  %214 = vrot.lane.b32.xlu1 %v3077_v7, %s2993_s26 }
  0x54   :  { %69 = vrot.lane.b32.xlu0 %v3155_v9, %s2985_s19  ;;  %71 = vrot.lane.b32.xlu1 %v2889_v10, %s2985_s19 }
  0x58   :  { %90 = vrot.lane.b32.xlu0 %v3155_v9, %s2986_s20  ;;  %92 = vrot.lane.b32.xlu1 %v2889_v10, %s2986_s20 }
  0x5c   :  { %111 = vrot.lane.b32.xlu0 %v3155_v9, %s2987_s21  ;;  %113 = vrot.lane.b32.xlu1 %v2889_v10, %s2987_s21 }
  0x60   :  { %132 = vrot.lane.b32.xlu0 %v3155_v9, %s2988_s22  ;;  %134 = vrot.lane.b32.xlu1 %v2889_v10, %s2988_s22 }
  0x64   :  { %153 = vrot.lane.b32.xlu0 %v3155_v9, %s2989_s23  ;;  %155 = vrot.lane.b32.xlu1 %v2889_v10, %s2989_s23 }
  0x68   :  { %174 = vrot.lane.b32.xlu0 %v3155_v9, %s2990_s24  ;;  %176 = vrot.lane.b32.xlu1 %v2889_v10, %s2990_s24 }
  0x6c   :  { %195 = vrot.lane.b32.xlu0 %v3155_v9, %s2991_s25  ;;  %197 = vrot.lane.b32.xlu1 %v2889_v10, %s2991_s25 }
  0x70   :  { %216 = vrot.lane.b32.xlu0 %v3155_v9, %s2993_s26  ;;  %218 = vrot.lane.b32.xlu1 %v2889_v10, %s2993_s26 }
  0x74   :  { %330 = vperm.xlu0 %2821, %v326_v11   ;;  %335 = vperm.xlu1 %2822, %v327_v12  }
  0x76   :  { %v62_v13 = vpop.permute.xlu0 %61  ;;  %v60_v14 = vpop.permute.xlu1 %59 }
  0x77   :  { %v74_v15 = vsel %vm73_vm0, %v60_v14, %v62_v13 }
  0x78   :  { %v230_v20 = vsel %vm227_vm1, %v3060_v3, %v74_v15 }
  0x7a   :  { %v64_v16 = vpop.permute.xlu0 %63  ;;  %v66_v17 = vpop.permute.xlu1 %65 }
  0x7b   :  { %v75_v18 = vsel %vm73_vm0, %v62_v13, %v64_v16  ;;  %v76_v23 = vsel %vm73_vm0, %v64_v16, %v66_v17 }
  0x7c   :  { %v234_v19 = vsel %vm227_vm1, %v3058_v2, %v75_v18  ;;  %v238_v26 = vsel %vm227_vm1, %v3069_v5, %v76_v23 }
  0x7d   :  { %365 = vmatprep.subr.bf16.mxu0 %v234_v19 }
  0x7e   :  { %v3196_v21 = vpop.permute.xlu0 %67  ;;  %366 = vmatpush1.bf16.msra.mxu0 %v230_v20  ;;  %v83_v22 = vpop.permute.xlu1 %82 }
  0x7f   :  { %v77_v24 = vsel %vm73_vm0, %v66_v17, %v3196_v21 }
  0x80   :  { %v242_v25 = vsel %vm227_vm1, %v3071_v6, %v77_v24 }
  0x81   :  { %408 = vmatprep.subr.bf16.mxu1 %v242_v25 }
  0x82   :  { %v85_v27 = vpop.permute.xlu0 %84  ;;  %409 = vmatpush1.bf16.msra.mxu1 %v238_v26  ;;  %v104_v28 = vpop.permute.xlu1 %103 }
  0x83   :  { %v96_v31 = vsel %vm94_vm2, %v83_v22, %v85_v27 }
  0x86   :  { %v106_v29 = vpop.permute.xlu0 %105  ;;  %v81_v30 = vpop.permute.xlu1 %80 }
  0x87   :  { %v117_v32 = vsel %vm115_vm3, %v104_v28, %v106_v29  ;;  %v95_v38 = vsel %vm94_vm2, %v81_v30, %v83_v22 }
  0x88   :  { %v258_v33 = vsel %vm227_vm1, %v96_v31, %v117_v32 }
  0x89   :  { %367 = vmatprep.subr.bf16.mxu0 %v258_v33 }
  0x8a   :  { %v87_v34 = vpop.permute.xlu0 %86  ;;  %v3208_v35 = vpop.permute.xlu1 %88 }
  0x8b   :  { %v98_v44 = vsel %vm94_vm2, %v87_v34, %v3208_v35  ;;  %v97_v46 = vsel %vm94_vm2, %v85_v27, %v87_v34 }
  0x8e   :  { %v102_v36 = vpop.permute.xlu0 %101  ;;  %v108_v37 = vpop.permute.xlu1 %107 }
  0x8f   :  { %v116_v39 = vsel %vm115_vm3, %v102_v36, %v104_v28  ;;  %v118_v41 = vsel %vm115_vm3, %v106_v29, %v108_v37 }
  0x90   :  { %v254_v40 = vsel %vm227_vm1, %v95_v38, %v116_v39  ;;  %v262_v48 = vsel %vm227_vm1, %v97_v46, %v118_v41  ;;  %v3266_v39 = vld [vmem:[%s4292_s1] sm:$0xff]  }
  0x91   :  { %368 = vmatpush1.bf16.msra.mxu0 %v254_v40 }
  0x92   :  { %v3214_v42 = vpop.permute.xlu0 %109  ;;  %v125_v43 = vpop.permute.xlu1 %124 }
  0x93   :  { %v119_v45 = vsel %vm115_vm3, %v108_v37, %v3214_v42 }
  0x94   :  { %v266_v47 = vsel %vm227_vm1, %v98_v44, %v119_v45 }
  0x95   :  { %410 = vmatprep.subr.bf16.mxu1 %v266_v47 }
  0x96   :  { %v127_v49 = vpop.permute.xlu0 %126  ;;  %411 = vmatpush1.bf16.msra.mxu1 %v262_v48  ;;  %v146_v50 = vpop.permute.xlu1 %145 }
  0x97   :  { %v138_v53 = vsel %vm136_vm4, %v125_v43, %v127_v49 }
  0x9a   :  { %v148_v51 = vpop.permute.xlu0 %147  ;;  %v123_v52 = vpop.permute.xlu1 %122 }
  0x9b   :  { %v159_v54 = vsel %vm157_vm5, %v146_v50, %v148_v51  ;;  %v137_v60 = vsel %vm136_vm4, %v123_v52, %v125_v43 }
  0x9c   :  { %v282_v55 = vsel %vm227_vm1, %v138_v53, %v159_v54 }
  0x9d   :  { %369 = vmatprep.subr.bf16.mxu0 %v282_v55 }
  0x9e   :  { %v129_v56 = vpop.permute.xlu0 %128  ;;  %v3226_v57 = vpop.permute.xlu1 %130 }
  0x9f   :  { %v140_v2 = vsel %vm136_vm4, %v129_v56, %v3226_v57  ;;  %v139_v4 = vsel %vm136_vm4, %v127_v49, %v129_v56 }
  0xa2   :  { %v144_v58 = vpop.permute.xlu0 %143  ;;  %v150_v59 = vpop.permute.xlu1 %149 }
  0xa3   :  { %v158_v61 = vsel %vm157_vm5, %v144_v58, %v146_v50  ;;  %v160_v63 = vsel %vm157_vm5, %v148_v51, %v150_v59 }
  0xa4   :  { %v278_v62 = vsel %vm227_vm1, %v137_v60, %v158_v61  ;;  %v286_v6 = vsel %vm227_vm1, %v139_v4, %v160_v63 }
  0xa5   :  { %370 = vmatpush1.bf16.msra.mxu0 %v278_v62 }
  0xa6   :  { %v3232_v0 = vpop.permute.xlu0 %151  ;;  %v167_v1 = vpop.permute.xlu1 %166 }
  0xa7   :  { %v161_v3 = vsel %vm157_vm5, %v150_v59, %v3232_v0 }
  0xa8   :  { %v290_v5 = vsel %vm227_vm1, %v140_v2, %v161_v3 }
  0xa9   :  { %412 = vmatprep.subr.bf16.mxu1 %v290_v5 }
  0xaa   :  { %v169_v10 = vpop.permute.xlu0 %168  ;;  %413 = vmatpush1.bf16.msra.mxu1 %v286_v6  ;;  %v188_v11 = vpop.permute.xlu1 %187 }
  0xab   :  { %v180_v14 = vsel %vm178_vm6, %v167_v1, %v169_v10 }
  0xae   :  { %v190_v12 = vpop.permute.xlu0 %189  ;;  %v165_v13 = vpop.permute.xlu1 %164 }
  0xaf   :  { %v201_v15 = vsel %vm199_vm7, %v188_v11, %v190_v12  ;;  %v179_v22 = vsel %vm178_vm6, %v165_v13, %v167_v1 }
  0xb0   :  { %v306_v16 = vsel %vm227_vm1, %v180_v14, %v201_v15 }
  0xb1   :  { %371 = vmatprep.subr.bf16.mxu0 %v306_v16 }
  0xb2   :  { %v171_v17 = vpop.permute.xlu0 %170  ;;  %v3244_v18 = vpop.permute.xlu1 %172 }
  0xb3   :  { %v182_v28 = vsel %vm178_vm6, %v171_v17, %v3244_v18  ;;  %v181_v30 = vsel %vm178_vm6, %v169_v10, %v171_v17 }
  0xb6   :  { %v186_v19 = vpop.permute.xlu0 %185  ;;  %v192_v20 = vpop.permute.xlu1 %191 }
  0xb7   :  { %v200_v23 = vsel %vm199_vm7, %v186_v19, %v188_v11  ;;  %v202_v25 = vsel %vm199_vm7, %v190_v12, %v192_v20 }
  0xb8   :  { %v302_v24 = vsel %vm227_vm1, %v179_v22, %v200_v23  ;;  %v310_v32 = vsel %vm227_vm1, %v181_v30, %v202_v25 }
  0xb9   :  { %372 = vmatpush1.bf16.msra.mxu0 %v302_v24 }
  0xba   :  { %v3250_v26 = vpop.permute.xlu0 %193  ;;  %v207_v27 = vpop.permute.xlu1 %206 }
  0xbb   :  { %v203_v29 = vsel %vm199_vm7, %v192_v20, %v3250_v26 }
  0xbc   :  { %v314_v31 = vsel %vm227_vm1, %v182_v28, %v203_v29 }
  0xbd   :  { %414 = vmatprep.subr.bf16.mxu1 %v314_v31 }
  0xbe   :  { %v209_v33 = vpop.permute.xlu0 %208  ;;  %415 = vmatpush1.bf16.msra.mxu1 %v310_v32  ;;  %v211_v34 = vpop.permute.xlu1 %210 }
  0xbf   :  { %v222_v36 = vsel %vm220_vm8, %v209_v33, %v211_v34  ;;  %v221_v37 = vsel %vm220_vm8, %v207_v27, %v209_v33 }
  0xc0   :  { %2558 = vmatprep.subr.msk.bf16.mxu0 %vm227_vm1, %v222_v36  ;;  %v348_v38 = vsel %vm227_vm1, %v221_v37, 0 }
  0xc1   :  { %374 = vmatpush1.bf16.msra.mxu0 %v348_v38 }
  0xc2   :  { %v213_v40 = vpop.permute.xlu0 %212  ;;  %v215_v41 = vpop.permute.xlu1 %214 }
  0xc3   :  { %v224_v43 = vsel %vm220_vm8, %v213_v40, %v215_v41  ;;  %v223_v44 = vsel %vm220_vm8, %v211_v34, %v213_v40 }
  0xc4   :  { %2559 = vmatmul.mubr.msk.bf16.vlgmr.msra.gmra.mrb[0].mxu0 %vm343_vm9, %v3266_v39  ;;  %2560 = vmatprep.subr.msk.bf16.mxu1 %vm227_vm1, %v224_v43  ;;  %v354_v45 = vsel %vm227_vm1, %v223_v44, 0 }
  0xc5   :  { %417 = vmatpush1.bf16.msra.mxu1 %v354_v45  ;;  %483 = vmatprep.mubr.bf16.mxu0 %v2992_v8 }
  0xc6   :  { %v70_v46 = vpop.permute.xlu0 %69  ;;  %v72_v47 = vpop.permute.xlu1 %71 }
  0xc7   :  { %v78_v48 = vsel %vm73_vm0, %v3196_v21, %v70_v46  ;;  %v79_v49 = vsel %vm73_vm0, %v70_v46, %v72_v47 }
  0xc8   :  { %2561 = vmatmul.mubr.msk.bf16.vlgmr.msra.gmra.mrb[0].mxu1 %vm343_vm9, %v3266_v39  ;;  %v250_v50 = vsel %vm227_vm1, %v3155_v9, %v79_v49  ;;  %v246_v51 = vsel %vm227_vm1, %v3077_v7, %v78_v48 }
  0xc9   :  { %451 = vmatprep.subr.bf16.mxu0 %v250_v50 }
  0xca   :  { %v91_v52 = vpop.permute.xlu0 %90  ;;  %452 = vmatpush1.bf16.msra.mxu0 %v246_v51  ;;  %v93_v53 = vpop.permute.xlu1 %92 }
  0xcb   :  { %v100_v54 = vsel %vm94_vm2, %v91_v52, %v93_v53  ;;  %v99_v21 = vsel %vm94_vm2, %v3208_v35, %v91_v52 }
  0xce   :  { %v112_v55 = vpop.permute.xlu0 %111  ;;  %v114_v56 = vpop.permute.xlu1 %113 }
  0xcf   :  { %v120_v58 = vsel %vm115_vm3, %v3214_v42, %v112_v55  ;;  %v121_v59 = vsel %vm115_vm3, %v112_v55, %v114_v56 }
  0xd0   :  { %v274_v9 = vsel %vm227_vm1, %v100_v54, %v121_v59  ;;  %v270_v7 = vsel %vm227_vm1, %v99_v21, %v120_v58 }
  0xd1   :  { %453 = vmatprep.subr.bf16.mxu0 %v274_v9 }
  0xd2   :  { %v133_v60 = vpop.permute.xlu0 %132  ;;  %454 = vmatpush1.bf16.msra.mxu0 %v270_v7  ;;  %v135_v61 = vpop.permute.xlu1 %134 }
  0xd3   :  { %v142_v62 = vsel %vm136_vm4, %v133_v60, %v135_v61  ;;  %v141_v35 = vsel %vm136_vm4, %v3226_v57, %v133_v60 }
  0xd6   :  { %v154_v63 = vpop.permute.xlu0 %153  ;;  %v156_v1 = vpop.permute.xlu1 %155 }
  0xd7   :  { %v162_v42 = vsel %vm157_vm5, %v3232_v0, %v154_v63  ;;  %v163_v2 = vsel %vm157_vm5, %v154_v63, %v156_v1 }
  0xd8   :  { %v298_v3 = vsel %vm227_vm1, %v142_v62, %v163_v2  ;;  %v294_v4 = vsel %vm227_vm1, %v141_v35, %v162_v42 }
  0xd9   :  { %455 = vmatprep.subr.bf16.mxu0 %v298_v3 }
  0xda   :  { %v175_v5 = vpop.permute.xlu0 %174  ;;  %456 = vmatpush1.bf16.msra.mxu0 %v294_v4  ;;  %v177_v6 = vpop.permute.xlu1 %176 }
  0xdb   :  { %v184_v10 = vsel %vm178_vm6, %v175_v5, %v177_v6  ;;  %v183_v57 = vsel %vm178_vm6, %v3244_v18, %v175_v5 }
  0xde   :  { %v196_v11 = vpop.permute.xlu0 %195  ;;  %v198_v12 = vpop.permute.xlu1 %197 }
  0xdf   :  { %v204_v0 = vsel %vm199_vm7, %v3250_v26, %v196_v11  ;;  %v205_v13 = vsel %vm199_vm7, %v196_v11, %v198_v12 }
  0xe0   :  { %v322_v14 = vsel %vm227_vm1, %v184_v10, %v205_v13  ;;  %v318_v15 = vsel %vm227_vm1, %v183_v57, %v204_v0 }
  0xe1   :  { %457 = vmatprep.subr.bf16.mxu0 %v322_v14  ;;  %v3371_v14 = vld [vmem:[%s4294_s3 + $0x4] ss:$8 sps:$4 sm:$0xff]  }
  0xe2   :  { %v217_v16 = vpop.permute.xlu0 %216  ;;  %458 = vmatpush1.bf16.msra.mxu0 %v318_v15  ;;  %v219_v17 = vpop.permute.xlu1 %218  ;;  %v722_v15 = vld [vmem:[%s4295_s4] sm:$0xff] }
  0xe3   :  { %v225_v19 = vsel %vm220_vm8, %v215_v41, %v217_v16  ;;  %v226_v20 = vsel %vm220_vm8, %v217_v16, %v219_v17  ;;  %v723_v16 = vld [vmem:[%s4295_s4 + $0x8] sm:$0xff]  ;;  %v724_v17 = vld [vmem:[%s4295_s4 + $0x10] sm:$0xff] }
  0xe4   :  { %2562 = vmatprep.subr.msk.bf16.mxu0 %vm227_vm1, %v226_v20  ;;  %v360_v18 = vsel %vm227_vm1, %v225_v19, 0  ;;  %v725_v19 = vld [vmem:[%s4295_s4 + $0x18] sm:$0xff] }
  0xe6   :  { %460 = vmatpush1.bf16.msra.mxu0 %v360_v18 }
  0xe9   :  { %2563 = vmatmul.mubr.msk.bf16.vlgmr.msra.gmra.mrb[4].mxu0 %vm343_vm9, %v3266_v39 }
  0xf3   :  { %v3314_v22 = vpop.permute.xlu0 %330  ;;  %v3316_v24 = vpop.permute.xlu1 %335 }
 0x197   :  { %v399_v23 = vpop.f32.mrb[0].mxu0 }
 0x198   :  { %v400_v25 = vadd.f32 %v399_v23, %v3314_v22  ;;  %v401_v26 = vpop.f32.mrb[1].mxu0 }
 0x199   :  { %v402_v27 = vadd.f32 %v401_v26, %v3314_v22  ;;  %v403_v28 = vpop.f32.mrb[2].mxu0 }
 0x19a   :  { %v506_v29 = vmul.f32 0.2, %v400_v25  ;;  %v404_v30 = vadd.f32 %v403_v28, %v3316_v24  ;;  %v405_v31 = vpop.f32.mrb[3].mxu0  ;;  %vm494_vm10 = vcmp.gt.f32.partialorder %v400_v25, 0.0 }
 0x19b   :  { %v507_v32 = vmul.f32 0.2, %v402_v27  ;;  %v406_v33 = vadd.f32 %v405_v31, %v3316_v24  ;;  %v442_v34 = vpop.f32.mrb[0].mxu1  ;;  %vm495_vm11 = vcmp.gt.f32.partialorder %v402_v27, 0.0 }
 0x19c   :  { %vm500_vm12 = vcmp.gt.f32.partialorder %v404_v30, 0.0  ;;  %v512_v36 = vmul.f32 0.2, %v404_v30  ;;  %v443_v37 = vadd.f32 %v442_v34, %v3314_v22  ;;  %v444_v38 = vpop.f32.mrb[1].mxu1  ;;  %v518_v43 = vsel %vm494_vm10, %v400_v25, %v506_v29 }
 0x19d   :  { %vm501_vm13 = vcmp.gt.f32.partialorder %v406_v33, 0.0  ;;  %v513_v39 = vmul.f32 0.2, %v406_v33  ;;  %v445_v40 = vadd.f32 %v444_v38, %v3314_v22  ;;  %v446_v41 = vpop.f32.mrb[2].mxu1  ;;  %v519_v48 = vsel %vm495_vm11, %v402_v27, %v507_v32 }
 0x19e   :  { %v524_v44 = vsel %vm500_vm12, %v404_v30, %v512_v36  ;;  %v508_v45 = vmul.f32 0.2, %v443_v37  ;;  %v447_v46 = vadd.f32 %v446_v41, %v3316_v24  ;;  %v448_v47 = vpop.f32.mrb[3].mxu1  ;;  %vm496_vm14 = vcmp.gt.f32.partialorder %v443_v37, 0.0 }
 0x19f   :  { %v530_v49 = vpack.c.bf16 %v524_v44, %v518_v43  ;;  %v525_v50 = vsel %vm501_vm13, %v406_v33, %v513_v39  ;;  %v509_v53 = vmul.f32 0.2, %v445_v40  ;;  %v449_v54 = vadd.f32 %v448_v47, %v3316_v24 }
 0x1a0   :  { %v3325_v51 = vpack.c.bf16 %v525_v50, %v519_v48  ;;  %vm502_vm15 = vcmp.gt.f32.partialorder %v447_v46, 0.0  ;;  %v514_v52 = vmul.f32 0.2, %v447_v46  ;;  %v520_v55 = vsel %vm496_vm14, %v443_v37, %v508_v45 }
 0x1a1   :  { %542 = vrot.lane.b32.xlu1 %v530_v49, %s2985_s19  ;;  %vm497_vm1 = vcmp.gt.f32.partialorder %v445_v40, 0.0  ;;  %vm503_vm9 = vcmp.gt.f32.partialorder %v449_v54, 0.0  ;;  %v515_v58 = vmul.f32 0.2, %v449_v54  ;;  %vm764_vm14 = vcmask 130048  }
 0x1a2   :  { %v526_v56 = vsel %vm502_vm15, %v447_v46, %v514_v52  ;;  %771 = vmatprep.subr.bf16.mxu1 %v3325_v51  ;;  %v521_v59 = vsel %vm497_vm1, %v445_v40, %v509_v53  ;;  %2568 = vmatprep.mubr.msk.bf16.mxu1 %vm764_vm14, %v3371_v14 }
 0x1a3   :  { %v532_v21 = vpack.c.bf16 %v526_v56, %v520_v55  ;;  %772 = vmatpush1.bf16.msra.mxu1 %v530_v49  ;;  %v527_v9 = vsel %vm503_vm9, %v449_v54, %v515_v58  ;;  %2570 = vmatprep.mubr.msk.bf16.mxu0 %vm764_vm14, %v3371_v14 }
 0x1a4   :  { %v3332_v7 = vpack.c.bf16 %v527_v9, %v521_v59 }
 0x1a5   :  { %546 = vrot.lane.b32.xlu0 %v532_v21, %s2985_s19  ;;  %568 = vrot.lane.b32.xlu1 %v532_v21, %s2986_s20 }
 0x1a6   :  { %824 = vmatprep.subr.bf16.mxu0 %v3332_v7 }
 0x1a7   :  { %825 = vmatpush1.bf16.msra.mxu0 %v532_v21 }
 0x1a9   :  { %564 = vrot.lane.b32.xlu0 %v530_v49, %s2986_s20  ;;  %586 = vrot.lane.b32.xlu1 %v530_v49, %s2987_s21 }
 0x1ad   :  { %590 = vrot.lane.b32.xlu0 %v532_v21, %s2987_s21  ;;  %612 = vrot.lane.b32.xlu1 %v532_v21, %s2988_s22 }
 0x1b1   :  { %608 = vrot.lane.b32.xlu0 %v530_v49, %s2988_s22  ;;  %630 = vrot.lane.b32.xlu1 %v530_v49, %s2989_s23 }
 0x1b5   :  { %634 = vrot.lane.b32.xlu0 %v532_v21, %s2989_s23  ;;  %656 = vrot.lane.b32.xlu1 %v532_v21, %s2990_s24 }
 0x1b9   :  { %652 = vrot.lane.b32.xlu0 %v530_v49, %s2990_s24  ;;  %674 = vrot.lane.b32.xlu1 %v530_v49, %s2991_s25 }
 0x1bc   :  { %v485_v60 = vpop.f32.mrb[4].mxu0 }
 0x1bd   :  { %v486_v61 = vadd.f32 %v485_v60, %v3314_v22  ;;  %v487_v62 = vpop.f32.mrb[5].mxu0  ;;  %678 = vrot.lane.b32.xlu0 %v532_v21, %s2991_s25  ;;  %544 = vrot.lane.b32.xlu1 %v3325_v51, %s2985_s19 }
 0x1be   :  { %v488_v63 = vadd.f32 %v487_v62, %v3314_v22  ;;  %v489_v1 = vpop.f32.mrb[6].mxu0 }
 0x1bf   :  { %v510_v35 = vmul.f32 0.2, %v486_v61  ;;  %v490_v42 = vadd.f32 %v489_v1, %v3316_v24  ;;  %v491_v2 = vpop.f32.mrb[7].mxu0  ;;  %vm498_vm10 = vcmp.gt.f32.partialorder %v486_v61, 0.0 }
 0x1c0   :  { %v511_v3 = vmul.f32 0.2, %v488_v63  ;;  %v492_v4 = vadd.f32 %v491_v2, %v3316_v24  ;;  %vm499_vm11 = vcmp.gt.f32.partialorder %v488_v63, 0.0 }
 0x1c1   :  { %vm504_vm12 = vcmp.gt.f32.partialorder %v490_v42, 0.0  ;;  %v516_v5 = vmul.f32 0.2, %v490_v42  ;;  %566 = vrot.lane.b32.xlu0 %v3325_v51, %s2986_s20  ;;  %700 = vrot.lane.b32.xlu1 %v532_v21, %s2993_s26  ;;  %v522_v10 = vsel %vm498_vm10, %v486_v61, %v510_v35  ;;  %v3474_v35 = vld [vmem:[%s4294_s3] ss:$8 sps:$4 sm:$0xff]  }
 0x1c2   :  { %vm505_vm13 = vcmp.gt.f32.partialorder %v492_v4, 0.0  ;;  %v517_v6 = vmul.f32 0.2, %v492_v4  ;;  %v523_v12 = vsel %vm499_vm11, %v488_v63, %v511_v3 }
 0x1c3   :  { %v528_v11 = vsel %vm504_vm12, %v490_v42, %v516_v5 }
 0x1c4   :  { %v3355_v57 = vpack.c.bf16 %v528_v11, %v522_v10  ;;  %v529_v0 = vsel %vm505_vm13, %v492_v4, %v517_v6  ;;  %v3481_v4 = vld [vmem:[%s4294_s3 + $0x14] ss:$8 sps:$4 sm:$0xff]  }
 0x1c5   :  { %v535_v13 = vpack.c.bf16 %v529_v0, %v523_v12  ;;  %696 = vrot.lane.b32.xlu0 %v530_v49, %s2993_s26  ;;  %588 = vrot.lane.b32.xlu1 %v3325_v51, %s2987_s21 }
 0x1c9   :  { %610 = vrot.lane.b32.xlu0 %v3325_v51, %s2988_s22  ;;  %632 = vrot.lane.b32.xlu1 %v3325_v51, %s2989_s23 }
 0x1cd   :  { %654 = vrot.lane.b32.xlu0 %v3325_v51, %s2990_s24  ;;  %676 = vrot.lane.b32.xlu1 %v3325_v51, %s2991_s25 }
 0x1d1   :  { %698 = vrot.lane.b32.xlu0 %v3325_v51, %s2993_s26  ;;  %548 = vrot.lane.b32.xlu1 %v3332_v7, %s2985_s19 }
 0x1d5   :  { %570 = vrot.lane.b32.xlu0 %v3332_v7, %s2986_s20  ;;  %592 = vrot.lane.b32.xlu1 %v3332_v7, %s2987_s21 }
 0x1d9   :  { %614 = vrot.lane.b32.xlu0 %v3332_v7, %s2988_s22  ;;  %572 = vrot.lane.b32.xlu1 %v3355_v57, %s2986_s20 }
 0x1dd   :  { %550 = vrot.lane.b32.xlu0 %v3355_v57, %s2985_s19  ;;  %616 = vrot.lane.b32.xlu1 %v3355_v57, %s2988_s22 }
 0x1e1   :  { %594 = vrot.lane.b32.xlu0 %v3355_v57, %s2987_s21  ;;  %552 = vrot.lane.b32.xlu1 %v535_v13, %s2985_s19 }
 0x1e5   :  { %638 = vrot.lane.b32.xlu0 %v3355_v57, %s2989_s23  ;;  %636 = vrot.lane.b32.xlu1 %v3332_v7, %s2989_s23 }
 0x1e9   :  { %574 = vrot.lane.b32.xlu0 %v535_v13, %s2986_s20  ;;  %596 = vrot.lane.b32.xlu1 %v535_v13, %s2987_s21 }
 0x1ed   :  { %658 = vrot.lane.b32.xlu0 %v3332_v7, %s2990_s24  ;;  %660 = vrot.lane.b32.xlu1 %v3355_v57, %s2990_s24 }
 0x1f1   :  { %618 = vrot.lane.b32.xlu0 %v535_v13, %s2988_s22  ;;  %640 = vrot.lane.b32.xlu1 %v535_v13, %s2989_s23 }
 0x1f5   :  { %682 = vrot.lane.b32.xlu0 %v3355_v57, %s2991_s25  ;;  %680 = vrot.lane.b32.xlu1 %v3332_v7, %s2991_s25 }
 0x1f9   :  { %662 = vrot.lane.b32.xlu0 %v535_v13, %s2990_s24  ;;  %684 = vrot.lane.b32.xlu1 %v535_v13, %s2991_s25 }
 0x1fd   :  { %702 = vrot.lane.b32.xlu0 %v3332_v7, %s2993_s26  ;;  %704 = vrot.lane.b32.xlu1 %v3355_v57, %s2993_s26 }
 0x201   :  { %706 = vrot.lane.b32.xlu0 %v535_v13, %s2993_s26  ;;  %728 = vperm.xlu1 %2822, %v722_v15  }
 0x205   :  { %733 = vperm.xlu0 %2821, %v723_v16   ;;  %738 = vperm.xlu1 %2822, %v724_v17  }
 0x209   :  { %743 = vperm.xlu0 %2821, %v725_v19  }
 0x213   :  { %v543_v20 = vpop.permute.xlu1 %542 }
 0x217   :  { %v3431_v18 = vpop.permute.xlu0 %546  ;;  %v3433_v22 = vpop.permute.xlu1 %568 }
 0x21b   :  { %v565_v23 = vpop.permute.xlu0 %564  ;;  %v587_v24 = vpop.permute.xlu1 %586 }
 0x21f   :  { %v3435_v25 = vpop.permute.xlu0 %590  ;;  %v3437_v26 = vpop.permute.xlu1 %612 }
 0x223   :  { %v609_v27 = vpop.permute.xlu0 %608  ;;  %v631_v28 = vpop.permute.xlu1 %630 }
 0x227   :  { %v3439_v29 = vpop.permute.xlu0 %634  ;;  %v3441_v30 = vpop.permute.xlu1 %656 }
 0x22b   :  { %v653_v31 = vpop.permute.xlu0 %652  ;;  %v675_v32 = vpop.permute.xlu1 %674 }
 0x22f   :  { %v3443_v33 = vpop.permute.xlu0 %678  ;;  %v545_v34 = vpop.permute.xlu1 %544 }
 0x230   :  { %v555_v36 = vsel %vm73_vm0, %v545_v34, %v3431_v18  ;;  %v554_v37 = vsel %vm73_vm0, %v543_v20, %v545_v34 }
 0x231   :  { %773 = vmatprep.subr.bf16.mxu1 %v555_v36 }
 0x232   :  { %774 = vmatpush1.bf16.msra.mxu1 %v554_v37 }
 0x233   :  { %v567_v38 = vpop.permute.xlu0 %566  ;;  %v3448_v39 = vpop.permute.xlu1 %700 }
 0x234   :  { %v577_v40 = vsel %vm94_vm2, %v567_v38, %v3433_v22  ;;  %v576_v41 = vsel %vm94_vm2, %v565_v23, %v567_v38 }
 0x235   :  { %775 = vmatprep.subr.bf16.mxu1 %v577_v40 }
 0x236   :  { %776 = vmatpush1.bf16.msra.mxu1 %v576_v41 }
 0x237   :  { %v697_v43 = vpop.permute.xlu0 %696  ;;  %v589_v44 = vpop.permute.xlu1 %588 }
 0x238   :  { %v599_v45 = vsel %vm115_vm3, %v589_v44, %v3435_v25  ;;  %v598_v46 = vsel %vm115_vm3, %v587_v24, %v589_v44 }
 0x239   :  { %777 = vmatprep.subr.bf16.mxu1 %v599_v45 }
 0x23a   :  { %778 = vmatpush1.bf16.msra.mxu1 %v598_v46 }
 0x23b   :  { %v611_v47 = vpop.permute.xlu0 %610  ;;  %v633_v48 = vpop.permute.xlu1 %632 }
 0x23c   :  { %v621_v49 = vsel %vm136_vm4, %v611_v47, %v3437_v26  ;;  %v620_v50 = vsel %vm136_vm4, %v609_v27, %v611_v47  ;;  %v643_v52 = vsel %vm157_vm5, %v633_v48, %v3439_v29  ;;  %v642_v54 = vsel %vm157_vm5, %v631_v28, %v633_v48 }
 0x23d   :  { %779 = vmatprep.subr.bf16.mxu1 %v621_v49 }
 0x23e   :  { %780 = vmatpush1.bf16.msra.mxu1 %v620_v50 }
 0x23f   :  { %v655_v51 = vpop.permute.xlu0 %654  ;;  %v677_v53 = vpop.permute.xlu1 %676  ;;  %781 = vmatprep.subr.bf16.mxu1 %v643_v52 }
 0x240   :  { %v665_v56 = vsel %vm178_vm6, %v655_v51, %v3441_v30  ;;  %v664_v58 = vsel %vm178_vm6, %v653_v31, %v655_v51  ;;  %v687_v9 = vsel %vm199_vm7, %v677_v53, %v3443_v33  ;;  %v686_v60 = vsel %vm199_vm7, %v675_v32, %v677_v53 }
 0x242   :  { %782 = vmatpush1.bf16.msra.mxu1 %v642_v54 }
 0x243   :  { %v699_v55 = vpop.permute.xlu0 %698  ;;  %v549_v21 = vpop.permute.xlu1 %548  ;;  %783 = vmatprep.subr.bf16.mxu1 %v665_v56 }
 0x244   :  { %v709_v62 = vsel %vm220_vm8, %v699_v55, %v3448_v39  ;;  %v708_v1 = vsel %vm220_vm8, %v697_v43, %v699_v55  ;;  %v556_v5 = vsel %vm73_vm0, %v3431_v18, %v549_v21 }
 0x246   :  { %784 = vmatpush1.bf16.msra.mxu1 %v664_v58 }
 0x247   :  { %v571_v59 = vpop.permute.xlu0 %570  ;;  %v593_v7 = vpop.permute.xlu1 %592  ;;  %785 = vmatprep.subr.bf16.mxu1 %v687_v9 }
 0x248   :  { %v578_v0 = vsel %vm94_vm2, %v3433_v22, %v571_v59  ;;  %v600_v17 = vsel %vm115_vm3, %v3435_v25, %v593_v7 }
 0x24a   :  { %786 = vmatpush1.bf16.msra.mxu1 %v686_v60 }
 0x24b   :  { %v615_v61 = vpop.permute.xlu0 %614  ;;  %v573_v63 = vpop.permute.xlu1 %572  ;;  %787 = vmatprep.subr.bf16.mxu1 %v709_v62 }
 0x24c   :  { %v579_v6 = vsel %vm94_vm2, %v571_v59, %v573_v63  ;;  %v622_v23 = vsel %vm136_vm4, %v3437_v26, %v615_v61 }
 0x24e   :  { %788 = vmatpush1.bf16.msra.mxu1 %v708_v1 }
 0x24f   :  { %v551_v42 = vpop.permute.xlu0 %550  ;;  %v617_v2 = vpop.permute.xlu1 %616  ;;  %877 = vmatprep.subr.bf16.mxu1 %v2992_v8 }
 0x250   :  { %v557_v3 = vsel %vm73_vm0, %v549_v21, %v551_v42  ;;  %v623_v19 = vsel %vm136_vm4, %v615_v61, %v617_v2 }
 0x251   :  { %826 = vmatprep.subr.bf16.mxu0 %v557_v3  ;;  %804 = vmatmul.mubr.bf16.vlgmr.msra.gmra.mrb[4].mxu1 %v3474_v35 }
 0x252   :  { %827 = vmatpush1.bf16.msra.mxu0 %v556_v5  ;;  %878 = vmatpush1.bf16.msra.mxu1 %v3355_v57  ;;  %v3498_v57 = vld [vmem:[%s4294_s3 + $0x10] ss:$8 sps:$4 sm:$0xff]  }
 0x253   :  { %v595_v10 = vpop.permute.xlu0 %594  ;;  %828 = vmatprep.subr.bf16.mxu0 %v579_v6  ;;  %v553_v11 = vpop.permute.xlu1 %552  ;;  %879 = vmatprep.subr.bf16.mxu1 %v2992_v8 }
 0x254   :  { %2569 = vmatprep.mubr.msk.bf16.mxu1 %vm764_vm14, %v3481_v4  ;;  %v558_v12 = vsel %vm73_vm0, %v551_v42, %v553_v11  ;;  %v601_v13 = vsel %vm115_vm3, %v593_v7, %v595_v10 }
 0x256   :  { %829 = vmatpush1.bf16.msra.mxu0 %v578_v0  ;;  %880 = vmatpush1.bf16.msra.mxu1 %v558_v12 }
 0x257   :  { %v639_v15 = vpop.permute.xlu0 %638  ;;  %830 = vmatprep.subr.bf16.mxu0 %v601_v13  ;;  %v637_v16 = vpop.permute.xlu1 %636  ;;  %881 = vmatprep.subr.bf16.mxu1 %v2992_v8 }
 0x258   :  { %v645_v24 = vsel %vm157_vm5, %v637_v16, %v639_v15 }
 0x259   :  { %814 = vmatmul.mubr.bf16.gmra.mrb[8].mxu1 %v3498_v57 }
 0x25a   :  { %831 = vmatpush1.bf16.msra.mxu0 %v600_v17  ;;  %2572 = vmatprep.mubr.msk.bf16.mxu1 %vm764_vm14, %v3371_v14  ;;  %v644_v14 = vsel %vm157_vm5, %v3439_v29, %v637_v16 }
 0x25b   :  { %v575_v20 = vpop.permute.xlu0 %574  ;;  %832 = vmatprep.subr.bf16.mxu0 %v623_v19  ;;  %v597_v22 = vpop.permute.xlu1 %596 }
 0x25c   :  { %v580_v18 = vsel %vm94_vm2, %v573_v63, %v575_v20  ;;  %v602_v27 = vsel %vm115_vm3, %v595_v10, %v597_v22 }
 0x25d   :  { %882 = vmatpush1.bf16.msra.mxu1 %v580_v18 }
 0x25e   :  { %833 = vmatpush1.bf16.msra.mxu0 %v622_v23  ;;  %883 = vmatprep.subr.bf16.mxu1 %v2992_v8 }
 0x25f   :  { %v659_v25 = vpop.permute.xlu0 %658  ;;  %834 = vmatprep.subr.bf16.mxu0 %v645_v24  ;;  %v661_v28 = vpop.permute.xlu1 %660 }
 0x260   :  { %v667_v31 = vsel %vm178_vm6, %v659_v25, %v661_v28  ;;  %v666_v36 = vsel %vm178_vm6, %v3441_v30, %v659_v25 }
 0x261   :  { %884 = vmatpush1.bf16.msra.mxu1 %v602_v27 }
 0x262   :  { %835 = vmatpush1.bf16.msra.mxu0 %v644_v14  ;;  %885 = vmatprep.subr.bf16.mxu1 %v2992_v8 }
 0x263   :  { %v619_v26 = vpop.permute.xlu0 %618  ;;  %836 = vmatprep.subr.bf16.mxu0 %v667_v31  ;;  %v641_v34 = vpop.permute.xlu1 %640 }
 0x264   :  { %v624_v32 = vsel %vm136_vm4, %v617_v2, %v619_v26  ;;  %v646_v29 = vsel %vm157_vm5, %v639_v15, %v641_v34 }
 0x265   :  { %886 = vmatpush1.bf16.msra.mxu1 %v624_v32 }
 0x266   :  { %837 = vmatpush1.bf16.msra.mxu0 %v666_v36  ;;  %887 = vmatprep.subr.bf16.mxu1 %v2992_v8 }
 0x267   :  { %v683_v37 = vpop.permute.xlu0 %682  ;;  %v681_v38 = vpop.permute.xlu1 %680 }
 0x268   :  { %v689_v40 = vsel %vm199_vm7, %v681_v38, %v683_v37  ;;  %v688_v41 = vsel %vm199_vm7, %v3443_v33, %v681_v38 }
 0x269   :  { %888 = vmatpush1.bf16.msra.mxu1 %v646_v29  ;;  %838 = vmatprep.subr.bf16.mxu0 %v689_v40 }
 0x26a   :  { %889 = vmatprep.subr.bf16.mxu1 %v2992_v8  ;;  %839 = vmatpush1.bf16.msra.mxu0 %v688_v41 }
 0x26b   :  { %v663_v43 = vpop.permute.xlu0 %662  ;;  %v685_v44 = vpop.permute.xlu1 %684 }
 0x26c   :  { %v668_v30 = vsel %vm178_vm6, %v661_v28, %v663_v43  ;;  %v690_v46 = vsel %vm199_vm7, %v683_v37, %v685_v44 }
 0x26d   :  { %890 = vmatpush1.bf16.msra.mxu1 %v668_v30 }
 0x26e   :  { %891 = vmatprep.subr.bf16.mxu1 %v2992_v8 }
 0x26f   :  { %v703_v45 = vpop.permute.xlu0 %702  ;;  %v705_v47 = vpop.permute.xlu1 %704 }
 0x270   :  { %v710_v48 = vsel %vm220_vm8, %v3448_v39, %v703_v45  ;;  %v711_v33 = vsel %vm220_vm8, %v703_v45, %v705_v47 }
 0x271   :  { %892 = vmatpush1.bf16.msra.mxu1 %v690_v46  ;;  %840 = vmatprep.subr.bf16.mxu0 %v711_v33 }
 0x272   :  { %893 = vmatprep.subr.bf16.mxu1 %v2992_v8  ;;  %841 = vmatpush1.bf16.msra.mxu0 %v710_v48 }
 0x273   :  { %v707_v49 = vpop.permute.xlu0 %706 }
 0x274   :  { %v712_v50 = vsel %vm220_vm8, %v705_v47, %v707_v49 }
 0x275   :  { %894 = vmatpush1.bf16.msra.mxu1 %v712_v50  ;;  %857 = vmatmul.mubr.bf16.vlgmr.msra.gmra.mrb[8].mxu0 %v3474_v35 }
 0x276   :  { %2571 = vmatprep.mubr.msk.bf16.mxu0 %vm764_vm14, %v3481_v4 }
 0x278   :  { %910 = vmatmul.mubr.bf16.vlgmr.msra.gmra.mrb[12].mxu1 %v3474_v35 }
 0x279   :  { %2573 = vmatprep.mubr.msk.bf16.mxu1 %vm764_vm14, %v3481_v4 }
 0x27d   :  { %867 = vmatmul.mubr.bf16.gmra.mrb[12].mxu0 %v3498_v57 }
 0x280   :  { %918 = vmatmul.mubr.bf16.gmra.mrb[16].mxu1 %v3498_v57  ;;  %v3542_v39 = vpop.permute.xlu1 %728 }
 0x284   :  { %v3545_v54 = vpop.permute.xlu0 %733  ;;  %v3550_v1 = vpop.permute.xlu1 %738 }
 0x288   :  { %v3557_v10 = vpop.permute.xlu0 %743 }
 0x324   :  { %v805_v51 = vpop.f32.mrb[4].mxu1 }
 0x325   :  { %v806_v52 = vadd.f32 %v805_v51, %v3542_v39  ;;  %v807_v53 = vpop.f32.mrb[5].mxu1 }
 0x326   :  { %v808_v55 = vadd.f32 %v807_v53, %v3542_v39  ;;  %v809_v56 = vpop.f32.mrb[6].mxu1 }
 0x327   :  { %v946_v21 = vmul.f32 0.2, %v806_v52  ;;  %v810_v58 = vadd.f32 %v809_v56, %v3545_v54  ;;  %v811_v59 = vpop.f32.mrb[7].mxu1  ;;  %vm926_vm15 = vcmp.gt.f32.partialorder %v806_v52, 0.0 }
 0x328   :  { %v947_v9 = vmul.f32 0.2, %v808_v55  ;;  %v812_v7 = vadd.f32 %v811_v59, %v3545_v54  ;;  %vm927_vm1 = vcmp.gt.f32.partialorder %v808_v55, 0.0 }
 0x329   :  { %vm931_vm9 = vcmp.gt.f32.partialorder %v810_v58, 0.0  ;;  %v951_v60 = vmul.f32 0.2, %v810_v58  ;;  %v966_v62 = vsel %vm926_vm15, %v806_v52, %v946_v21 }
 0x32a   :  { %vm932_vm10 = vcmp.gt.f32.partialorder %v812_v7, 0.0  ;;  %v952_v61 = vmul.f32 0.2, %v812_v7  ;;  %v967_v35 = vsel %vm927_vm1, %v808_v55, %v947_v9 }
 0x32b   :  { %v971_v63 = vsel %vm931_vm9, %v810_v58, %v951_v60 }
 0x32c   :  { %v3552_v42 = vpack.c.bf16 %v971_v63, %v966_v62  ;;  %v972_v2 = vsel %vm932_vm10, %v812_v7, %v952_v61  ;;  %v815_v3 = vpop.f32.mrb[8].mxu1 }
 0x32d   :  { %v3554_v4 = vpack.c.bf16 %v972_v2, %v967_v35  ;;  %v816_v5 = vadd.f32 %v815_v3, %v3550_v1  ;;  %v817_v6 = vpop.f32.mrb[9].mxu1 }
 0x32e   :  { %v818_v11 = vadd.f32 %v817_v6, %v3550_v1  ;;  %v819_v12 = vpop.f32.mrb[10].mxu1  ;;  %1006 = vrot.lane.b32.xlu1 %v3552_v42, %s2985_s19 }
 0x32f   :  { %v956_v0 = vmul.f32 0.2, %v816_v5  ;;  %v820_v13 = vadd.f32 %v819_v12, %v3557_v10  ;;  %v821_v57 = vpop.f32.mrb[11].mxu1  ;;  %1431 = vmatprep.subr.bf16.mxu0 %v3554_v4  ;;  %vm936_vm11 = vcmp.gt.f32.partialorder %v816_v5, 0.0 }
 0x330   :  { %v957_v15 = vmul.f32 0.2, %v818_v11  ;;  %v822_v16 = vadd.f32 %v821_v57, %v3557_v10  ;;  %1432 = vmatpush1.bf16.msra.mxu0 %v3552_v42  ;;  %vm937_vm12 = vcmp.gt.f32.partialorder %v818_v11, 0.0 }
 0x331   :  { %vm941_vm13 = vcmp.gt.f32.partialorder %v820_v13, 0.0  ;;  %v961_v17 = vmul.f32 0.2, %v820_v13  ;;  %v976_v20 = vsel %vm936_vm11, %v816_v5, %v956_v0 }
 0x332   :  { %vm942_vm14 = vcmp.gt.f32.partialorder %v822_v16, 0.0  ;;  %v962_v19 = vmul.f32 0.2, %v822_v16  ;;  %1042 = vrot.lane.b32.xlu1 %v3552_v42, %s2986_s20  ;;  %v977_v22 = vsel %vm937_vm12, %v818_v11, %v957_v15 }
 0x333   :  { %v981_v18 = vsel %vm941_vm13, %v820_v13, %v961_v17 }
 0x334   :  { %v3568_v23 = vpack.c.bf16 %v981_v18, %v976_v20  ;;  %v982_v24 = vsel %vm942_vm14, %v822_v16, %v962_v19 }
 0x335   :  { %v3570_v25 = vpack.c.bf16 %v982_v24, %v977_v22 }
 0x336   :  { %1016 = vrot.lane.b32.xlu0 %v3568_v23, %s2985_s19  ;;  %1078 = vrot.lane.b32.xlu1 %v3552_v42, %s2987_s21 }
 0x337   :  { %1433 = vmatprep.subr.bf16.mxu0 %v3570_v25 }
 0x338   :  { %1434 = vmatpush1.bf16.msra.mxu0 %v3568_v23 }
 0x33a   :  { %1052 = vrot.lane.b32.xlu0 %v3568_v23, %s2986_s20  ;;  %1114 = vrot.lane.b32.xlu1 %v3552_v42, %s2988_s22 }
 0x33e   :  { %1088 = vrot.lane.b32.xlu0 %v3568_v23, %s2987_s21  ;;  %1150 = vrot.lane.b32.xlu1 %v3552_v42, %s2989_s23 }
 0x342   :  { %1124 = vrot.lane.b32.xlu0 %v3568_v23, %s2988_s22  ;;  %1008 = vrot.lane.b32.xlu1 %v3554_v4, %s2985_s19 }
 0x346   :  { %1160 = vrot.lane.b32.xlu0 %v3568_v23, %s2989_s23  ;;  %1044 = vrot.lane.b32.xlu1 %v3554_v4, %s2986_s20 }
 0x348   :  { %v858_v27 = vpop.f32.mrb[8].mxu0 }
 0x349   :  { %v859_v28 = vadd.f32 %v858_v27, %v3542_v39  ;;  %v860_v14 = vpop.f32.mrb[9].mxu0 }
 0x34a   :  { %v861_v31 = vadd.f32 %v860_v14, %v3542_v39  ;;  %v862_v26 = vpop.f32.mrb[10].mxu0  ;;  %1018 = vrot.lane.b32.xlu0 %v3570_v25, %s2985_s19  ;;  %1080 = vrot.lane.b32.xlu1 %v3554_v4, %s2987_s21 }
 0x34b   :  { %v911_v32 = vpop.f32.mrb[12].mxu1  ;;  %v948_v34 = vmul.f32 0.2, %v859_v28  ;;  %v863_v36 = vadd.f32 %v862_v26, %v3545_v54  ;;  %v864_v37 = vpop.f32.mrb[11].mxu0  ;;  %vm928_vm15 = vcmp.gt.f32.partialorder %v859_v28, 0.0 }
 0x34c   :  { %v912_v29 = vadd.f32 %v911_v32, %v3542_v39  ;;  %v913_v38 = vpop.f32.mrb[13].mxu1  ;;  %v949_v40 = vmul.f32 0.2, %v861_v31  ;;  %v865_v41 = vadd.f32 %v864_v37, %v3545_v54  ;;  %vm929_vm1 = vcmp.gt.f32.partialorder %v861_v31, 0.0 }
 0x34d   :  { %v914_v43 = vpop.f32.mrb[14].mxu1  ;;  %vm933_vm9 = vcmp.gt.f32.partialorder %v863_v36, 0.0  ;;  %v953_v30 = vmul.f32 0.2, %v863_v36  ;;  %v968_v47 = vsel %vm928_vm15, %v859_v28, %v948_v34 }
 0x34e   :  { %v916_v44 = vpop.f32.mrb[15].mxu1  ;;  %vm934_vm10 = vcmp.gt.f32.partialorder %v865_v41, 0.0  ;;  %v954_v45 = vmul.f32 0.2, %v865_v41  ;;  %v950_v46 = vmul.f32 0.2, %v912_v29  ;;  %1054 = vrot.lane.b32.xlu0 %v3570_v25, %s2986_s20  ;;  %1116 = vrot.lane.b32.xlu1 %v3554_v4, %s2988_s22  ;;  %v915_v33 = vadd.f32 %v914_v43, %v3545_v54 }
 0x34f   :  { %v973_v48 = vsel %vm933_vm9, %v863_v36, %v953_v30  ;;  %vm930_vm11 = vcmp.gt.f32.partialorder %v912_v29, 0.0  ;;  %v969_v49 = vsel %vm929_vm1, %v861_v31, %v949_v40  ;;  %v2899_v36 = vld [vmem:[%s4296_s5 + $0x4] ss:$12 sps:$4 sm:$0xff]  }
 0x350   :  { %v3608_v50 = vpack.c.bf16 %v973_v48, %v968_v47  ;;  %v974_v39 = vsel %vm934_vm10, %v865_v41, %v954_v45  ;;  %v868_v51 = vpop.f32.mrb[12].mxu0  ;;  %vm935_vm12 = vcmp.gt.f32.partialorder %v915_v33, 0.0  ;;  %v955_v53 = vmul.f32 0.2, %v915_v33  ;;  %1609 = vmatprep.mubr.bf16.mxu1 %v2899_v36  ;;  %1463 = vmatprep.mubr.bf16.mxu0 %v2899_v36 }
 0x351   :  { %v3610_v52 = vpack.c.bf16 %v974_v39, %v969_v49  ;;  %v869_v55 = vadd.f32 %v868_v51, %v3550_v1  ;;  %v870_v56 = vpop.f32.mrb[13].mxu0  ;;  %v970_v21 = vsel %vm930_vm11, %v912_v29, %v950_v46  ;;  %v1312_v49 = vld [vmem:[%s4297_s6 + $0x10] sm:$0xff] }
 0x352   :  { %v871_v58 = vadd.f32 %v870_v56, %v3550_v1  ;;  %v872_v59 = vpop.f32.mrb[14].mxu0  ;;  %1090 = vrot.lane.b32.xlu0 %v3570_v25, %s2987_s21  ;;  %1152 = vrot.lane.b32.xlu1 %v3554_v4, %s2989_s23  ;;  %v975_v9 = vsel %vm935_vm12, %v915_v33, %v955_v53  ;;  %v1314_v53 = vld [vmem:[%s4297_s6 + $0x20] sm:$0xff] }
 0x353   :  { %v919_v54 = vpop.f32.mrb[16].mxu1  ;;  %vm938_vm13 = vcmp.gt.f32.partialorder %v869_v55, 0.0  ;;  %v958_v7 = vmul.f32 0.2, %v869_v55  ;;  %v873_v60 = vadd.f32 %v872_v59, %v3557_v10  ;;  %v874_v61 = vpop.f32.mrb[15].mxu0  ;;  %1577 = vmatprep.subr.bf16.mxu1 %v3610_v52  ;;  %v3620_v63 = vpack.c.bf16 %v975_v9, %v970_v21  ;;  %v1316_v21 = vld [vmem:[%s4297_s6 + $0x30] sm:$0xff] }
 0x354   :  { %v921_v62 = vpop.f32.mrb[17].mxu1  ;;  %vm939_vm14 = vcmp.gt.f32.partialorder %v871_v58, 0.0  ;;  %v959_v35 = vmul.f32 0.2, %v871_v58  ;;  %v875_v2 = vadd.f32 %v874_v61, %v3557_v10  ;;  %1578 = vmatpush1.bf16.msra.mxu1 %v3608_v50  ;;  %v920_v6 = vadd.f32 %v919_v54, %v3550_v1  ;;  %v1315_v54 = vld [vmem:[%s4297_s6 + $0x28] sm:$0xff] }
 0x355   :  { %v922_v3 = vpop.f32.mrb[18].mxu1  ;;  %vm943_vm15 = vcmp.gt.f32.partialorder %v873_v60, 0.0  ;;  %v963_v5 = vmul.f32 0.2, %v873_v60  ;;  %v978_v12 = vsel %vm938_vm13, %v869_v55, %v958_v7 }
 0x356   :  { %v924_v11 = vpop.f32.mrb[19].mxu1  ;;  %vm944_vm1 = vcmp.gt.f32.partialorder %v875_v2, 0.0  ;;  %v964_v0 = vmul.f32 0.2, %v875_v2  ;;  %v923_v13 = vadd.f32 %v922_v3, %v3557_v10  ;;  %1126 = vrot.lane.b32.xlu0 %v3570_v25, %s2988_s22  ;;  %1188 = vrot.lane.b32.xlu1 %v3554_v4, %s2990_s24  ;;  %v979_v57 = vsel %vm939_vm14, %v871_v58, %v959_v35 }
 0x357   :  { %v983_v15 = vsel %vm943_vm15, %v873_v60, %v963_v5  ;;  %vm940_vm9 = vcmp.gt.f32.partialorder %v920_v6, 0.0  ;;  %v960_v16 = vmul.f32 0.2, %v920_v6  ;;  %v1317_v60 = vld [vmem:[%s4297_s6 + $0x38] sm:$0xff] }
 0x358   :  { %v3631_v17 = vpack.c.bf16 %v983_v15, %v978_v12  ;;  %v984_v1 = vsel %vm944_vm1, %v875_v2, %v964_v0  ;;  %vm945_vm10 = vcmp.gt.f32.partialorder %v923_v13, 0.0  ;;  %v965_v19 = vmul.f32 0.2, %v923_v13 }
 0x359   :  { %v3633_v20 = vpack.c.bf16 %v984_v1, %v979_v57  ;;  %v980_v18 = vsel %vm940_vm9, %v920_v6, %v960_v16 }
 0x35a   :  { %v985_v22 = vsel %vm945_vm10, %v923_v13, %v965_v19  ;;  %1162 = vrot.lane.b32.xlu0 %v3570_v25, %s2989_s23  ;;  %1012 = vrot.lane.b32.xlu1 %v3610_v52, %s2985_s19 }
 0x35b   :  { %v3639_v10 = vpack.c.bf16 %v985_v22, %v980_v18  ;;  %1579 = vmatprep.subr.bf16.mxu1 %v3633_v20 }
 0x35c   :  { %1580 = vmatpush1.bf16.msra.mxu1 %v3631_v17 }
 0x35e   :  { %1010 = vrot.lane.b32.xlu0 %v3608_v50, %s2985_s19  ;;  %1048 = vrot.lane.b32.xlu1 %v3610_v52, %s2986_s20 }
 0x362   :  { %1046 = vrot.lane.b32.xlu0 %v3608_v50, %s2986_s20  ;;  %1084 = vrot.lane.b32.xlu1 %v3610_v52, %s2987_s21 }
 0x366   :  { %1082 = vrot.lane.b32.xlu0 %v3608_v50, %s2987_s21  ;;  %1120 = vrot.lane.b32.xlu1 %v3610_v52, %s2988_s22 }
 0x36a   :  { %1118 = vrot.lane.b32.xlu0 %v3608_v50, %s2988_s22  ;;  %1156 = vrot.lane.b32.xlu1 %v3610_v52, %s2989_s23 }
 0x36e   :  { %1154 = vrot.lane.b32.xlu0 %v3608_v50, %s2989_s23  ;;  %1020 = vrot.lane.b32.xlu1 %v3631_v17, %s2985_s19 }
 0x372   :  { %1022 = vrot.lane.b32.xlu0 %v3633_v20, %s2985_s19  ;;  %1056 = vrot.lane.b32.xlu1 %v3631_v17, %s2986_s20 }
 0x376   :  { %1058 = vrot.lane.b32.xlu0 %v3633_v20, %s2986_s20  ;;  %1092 = vrot.lane.b32.xlu1 %v3631_v17, %s2987_s21 }
 0x37a   :  { %1094 = vrot.lane.b32.xlu0 %v3633_v20, %s2987_s21  ;;  %1128 = vrot.lane.b32.xlu1 %v3631_v17, %s2988_s22 }
 0x37e   :  { %1130 = vrot.lane.b32.xlu0 %v3633_v20, %s2988_s22  ;;  %1164 = vrot.lane.b32.xlu1 %v3631_v17, %s2989_s23 }
 0x382   :  { %1166 = vrot.lane.b32.xlu0 %v3633_v20, %s2989_s23  ;;  %1192 = vrot.lane.b32.xlu1 %v3610_v52, %s2990_s24 }
 0x386   :  { %1014 = vrot.lane.b32.xlu0 %v3620_v63, %s2985_s19  ;;  %1024 = vrot.lane.b32.xlu1 %v3639_v10, %s2985_s19 }
 0x38a   :  { %1190 = vrot.lane.b32.xlu0 %v3608_v50, %s2990_s24  ;;  %1186 = vrot.lane.b32.xlu1 %v3552_v42, %s2990_s24 }
 0x38e   :  { %1050 = vrot.lane.b32.xlu0 %v3620_v63, %s2986_s20  ;;  %1060 = vrot.lane.b32.xlu1 %v3639_v10, %s2986_s20 }
 0x392   :  { %1086 = vrot.lane.b32.xlu0 %v3620_v63, %s2987_s21  ;;  %1200 = vrot.lane.b32.xlu1 %v3631_v17, %s2990_s24 }
 0x396   :  { %1122 = vrot.lane.b32.xlu0 %v3620_v63, %s2988_s22  ;;  %1096 = vrot.lane.b32.xlu1 %v3639_v10, %s2987_s21 }
 0x39a   :  { %1158 = vrot.lane.b32.xlu0 %v3620_v63, %s2989_s23  ;;  %1224 = vrot.lane.b32.xlu1 %v3554_v4, %s2991_s25 }
 0x39e   :  { %1194 = vrot.lane.b32.xlu0 %v3620_v63, %s2990_s24  ;;  %1132 = vrot.lane.b32.xlu1 %v3639_v10, %s2988_s22  ;;  %s2995_s22 = smov 122  }
 0x3a0   :  { %v1007_v24 = vpop.permute.xlu1 %1006 }
 0x3a2   :  { %1198 = vrot.lane.b32.xlu0 %v3570_v25, %s2990_s24  ;;  %1228 = vrot.lane.b32.xlu1 %v3610_v52, %s2991_s25 }
 0x3a4   :  { %v3715_v27 = vpop.permute.xlu1 %1042 }
 0x3a6   :  { %1202 = vrot.lane.b32.xlu0 %v3633_v20, %s2990_s24  ;;  %1168 = vrot.lane.b32.xlu1 %v3639_v10, %s2989_s23 }
 0x3a8   :  { %v3721_v28 = vpop.permute.xlu0 %1016  ;;  %v3723_v14 = vpop.permute.xlu1 %1078 }
 0x3aa   :  { %1196 = vrot.lane.b32.xlu0 %v3568_v23, %s2990_s24  ;;  %1222 = vrot.lane.b32.xlu1 %v3552_v42, %s2991_s25 }
 0x3ac   :  { %v3729_v31 = vpop.permute.xlu0 %1052  ;;  %v3731_v26 = vpop.permute.xlu1 %1114 }
 0x3ae   :  { %1226 = vrot.lane.b32.xlu0 %v3608_v50, %s2991_s25  ;;  %1204 = vrot.lane.b32.xlu1 %v3639_v10, %s2990_s24 }
 0x3b0   :  { %v3737_v32 = vpop.permute.xlu0 %1088  ;;  %v3739_v34 = vpop.permute.xlu1 %1150 }
 0x3b2   :  { %1230 = vrot.lane.b32.xlu0 %v3620_v63, %s2991_s25  ;;  %1236 = vrot.lane.b32.xlu1 %v3631_v17, %s2991_s25 }
 0x3b4   :  { %v3748_v37 = vpop.permute.xlu0 %1124  ;;  %v1009_v29 = vpop.permute.xlu1 %1008 }
 0x3b5   :  { %v1026_v51 = vsel %vm73_vm0, %v1007_v24, %v1009_v29 }
 0x3b6   :  { %1234 = vrot.lane.b32.xlu0 %v3570_v25, %s2991_s25  ;;  %1240 = vrot.lane.b32.xlu1 %v3639_v10, %s2991_s25 }
 0x3b8   :  { %v3754_v38 = vpop.permute.xlu0 %1160  ;;  %v1045_v40 = vpop.permute.xlu1 %1044 }
 0x3b9   :  { %v1062_v6 = vsel %vm94_vm2, %v3715_v27, %v1045_v40 }
 0x3ba   :  { %1238 = vrot.lane.b32.xlu0 %v3633_v20, %s2991_s25  ;;  %1260 = vrot.lane.b32.xlu1 %v3554_v4, %s2993_s26 }
 0x3bc   :  { %v1019_v41 = vpop.permute.xlu0 %1018  ;;  %v3760_v43 = vpop.permute.xlu1 %1080 }
 0x3bd   :  { %v1030_v35 = vsel %vm73_vm0, %v3721_v28, %v1019_v41 }
 0x3be   :  { %1232 = vrot.lane.b32.xlu0 %v3568_v23, %s2991_s25  ;;  %1264 = vrot.lane.b32.xlu1 %v3610_v52, %s2993_s26  ;;  %v1311_v52 = vld [vmem:[%s4297_s6 + $0x8] sm:$0xff] }
 0x3c0   :  { %v1055_v30 = vpop.permute.xlu0 %1054  ;;  %v3766_v44 = vpop.permute.xlu1 %1116 }
 0x3c1   :  { %v1066_v13 = vsel %vm94_vm2, %v3729_v31, %v1055_v30  ;;  %v1134_v27 = vsel %vm136_vm4, %v3731_v26, %v3766_v44 }
 0x3c2   :  { %1262 = vrot.lane.b32.xlu0 %v3608_v50, %s2993_s26  ;;  %1258 = vrot.lane.b32.xlu1 %v3552_v42, %s2993_s26  ;;  %v1310_v42 = vld [vmem:[%s4297_s6] sm:$0xff] }
 0x3c4   :  { %v3772_v45 = vpop.permute.xlu0 %1090  ;;  %v3774_v4 = vpop.permute.xlu1 %1152 }
 0x3c5   :  { %v1102_v18 = vsel %vm115_vm3, %v3737_v32, %v3772_v45 }
 0x3c6   :  { %1266 = vrot.lane.b32.xlu0 %v3620_v63, %s2993_s26  ;;  %1272 = vrot.lane.b32.xlu1 %v3631_v17, %s2993_s26  ;;  %v1098_v17 = vsel %vm115_vm3, %v3723_v14, %v3760_v43 }
 0x3c8   :  { %v3780_v46 = vpop.permute.xlu0 %1126  ;;  %v3782_v47 = vpop.permute.xlu1 %1188 }
 0x3c9   :  { %v1138_v36 = vsel %vm136_vm4, %v3748_v37, %v3780_v46  ;;  %v1170_v37 = vsel %vm157_vm5, %v3739_v34, %v3774_v4 }
 0x3ca   :  { %1270 = vrot.lane.b32.xlu0 %v3570_v25, %s2993_s26  ;;  %1276 = vrot.lane.b32.xlu1 %v3639_v10, %s2993_s26 }
 0x3cc   :  { %v3791_v48 = vpop.permute.xlu0 %1162  ;;  %v3793_v33 = vpop.permute.xlu1 %1012 }
 0x3ce   :  { %1274 = vrot.lane.b32.xlu0 %v3633_v20, %s2993_s26  ;;  %1320 = vperm.xlu1 %2822, %v1310_v42  }
 0x3d0   :  { %v3800_v25 = vpop.permute.xlu0 %1010  ;;  %v3802_v50 = vpop.permute.xlu1 %1048 }
 0x3d1   :  { %v1027_v39 = vsel %vm73_vm0, %v1009_v29, %v3800_v25  ;;  %v1028_v29 = vsel %vm73_vm0, %v3800_v25, %v3793_v33 }
 0x3d2   :  { %1268 = vrot.lane.b32.xlu0 %v3568_v23, %s2993_s26  ;;  %1330 = vperm.xlu1 %2822, %v1312_v49   ;;  %v1313_v23 = vld [vmem:[%s4297_s6 + $0x18] sm:$0xff] }
 0x3d3   :  { %1435 = vmatprep.subr.bf16.mxu0 %v1027_v39 }
 0x3d4   :  { %1436 = vmatpush1.bf16.msra.mxu0 %v1026_v51  ;;  %v3815_v55 = vpop.permute.xlu0 %1046  ;;  %v3817_v56 = vpop.permute.xlu1 %1084 }
 0x3d5   :  { %v1063_v2 = vsel %vm94_vm2, %v1045_v40, %v3815_v55  ;;  %v1064_v34 = vsel %vm94_vm2, %v3815_v55, %v3802_v50 }
 0x3d6   :  { %1325 = vperm.xlu0 %2821, %v1311_v52   ;;  %1340 = vperm.xlu1 %2822, %v1314_v53  }
 0x3d8   :  { %v3825_v58 = vpop.permute.xlu0 %1082  ;;  %v3827_v59 = vpop.permute.xlu1 %1120 }
 0x3d9   :  { %v1099_v57 = vsel %vm115_vm3, %v3760_v43, %v3825_v58  ;;  %v1100_v53 = vsel %vm115_vm3, %v3825_v58, %v3817_v56 }
 0x3da   :  { %1335 = vperm.xlu0 %2821, %v1313_v23   ;;  %1350 = vperm.xlu1 %2822, %v1316_v21  }
 0x3dc   :  { %v3832_v9 = vpop.permute.xlu0 %1118  ;;  %v3834_v7 = vpop.permute.xlu1 %1156 }
 0x3dd   :  { %v1135_v22 = vsel %vm136_vm4, %v3766_v44, %v3832_v9 }
 0x3de   :  { %1345 = vperm.xlu0 %2821, %v1315_v54  }
 0x3e0   :  { %v3839_v61 = vpop.permute.xlu0 %1154  ;;  %v1021_v62 = vpop.permute.xlu1 %1020 }
 0x3e1   :  { %v1031_v63 = vsel %vm73_vm0, %v1019_v41, %v1021_v62  ;;  %v1171_v40 = vsel %vm157_vm5, %v3774_v4, %v3839_v61 }
 0x3e2   :  { %1355 = vperm.xlu0 %2821, %v1317_v60   ;;  %1437 = vmatprep.subr.bf16.mxu0 %v1031_v63 }
 0x3e3   :  { %1438 = vmatpush1.bf16.msra.mxu0 %v1030_v35 }
 0x3e4   :  { %v1023_v3 = vpop.permute.xlu0 %1022  ;;  %v3846_v5 = vpop.permute.xlu1 %1056  ;;  %1439 = vmatprep.subr.bf16.mxu0 %v1063_v2 }
 0x3e5   :  { %v1067_v11 = vsel %vm94_vm2, %v1055_v30, %v3846_v5  ;;  %v1032_v30 = vsel %vm73_vm0, %v1021_v62, %v1023_v3 }
 0x3e7   :  { %1440 = vmatpush1.bf16.msra.mxu0 %v1062_v6 }
 0x3e8   :  { %v1059_v12 = vpop.permute.xlu0 %1058  ;;  %v3852_v0 = vpop.permute.xlu1 %1092  ;;  %1441 = vmatprep.subr.bf16.mxu0 %v1067_v11 }
 0x3e9   :  { %v1103_v1 = vsel %vm115_vm3, %v3772_v45, %v3852_v0 }
 0x3eb   :  { %1442 = vmatpush1.bf16.msra.mxu0 %v1066_v13 }
 0x3ec   :  { %v3859_v15 = vpop.permute.xlu0 %1094  ;;  %v3861_v16 = vpop.permute.xlu1 %1128  ;;  %1443 = vmatprep.subr.bf16.mxu0 %v1099_v57 }
 0x3ed   :  { %v1139_v28 = vsel %vm136_vm4, %v3780_v46, %v3861_v16 }
 0x3ef   :  { %1444 = vmatpush1.bf16.msra.mxu0 %v1098_v17 }
 0x3f0   :  { %v3869_v19 = vpop.permute.xlu0 %1130  ;;  %v3871_v20 = vpop.permute.xlu1 %1164  ;;  %1445 = vmatprep.subr.bf16.mxu0 %v1103_v1 }
 0x3f1   :  { %v1175_v44 = vsel %vm157_vm5, %v3791_v48, %v3871_v20 }
 0x3f3   :  { %1446 = vmatpush1.bf16.msra.mxu0 %v1102_v18 }
 0x3f4   :  { %v3879_v10 = vpop.permute.xlu0 %1166  ;;  %v3881_v24 = vpop.permute.xlu1 %1192  ;;  %1447 = vmatprep.subr.bf16.mxu0 %v1135_v22 }
 0x3f5   :  { %v1176_v57 = vsel %vm157_vm5, %v3871_v20, %v3879_v10 }
 0x3f7   :  { %1448 = vmatpush1.bf16.msra.mxu0 %v1134_v27 }
 0x3f8   :  { %v1015_v14 = vpop.permute.xlu0 %1014  ;;  %v1025_v31 = vpop.permute.xlu1 %1024  ;;  %1449 = vmatprep.subr.bf16.mxu0 %v1139_v28 }
 0x3f9   :  { %v1029_v32 = vsel %vm73_vm0, %v3793_v33, %v1015_v14  ;;  %v1033_v26 = vsel %vm73_vm0, %v1023_v3, %v1025_v31  ;;  %v1174_v33 = vsel %vm157_vm5, %v3754_v38, %v3791_v48  ;;  %v1068_v38 = vsel %vm94_vm2, %v3846_v5, %v1059_v12 }
 0x3fa   :  { %1581 = vmatprep.subr.bf16.mxu1 %v1029_v32  ;;  %v1140_v3 = vsel %vm136_vm4, %v3861_v16, %v3869_v19  ;;  %vm1418_vm0 = vcmask 261120  }
 0x3fb   :  { %1450 = vmatpush1.bf16.msra.mxu0 %v1138_v36  ;;  %1582 = vmatpush1.bf16.msra.mxu1 %v1028_v29 }
 0x3fc   :  { %v3901_v41 = vpop.permute.xlu0 %1190  ;;  %1583 = vmatprep.subr.bf16.mxu1 %v1033_v26  ;;  %v1187_v43 = vpop.permute.xlu1 %1186  ;;  %1451 = vmatprep.subr.bf16.mxu0 %v1171_v40  ;;  %v2897_v26 = vld [vmem:[%s4296_s5] ss:$12 sps:$4 sm:$0xff]   ;;  %v2900_v40 = vld [vmem:[%s4296_s5 + $0x1c] ss:$12 sps:$4 sm:$0xff]  }
 0x3fd   :  { %v1207_v49 = vsel %vm178_vm6, %v3782_v47, %v3901_v41  ;;  %v1206_v48 = vsel %vm178_vm6, %v1187_v43, %v3782_v47  ;;  %v1104_v47 = vsel %vm115_vm3, %v3852_v0, %v3859_v15  ;;  %v1208_v17 = vsel %vm178_vm6, %v3901_v41, %v3881_v24 }
 0x3ff   :  { %1452 = vmatpush1.bf16.msra.mxu0 %v1170_v37  ;;  %1584 = vmatpush1.bf16.msra.mxu1 %v1032_v30 }
 0x400   :  { %v1051_v45 = vpop.permute.xlu0 %1050  ;;  %v1061_v46 = vpop.permute.xlu1 %1060  ;;  %1453 = vmatprep.subr.bf16.mxu0 %v1175_v44 }
 0x401   :  { %v1065_v42 = vsel %vm94_vm2, %v3802_v50, %v1051_v45  ;;  %v1069_v4 = vsel %vm94_vm2, %v1059_v12, %v1061_v46 }
 0x402   :  { %1585 = vmatprep.subr.bf16.mxu1 %v1065_v42  ;;  %v2902_v42 = vld [vmem:[%s4296_s5 + $0x18] ss:$12 sps:$4 sm:$0xff]  }
 0x403   :  { %1454 = vmatpush1.bf16.msra.mxu0 %v1174_v33  ;;  %1586 = vmatpush1.bf16.msra.mxu1 %v1064_v34  ;;  %v2903_v33 = vld [vmem:[%s4296_s5 + $0x34] ss:$12 sps:$4 sm:$0xff]  }
 0x404   :  { %v1087_v25 = vpop.permute.xlu0 %1086  ;;  %1587 = vmatprep.subr.bf16.mxu1 %v1069_v4  ;;  %v1201_v39 = vpop.permute.xlu1 %1200  ;;  %1455 = vmatprep.subr.bf16.mxu0 %v1207_v49 }
 0x405   :  { %v1101_v50 = vsel %vm115_vm3, %v3817_v56, %v1087_v25  ;;  %v1136_v56 = vsel %vm136_vm4, %v3832_v9, %v3827_v59  ;;  %v1172_v9 = vsel %vm157_vm5, %v3839_v61, %v3834_v7 }
 0x407   :  { %1456 = vmatpush1.bf16.msra.mxu0 %v1206_v48  ;;  %1588 = vmatpush1.bf16.msra.mxu1 %v1068_v38  ;;  %v2905_v48 = vld [vmem:[%s4296_s5 + $0x30] ss:$12 sps:$4 sm:$0xff]  }
 0x408   :  { %v1123_v51 = vpop.permute.xlu0 %1122  ;;  %1589 = vmatprep.subr.bf16.mxu1 %v1101_v50  ;;  %v1097_v52 = vpop.permute.xlu1 %1096  ;;  %v2906_v50 = vld [vmem:[%s4296_s5 + $0x4c] ss:$12 sps:$4 sm:$0xff]  }
 0x409   :  { %v1105_v55 = vsel %vm115_vm3, %v3859_v15, %v1097_v52  ;;  %v1137_v54 = vsel %vm136_vm4, %v3827_v59, %v1123_v51 }
 0x40b   :  { %1590 = vmatpush1.bf16.msra.mxu1 %v1100_v53  ;;  %v2913_v53 = vld [vmem:[%s4298_s7 + $0xc0] sm:$0xff]  }
 0x40c   :  { %v1159_v23 = vpop.permute.xlu0 %1158  ;;  %1591 = vmatprep.subr.bf16.mxu1 %v1105_v55  ;;  %v1225_v21 = vpop.permute.xlu1 %1224 }
 0x40d   :  { %v1173_v5 = vsel %vm157_vm5, %v3834_v7, %v1159_v23 }
 0x40f   :  { %1592 = vmatpush1.bf16.msra.mxu1 %v1104_v47 }
 0x410   :  { %v1195_v60 = vpop.permute.xlu0 %1194  ;;  %1593 = vmatprep.subr.bf16.mxu1 %v1137_v54  ;;  %v1133_v62 = vpop.permute.xlu1 %1132 }
 0x411   :  { %v1141_v58 = vsel %vm136_vm4, %v3869_v19, %v1133_v62  ;;  %v1209_v15 = vsel %vm178_vm6, %v3881_v24, %v1195_v60  ;;  %v2908_v60 = vld [vmem:[%s4296_s5 + $0x48] ss:$12 sps:$4 sm:$0xff]  }
 0x412   :  { %v2909_v62 = vld [vmem:[%s4296_s5 + $0x8] ss:$12 sps:$4 sm:$0xff]  }
 0x413   :  { %1594 = vmatpush1.bf16.msra.mxu1 %v1136_v56  ;;  %v2914_v56 = vld [vmem:[%s4298_s7 + $0x80] sm:$0xff]  }
 0x414   :  { %v1199_v63 = vpop.permute.xlu0 %1198  ;;  %1595 = vmatprep.subr.bf16.mxu1 %v1141_v58  ;;  %v1229_v35 = vpop.permute.xlu1 %1228  ;;  %v2917_v58 = vld [vmem:[%s4298_s7 + $0xc8] sm:$0xff]  }
 0x415   :  { %v1211_v2 = vsel %vm178_vm6, %v1199_v63, %v1201_v39 }
 0x416   :  { %1457 = vmatprep.subr.bf16.mxu0 %v1211_v2  ;;  %v2919_v2 = vld [vmem:[%s4298_s7 + $0x48] sm:$0xff]  }
 0x417   :  { %1596 = vmatpush1.bf16.msra.mxu1 %v1140_v3  ;;  %v2921_v3 = vld [vmem:[%s4298_s7 + $0xd0] sm:$0xff]  }
 0x418   :  { %v1203_v6 = vpop.permute.xlu0 %1202  ;;  %1597 = vmatprep.subr.bf16.mxu1 %v1173_v5  ;;  %v1169_v59 = vpop.permute.xlu1 %1168  ;;  %v2910_v5 = vld [vmem:[%s4296_s5 + $0x20] ss:$12 sps:$4 sm:$0xff]  }
 0x419   :  { %v1177_v11 = vsel %vm157_vm5, %v3879_v10, %v1169_v59  ;;  %v1212_v22 = vsel %vm178_vm6, %v1201_v39, %v1203_v6  ;;  %v2922_v59 = vld [vmem:[%s4298_s7 + $0x90] sm:$0xff]  }
 0x41b   :  { %1598 = vmatpush1.bf16.msra.mxu1 %v1172_v9  ;;  %v2923_v9 = vld [vmem:[%s4298_s7 + $0x50] sm:$0xff]  }
 0x41c   :  { %v1197_v12 = vpop.permute.xlu0 %1196  ;;  %1599 = vmatprep.subr.bf16.mxu1 %v1177_v11  ;;  %v1223_v0 = vpop.permute.xlu1 %1222  ;;  %v2925_v11 = vld [vmem:[%s4298_s7 + $0xd8] sm:$0xff]  }
 0x41d   :  { %v1210_v13 = vsel %vm178_vm6, %v1197_v12, %v1199_v63  ;;  %v1242_v1 = vsel %vm199_vm7, %v1223_v0, %v1225_v21  ;;  %v2916_v63 = vld [vmem:[%s4298_s7] sm:$0xff]   ;;  %v2924_v12 = vld [vmem:[%s4298_s7 + $0x10] sm:$0xff]   ;;  %v2926_v0 = vld [vmem:[%s4298_s7 + $0x98] sm:$0xff]  }
 0x41e   :  { %1458 = vmatpush1.bf16.msra.mxu0 %v1210_v13  ;;  %v2927_v13 = vld [vmem:[%s4298_s7 + $0x58] sm:$0xff]  }
 0x41f   :  { %1600 = vmatpush1.bf16.msra.mxu1 %v1176_v57  ;;  %v2929_v57 = vld [vmem:[%s4298_s7 + $0xe0] sm:$0xff]  }
 0x420   :  { %v1227_v16 = vpop.permute.xlu0 %1226  ;;  %1601 = vmatprep.subr.bf16.mxu1 %v1209_v15  ;;  %v1205_v7 = vpop.permute.xlu1 %1204  ;;  %v2911_v15 = vld [vmem:[%s4296_s5 + $0x38] ss:$12 sps:$4 sm:$0xff]  }
 0x421   :  { %v1243_v61 = vsel %vm199_vm7, %v1225_v21, %v1227_v16  ;;  %v1213_v19 = vsel %vm178_vm6, %v1203_v6, %v1205_v7  ;;  %v1244_v14 = vsel %vm199_vm7, %v1227_v16, %v1229_v35  ;;  %v2915_v21 = vld [vmem:[%s4298_s7 + $0x40] sm:$0xff]   ;;  %v2920_v6 = vld [vmem:[%s4298_s7 + $0x8] sm:$0xff]   ;;  %v2928_v16 = vld [vmem:[%s4298_s7 + $0x18] sm:$0xff]  }
 0x422   :  { %1459 = vmatprep.subr.bf16.mxu0 %v1243_v61  ;;  %v2930_v7 = vld [vmem:[%s4298_s7 + $0xa0] sm:$0xff]  }
 0x423   :  { %1460 = vmatpush1.bf16.msra.mxu0 %v1242_v1  ;;  %1602 = vmatpush1.bf16.msra.mxu1 %v1208_v17  ;;  %v2931_v61 = vld [vmem:[%s4298_s7 + $0x60] sm:$0xff]   ;;  %v2912_v17 = vld [vmem:[%s4296_s5 + $0x50] ss:$12 sps:$4 sm:$0xff]   ;;  %s2996_s5 = smov [#allocation2]  }
 0x424   :  { %v1231_v20 = vpop.permute.xlu0 %1230  ;;  %1603 = vmatprep.subr.bf16.mxu1 %v1213_v19  ;;  %v1237_v18 = vpop.permute.xlu1 %1236  ;;  %v2932_v1 = vld [vmem:[%s4298_s7 + $0x20] sm:$0xff]   ;;  %v2933_v19 = vld [vmem:[%s4298_s7 + $0xe8] sm:$0xff]   ;;  %s2542_s14 = sshll.u32 %s2996_s5, 4  ;;  %s2543_s14 = int_to_ptr.vmem [resolvable:$true] %s2542_s14 }
 0x425   :  { %v1245_v10 = vsel %vm199_vm7, %v1229_v35, %v1231_v20  ;;  %v2918_v35 = vld [vmem:[%s4298_s7 + $0x88] sm:$0xff]   ;;  %s2961_s26 = scalar_lea.vmem %s2543_s14, 32  ;;  %p2966_p1 = scmp.lt.s32.totalorder %s2543_s14, %s2543_s14 }
 0x426   :  { %v2934_v20 = vld [vmem:[%s4298_s7 + $0xa8] sm:$0xff]   ;;  %p2962_p0 = scmp.ne.s32.totalorder %s2543_s14, %s2961_s26  ;;  %p2967_p2 = scmp.lt.s32.totalorder %s2961_s26, %s2961_s26 }
 0x427   :  { %1604 = vmatpush1.bf16.msra.mxu1 %v1212_v22  ;;  %v2937_v22 = vld [vmem:[%s4298_s7 + $0xf0] sm:$0xff]  }
 0x428   :  { %v1235_v27 = vpop.permute.xlu0 %1234  ;;  %1605 = vmatprep.subr.bf16.mxu1 %v1245_v10  ;;  %v1241_v28 = vpop.permute.xlu1 %1240  ;;  %v2938_v10 = vld [vmem:[%s4298_s7 + $0xb0] sm:$0xff]   ;;  %p2968_p3 = por %p2967_p2, %p2966_p1 }
 0x429   :  { %v1247_v24 = vsel %vm199_vm7, %v1235_v27, %v1237_v18 }
 0x42a   :  { %1461 = vmatprep.subr.bf16.mxu0 %v1247_v24  ;;  %v2941_v24 = vld [vmem:[%s4298_s7 + $0xf8] sm:$0xff]   ;;  %p2969_p4 = pnand %p2968_p3, %p2962_p0 }
 0x42b   :  { %1606 = vmatpush1.bf16.msra.mxu1 %v1244_v14  ;;  %v2942_v14 = vld [vmem:[%s4298_s7 + $0xb8] sm:$0xff]  }
 0x42c   :  { %v1239_v31 = vpop.permute.xlu0 %1238  ;;  %v1261_v32 = vpop.permute.xlu1 %1260 }
 0x42d   :  { %v1248_v36 = vsel %vm199_vm7, %v1237_v18, %v1239_v31  ;;  %v1249_v29 = vsel %vm199_vm7, %v1239_v31, %v1241_v28  ;;  %v2936_v18 = vld [vmem:[%s4298_s7 + $0x28] sm:$0xff]   ;;  %v2940_v28 = vld [vmem:[%s4298_s7 + $0x30] sm:$0xff]   ;;  %v2943_v31 = vld [vmem:[%s4298_s7 + $0x78] sm:$0xff]  }
 0x42e   :  { %1607 = vmatprep.subr.bf16.mxu1 %v1249_v29 }
 0x42f   :  { %1608 = vmatpush1.bf16.msra.mxu1 %v1248_v36 }
 0x430   :  { %v1233_v41 = vpop.permute.xlu0 %1232  ;;  %v1265_v43 = vpop.permute.xlu1 %1264 }
 0x431   :  { %v1246_v37 = vsel %vm199_vm7, %v1233_v41, %v1235_v27  ;;  %v2939_v27 = vld [vmem:[%s4298_s7 + $0x70] sm:$0xff]  }
 0x432   :  { %1462 = vmatpush1.bf16.msra.mxu0 %v1246_v37  ;;  %1610 = vmatmul.mubr.bf16.vlgmr.msra.gmra.mrb[20].mxu1 %v2897_v26 }
 0x433   :  { %1619 = vmatprep.mubr.bf16.mxu1 %v2900_v40 }
 0x434   :  { %v1263_v30 = vpop.permute.xlu0 %1262  ;;  %v1259_v44 = vpop.permute.xlu1 %1258 }
 0x435   :  { %v1278_v45 = vsel %vm220_vm8, %v1259_v44, %v1261_v32  ;;  %1464 = vmatmul.mubr.bf16.vlgmr.msra.gmra.mrb[16].mxu0 %v2897_v26  ;;  %v1279_v46 = vsel %vm220_vm8, %v1261_v32, %v1263_v30  ;;  %v1280_v49 = vsel %vm220_vm8, %v1263_v30, %v1265_v43  ;;  %v2944_v32 = vld [vmem:[%s4298_s7 + $0x38] sm:$0xff]  }
 0x436   :  { %1504 = vmatprep.subr.bf16.mxu0 %v1279_v46  ;;  %1473 = vmatprep.mubr.bf16.mxu0 %v2900_v40 }
 0x437   :  { %1505 = vmatpush1.bf16.msra.mxu0 %v1278_v45 }
 0x438   :  { %v1267_v34 = vpop.permute.xlu0 %1266  ;;  %v1273_v25 = vpop.permute.xlu1 %1272 }
 0x439   :  { %v1281_v4 = vsel %vm220_vm8, %v1265_v43, %v1267_v34 }
 0x43a   :  { %1620 = vmatmul.mubr.bf16.gmra.mrb[24].mxu1 %v2902_v42  ;;  %1650 = vmatprep.subr.bf16.mxu1 %v1281_v4 }
 0x43b   :  { %1651 = vmatpush1.bf16.msra.mxu1 %v1280_v49  ;;  %1629 = vmatprep.mubr.bf16.mxu1 %v2903_v33 }
 0x43c   :  { %v1271_v39 = vpop.permute.xlu0 %1270  ;;  %v1277_v51 = vpop.permute.xlu1 %1276 }
 0x43d   :  { %1474 = vmatmul.mubr.bf16.gmra.mrb[20].mxu0 %v2902_v42  ;;  %v1283_v38 = vsel %vm220_vm8, %v1271_v39, %v1273_v25 }
 0x43e   :  { %1506 = vmatprep.subr.bf16.mxu0 %v1283_v38  ;;  %1483 = vmatprep.mubr.bf16.mxu0 %v2903_v33 }
 0x440   :  { %v1275_v52 = vpop.permute.xlu0 %1274 }
 0x441   :  { %v1284_v55 = vsel %vm220_vm8, %v1273_v25, %v1275_v52  ;;  %v1285_v23 = vsel %vm220_vm8, %v1275_v52, %v1277_v51 }
 0x442   :  { %1630 = vmatmul.mubr.bf16.gmra.mrb[28].mxu1 %v2905_v48  ;;  %1652 = vmatprep.subr.bf16.mxu1 %v1285_v23 }
 0x443   :  { %1653 = vmatpush1.bf16.msra.mxu1 %v1284_v55  ;;  %1639 = vmatprep.mubr.bf16.mxu1 %v2906_v50 }
 0x444   :  { %v1269_v47 = vpop.permute.xlu0 %1268  ;;  %2683 = vmatprep.subr.bf16.mxu1 %v2913_v53 }
 0x445   :  { %v1282_v54 = vsel %vm220_vm8, %v1269_v47, %v1271_v39  ;;  %1484 = vmatmul.mubr.bf16.gmra.mrb[24].mxu0 %v2905_v48 }
 0x446   :  { %1507 = vmatpush1.bf16.msra.mxu0 %v1282_v54  ;;  %1493 = vmatprep.mubr.bf16.mxu0 %v2906_v50 }
 0x447   :  { %2643 = vmatprep.subr.bf16.mxu0 %v2915_v21 }
 0x44a   :  { %1640 = vmatmul.mubr.bf16.gmra.mrb[32].mxu1 %v2908_v60 }
 0x44b   :  { %1682 = vmatprep.mubr.bf16.mxu1 %v2992_v8 }
 0x44d   :  { %1494 = vmatmul.mubr.bf16.gmra.mrb[28].mxu0 %v2908_v60  ;;  %v1321_v36 = vpop.permute.xlu1 %1320 }
 0x44e   :  { %1536 = vmatprep.mubr.bf16.mxu0 %v2992_v8 }
 0x451   :  { %v1331_v55 = vpop.permute.xlu1 %1330 }
 0x452   :  { %2590 = vmatmul.mubr.msk.bf16.vlgmr.msra.gmra.mrb[20].mxu1 %vm1418_vm0, %v2909_v62 }
 0x453   :  { %1692 = vmatprep.mubr.bf16.mxu1 %v2992_v8  ;;  %2684 = vmatpush3.bf16.msra.mxu1 %v2914_v56 }
 0x454   :  { %2685 = vmatprep.subr.bf16.mxu1 %v2917_v58 }
 0x455   :  { %2586 = vmatmul.mubr.msk.bf16.vlgmr.msra.gmra.mrb[16].mxu0 %vm1418_vm0, %v2909_v62  ;;  %v1326_v41 = vpop.permute.xlu0 %1325 }
 0x456   :  { %1546 = vmatprep.mubr.bf16.mxu0 %v2992_v8  ;;  %2644 = vmatpush3.bf16.msra.mxu0 %v2916_v63 }
 0x457   :  { %2686 = vmatpush3.bf16.msra.mxu1 %v2918_v35  ;;  %2645 = vmatprep.subr.bf16.mxu0 %v2919_v2 }
 0x458   :  { %2687 = vmatprep.subr.bf16.mxu1 %v2921_v3 }
 0x459   :  { %v1336_v63 = vpop.permute.xlu0 %1335 }
 0x45a   :  { %2591 = vmatmul.mubr.msk.bf16.gmra.mrb[24].mxu1 %vm1418_vm0, %v2910_v5  ;;  %2646 = vmatpush3.bf16.msra.mxu0 %v2920_v6 }
 0x45b   :  { %1702 = vmatprep.mubr.bf16.mxu1 %v2992_v8  ;;  %2688 = vmatpush3.bf16.msra.mxu1 %v2922_v59 }
 0x45c   :  { %2647 = vmatprep.subr.bf16.mxu0 %v2923_v9  ;;  %2689 = vmatprep.subr.bf16.mxu1 %v2925_v11 }
 0x45d   :  { %2587 = vmatmul.mubr.msk.bf16.gmra.mrb[20].mxu0 %vm1418_vm0, %v2910_v5 }
 0x45e   :  { %1556 = vmatprep.mubr.bf16.mxu0 %v2992_v8  ;;  %2648 = vmatpush3.bf16.msra.mxu0 %v2924_v12 }
 0x45f   :  { %2690 = vmatpush3.bf16.msra.mxu1 %v2926_v0  ;;  %2649 = vmatprep.subr.bf16.mxu0 %v2927_v13 }
 0x460   :  { %2691 = vmatprep.subr.bf16.mxu1 %v2929_v57 }
 0x462   :  { %2592 = vmatmul.mubr.msk.bf16.gmra.mrb[28].mxu1 %vm1418_vm0, %v2911_v15  ;;  %2650 = vmatpush3.bf16.msra.mxu0 %v2928_v16 }
 0x463   :  { %1712 = vmatprep.mubr.bf16.mxu1 %v2992_v8  ;;  %2692 = vmatpush3.bf16.msra.mxu1 %v2930_v7 }
 0x464   :  { %2651 = vmatprep.subr.bf16.mxu0 %v2931_v61  ;;  %2693 = vmatprep.subr.bf16.mxu1 %v2933_v19 }
 0x465   :  { %2588 = vmatmul.mubr.msk.bf16.gmra.mrb[24].mxu0 %vm1418_vm0, %v2911_v15 }
 0x466   :  { %1566 = vmatprep.mubr.bf16.mxu0 %v2992_v8  ;;  %2652 = vmatpush3.bf16.msra.mxu0 %v2932_v1  ;;  %v2935_v8 = vld [vmem:[%s4298_s7 + $0x68] sm:$0xff]   ;;  %s2994_s7 = smov 124  }
 0x467   :  { %2694 = vmatpush3.bf16.msra.mxu1 %v2934_v20  ;;  %2653 = vmatprep.subr.bf16.mxu0 %v2935_v8 }
 0x468   :  { %2695 = vmatprep.subr.bf16.mxu1 %v2937_v22 }
 0x46a   :  { %2593 = vmatmul.mubr.msk.bf16.gmra.mrb[32].mxu1 %vm1418_vm0, %v2912_v17  ;;  %2654 = vmatpush3.bf16.msra.mxu0 %v2936_v18 }
 0x46b   :  { %2696 = vmatpush3.bf16.msra.mxu1 %v2938_v10  ;;  %2655 = vmatprep.subr.bf16.mxu0 %v2939_v27  ;;  %v1341_v10 = vpop.permute.xlu1 %1340 }
 0x46c   :  { %2697 = vmatprep.subr.bf16.mxu1 %v2941_v24 }
 0x46d   :  { %2589 = vmatmul.mubr.msk.bf16.gmra.mrb[28].mxu0 %vm1418_vm0, %v2912_v17 }
 0x46e   :  { %2656 = vmatpush3.bf16.msra.mxu0 %v2940_v28 }
 0x46f   :  { %2698 = vmatpush3.bf16.msra.mxu1 %v2942_v14  ;;  %2657 = vmatprep.subr.bf16.mxu0 %v2943_v31 }
 0x472   :  { %2658 = vmatpush3.bf16.msra.mxu0 %v2944_v32 }
 0x525   :  { %v1684_v29 = vpop.f32.mrb[20].mxu1 }
 0x526   :  { %v2761_v26 = vadd.f32 %v1684_v29, %v1321_v36  ;;  %v1686_v40 = vpop.f32.mrb[21].mxu1 }
 0x527   :  { %v2762_v43 = vadd.f32 %v1686_v40, %v1321_v36  ;;  %v1688_v37 = vpop.f32.mrb[22].mxu1  ;;  %v1346_v40 = vpop.permute.xlu0 %1345 }
 0x528   :  { %v1757_v30 = vmul.f32 0.2, %v2761_v26  ;;  %v2763_v44 = vadd.f32 %v1688_v37, %v1326_v41  ;;  %v1538_v45 = vpop.f32.mrb[16].mxu0  ;;  %v1690_v46 = vpop.f32.mrb[23].mxu1  ;;  %vm1725_vm2 = vcmp.gt.f32.partialorder %v2761_v26, 0.0 }
 0x529   :  { %v1758_v42 = vmul.f32 0.2, %v2762_v43  ;;  %v2745_v33 = vadd.f32 %v1538_v45, %v1321_v36  ;;  %v2764_v34 = vadd.f32 %v1690_v46, %v1326_v41  ;;  %v1540_v4 = vpop.f32.mrb[17].mxu0  ;;  %vm1726_vm3 = vcmp.gt.f32.partialorder %v2762_v43, 0.0 }
 0x52a   :  { %vm1729_vm4 = vcmp.gt.f32.partialorder %v2763_v44, 0.0  ;;  %v1761_v49 = vmul.f32 0.2, %v2763_v44  ;;  %v1542_v25 = vpop.f32.mrb[18].mxu0  ;;  %v2746_v38 = vadd.f32 %v1540_v4, %v1321_v36  ;;  %v1789_v48 = vsel %vm1725_vm2, %v2761_v26, %v1757_v30 }
 0x52b   :  { %vm1730_vm5 = vcmp.gt.f32.partialorder %v2764_v34, 0.0  ;;  %v1762_v39 = vmul.f32 0.2, %v2764_v34  ;;  %v1755_v51 = vmul.f32 0.2, %v2745_v33  ;;  %v2747_v52 = vadd.f32 %v1542_v25, %v1326_v41  ;;  %v1544_v53 = vpop.f32.mrb[19].mxu0 }
 0x52c   :  { %v1793_v50 = vsel %vm1729_vm4, %v2763_v44, %v1761_v49  ;;  %vm1723_vm6 = vcmp.gt.f32.partialorder %v2745_v33, 0.0  ;;  %v2748_v21 = vadd.f32 %v1544_v53, %v1326_v41  ;;  %v1790_v54 = vsel %vm1726_vm3, %v2762_v43, %v1758_v42 }
 0x52d   :  { %v1821_v23 = vpack.c.bf16 %v1793_v50, %v1789_v48  ;;  %v1694_v47 = vpop.f32.mrb[24].mxu1  ;;  %vm1727_vm7 = vcmp.gt.f32.partialorder %v2747_v52, 0.0  ;;  %v1759_v60 = vmul.f32 0.2, %v2747_v52  ;;  %v1794_v58 = vsel %vm1730_vm5, %v2764_v34, %v1762_v39 }
 0x52e   :  { %v4127_v62 = vadd.f32 %v1694_v47, %v1331_v55  ;;  %v1696_v56 = vpop.f32.mrb[25].mxu1  ;;  %vm1724_vm8 = vcmp.gt.f32.partialorder %v2746_v38, 0.0  ;;  %v1756_v35 = vmul.f32 0.2, %v2746_v38  ;;  %v1822_v5 = vpack.c.bf16 %v1794_v58, %v1790_v54 }
 0x52f   :  { %v2766_v2 = vadd.f32 %v1696_v56, %v1331_v55  ;;  %v1698_v3 = vpop.f32.mrb[26].mxu1  ;;  %v1787_v6 = vsel %vm1723_vm6, %v2745_v33, %v1755_v51  ;;  %v1791_v59 = vsel %vm1727_vm7, %v2747_v52, %v1759_v60  ;;  %vm1728_vm11 = vcmp.gt.f32.partialorder %v2748_v21, 0.0 }
 0x530   :  { %v2767_v9 = vadd.f32 %v1698_v3, %v1336_v63  ;;  %v1548_v11 = vpop.f32.mrb[20].mxu0  ;;  %v1700_v12 = vpop.f32.mrb[27].mxu1  ;;  %v1819_v0 = vpack.c.bf16 %v1791_v59, %v1787_v6  ;;  %v1760_v13 = vmul.f32 0.2, %v2748_v21  ;;  %vm1733_vm12 = vcmp.gt.f32.partialorder %v4127_v62, 0.0  ;;  %2188 = vmatprep.mubr.bf16.mxu1 %v1822_v5 }
 0x531   :  { %v4131_v57 = vadd.f32 %v1548_v11, %v1331_v55  ;;  %v1550_v15 = vpop.f32.mrb[21].mxu0  ;;  %v1765_v16 = vmul.f32 0.2, %v4127_v62  ;;  %v1766_v7 = vmul.f32 0.2, %v2766_v2  ;;  %v2768_v61 = vadd.f32 %v1700_v12, %v1336_v63  ;;  %2189 = vmatmul.mubr.bf16.vlgmr.msra.gmra.mrb[36].mxu1 %v1821_v23  ;;  %v1356_v6 = vpop.permute.xlu0 %1355 }
 0x532   :  { %v2750_v17 = vadd.f32 %v1550_v15, %v1331_v55  ;;  %v1552_v1 = vpop.f32.mrb[22].mxu0  ;;  %vm1734_vm13 = vcmp.gt.f32.partialorder %v2766_v2, 0.0  ;;  %vm1737_vm14 = vcmp.gt.f32.partialorder %v2767_v9, 0.0  ;;  %v1769_v19 = vmul.f32 0.2, %v2767_v9 }
 0x533   :  { %v4134_v20 = vadd.f32 %v1552_v1, %v1336_v63  ;;  %v1554_v8 = vpop.f32.mrb[23].mxu0  ;;  %vm1731_vm15 = vcmp.gt.f32.partialorder %v4131_v57, 0.0  ;;  %v1763_v18 = vmul.f32 0.2, %v4131_v57  ;;  %vm1738_vm1 = vcmp.gt.f32.partialorder %v2768_v61, 0.0 }
 0x534   :  { %v1770_v22 = vmul.f32 0.2, %v2768_v61  ;;  %vm1732_vm9 = vcmp.gt.f32.partialorder %v2750_v17, 0.0  ;;  %v2752_v27 = vadd.f32 %v1554_v8, %v1336_v63  ;;  %v1788_v28 = vsel %vm1724_vm8, %v2746_v38, %v1756_v35  ;;  %v1351_v63 = vpop.permute.xlu1 %1350 }
 0x535   :  { %v1792_v24 = vsel %vm1728_vm11, %v2748_v21, %v1760_v13  ;;  %v1704_v14 = vpop.f32.mrb[28].mxu1  ;;  %v1798_v29 = vsel %vm1734_vm13, %v2766_v2, %v1766_v7  ;;  %v1764_v41 = vmul.f32 0.2, %v2750_v17  ;;  %v1767_v43 = vmul.f32 0.2, %v4134_v20 }
 0x536   :  { %v1820_v31 = vpack.c.bf16 %v1792_v24, %v1788_v28  ;;  %v4140_v32 = vadd.f32 %v1704_v14, %v1341_v10  ;;  %v1706_v36 = vpop.f32.mrb[29].mxu1  ;;  %v1802_v26 = vsel %vm1738_vm1, %v2768_v61, %v1770_v22  ;;  %vm1735_vm10 = vcmp.gt.f32.partialorder %v4134_v20, 0.0 }
 0x537   :  { %v2770_v37 = vadd.f32 %v1706_v36, %v1341_v10  ;;  %v1708_v30 = vpop.f32.mrb[30].mxu1  ;;  %v1826_v44 = vpack.c.bf16 %v1802_v26, %v1798_v29  ;;  %vm1736_vm0 = vcmp.gt.f32.partialorder %v2752_v27, 0.0  ;;  %v1768_v45 = vmul.f32 0.2, %v2752_v27 }
 0x538   :  { %2123 = vmatprep.mubr.bf16.mxu0 %v1820_v31  ;;  %v4145_v46 = vadd.f32 %v1708_v30, %v1346_v40  ;;  %v1558_v42 = vpop.f32.mrb[24].mxu0  ;;  %v1710_v33 = vpop.f32.mrb[31].mxu1  ;;  %vm1741_vm2 = vcmp.gt.f32.partialorder %v4140_v32, 0.0  ;;  %v4149_v34 = vmul.f32 0.2, %v4140_v32  ;;  %v1797_v39 = vsel %vm1733_vm12, %v4127_v62, %v1765_v16 }
 0x539   :  { %2124 = vmatmul.mubr.bf16.vlgmr.msra.gmra.mrb[32].mxu0 %v1819_v0  ;;  %v4151_v4 = vadd.f32 %v1558_v42, %v1341_v10  ;;  %v2772_v49 = vadd.f32 %v1710_v33, %v1346_v40  ;;  %2196 = vmatprep.mubr.bf16.mxu1 %v1826_v44  ;;  %v1560_v25 = vpop.f32.mrb[25].mxu0  ;;  %vm1742_vm3 = vcmp.gt.f32.partialorder %v2770_v37, 0.0  ;;  %v1774_v38 = vmul.f32 0.2, %v2770_v37 }
 0x53a   :  { %v2754_v48 = vadd.f32 %v1560_v25, %v1341_v10  ;;  %v1801_v50 = vsel %vm1737_vm14, %v2767_v9, %v1769_v19  ;;  %v1562_v51 = vpop.f32.mrb[26].mxu0  ;;  %vm1745_vm4 = vcmp.gt.f32.partialorder %v4145_v46, 0.0  ;;  %v1777_v52 = vmul.f32 0.2, %v4145_v46 }
 0x53b   :  { %v4160_v53 = vmul.f32 0.2, %v4151_v4  ;;  %vm1746_vm5 = vcmp.gt.f32.partialorder %v2772_v49, 0.0  ;;  %vm1739_vm6 = vcmp.gt.f32.partialorder %v4151_v4, 0.0  ;;  %v1778_v55 = vmul.f32 0.2, %v2772_v49 }
 0x53c   :  { %vm1740_vm7 = vcmp.gt.f32.partialorder %v2754_v48, 0.0  ;;  %v1825_v23 = vpack.c.bf16 %v1801_v50, %v1797_v39  ;;  %v2755_v21 = vadd.f32 %v1562_v51, %v1346_v40  ;;  %v1564_v47 = vpop.f32.mrb[27].mxu0  ;;  %v1772_v54 = vmul.f32 0.2, %v2754_v48 }
 0x53d   :  { %v2756_v60 = vadd.f32 %v1564_v47, %v1346_v40  ;;  %v1796_v62 = vsel %vm1732_vm9, %v2750_v17, %v1764_v41  ;;  %v1800_v56 = vsel %vm1736_vm0, %v2752_v27, %v1768_v45  ;;  %v1714_v58 = vpop.f32.mrb[32].mxu1  ;;  %v1795_v2 = vsel %vm1731_vm15, %v4131_v57, %v1763_v18 }
 0x53e   :  { %2197 = vmatmul.mubr.bf16.gmra.mrb[40].mxu1 %v1825_v23  ;;  %vm1743_vm8 = vcmp.gt.f32.partialorder %v2755_v21, 0.0  ;;  %v1824_v35 = vpack.c.bf16 %v1800_v56, %v1796_v62  ;;  %v1799_v3 = vsel %vm1735_vm10, %v4134_v20, %v1767_v43  ;;  %v1716_v5 = vpop.f32.mrb[33].mxu1  ;;  %v1775_v59 = vmul.f32 0.2, %v2755_v21 }
 0x53f   :  { %vm1744_vm11 = vcmp.gt.f32.partialorder %v2756_v60, 0.0  ;;  %v1823_v9 = vpack.c.bf16 %v1799_v3, %v1795_v2  ;;  %v2773_v11 = vadd.f32 %v1714_v58, %v1351_v63  ;;  %v1718_v12 = vpop.f32.mrb[34].mxu1  ;;  %v1776_v0 = vmul.f32 0.2, %v2756_v60 }
 0x540   :  { %2131 = vmatprep.mubr.bf16.mxu0 %v1824_v35  ;;  %v2774_v13 = vadd.f32 %v1716_v5, %v1351_v63  ;;  %v2775_v15 = vadd.f32 %v1718_v12, %v1356_v6  ;;  %v1568_v16 = vpop.f32.mrb[28].mxu0  ;;  %v1720_v7 = vpop.f32.mrb[35].mxu1  ;;  %v1806_v61 = vsel %vm1742_vm3, %v2770_v37, %v1774_v38  ;;  %v1810_v19 = vsel %vm1746_vm5, %v2772_v49, %v1778_v55 }
 0x541   :  { %2132 = vmatmul.mubr.bf16.gmra.mrb[36].mxu0 %v1823_v9  ;;  %v1781_v57 = vmul.f32 0.2, %v2773_v11  ;;  %v2757_v17 = vadd.f32 %v1568_v16, %v1351_v63  ;;  %v2776_v1 = vadd.f32 %v1720_v7, %v1356_v6  ;;  %v1570_v20 = vpop.f32.mrb[29].mxu0  ;;  %vm1749_vm12 = vcmp.gt.f32.partialorder %v2773_v11, 0.0 }
 0x542   :  { %vm1750_vm13 = vcmp.gt.f32.partialorder %v2774_v13, 0.0  ;;  %v1782_v8 = vmul.f32 0.2, %v2774_v13  ;;  %v1785_v18 = vmul.f32 0.2, %v2775_v15  ;;  %vm1753_vm14 = vcmp.gt.f32.partialorder %v2775_v15, 0.0 }
 0x543   :  { %vm1747_vm15 = vcmp.gt.f32.partialorder %v2757_v17, 0.0  ;;  %v1779_v22 = vmul.f32 0.2, %v2757_v17  ;;  %v1786_v10 = vmul.f32 0.2, %v2776_v1  ;;  %v1830_v27 = vpack.c.bf16 %v1810_v19, %v1806_v61  ;;  %v1572_v31 = vpop.f32.mrb[30].mxu0 }
 0x544   :  { %v2758_v28 = vadd.f32 %v1570_v20, %v1351_v63  ;;  %v1805_v24 = vsel %vm1741_vm2, %v4140_v32, %v4149_v34  ;;  %v1809_v14 = vsel %vm1745_vm4, %v4145_v46, %v1777_v52  ;;  %v2759_v29 = vadd.f32 %v1572_v31, %v1356_v6  ;;  %v1574_v26 = vpop.f32.mrb[31].mxu0 }
 0x545   :  { %v1829_v36 = vpack.c.bf16 %v1809_v14, %v1805_v24  ;;  %v1804_v40 = vsel %vm1740_vm7, %v2754_v48, %v1772_v54  ;;  %v1808_v41 = vsel %vm1744_vm11, %v2756_v60, %v1776_v0  ;;  %vm1754_vm1 = vcmp.gt.f32.partialorder %v2776_v1, 0.0  ;;  %2204 = vmatprep.mubr.bf16.mxu1 %v1830_v27 }
 0x546   :  { %v1780_v43 = vmul.f32 0.2, %v2758_v28  ;;  %v2760_v37 = vadd.f32 %v1574_v26, %v1356_v6  ;;  %v1828_v30 = vpack.c.bf16 %v1808_v41, %v1804_v40  ;;  %vm1748_vm9 = vcmp.gt.f32.partialorder %v2758_v28, 0.0 }
 0x547   :  { %2205 = vmatmul.mubr.bf16.gmra.mrb[44].mxu1 %v1829_v36  ;;  %v1783_v32 = vmul.f32 0.2, %v2759_v29  ;;  %v1803_v44 = vsel %vm1739_vm6, %v4151_v4, %v4160_v53  ;;  %v1807_v45 = vsel %vm1743_vm8, %v2755_v21, %v1775_v59  ;;  %vm1751_vm10 = vcmp.gt.f32.partialorder %v2759_v29, 0.0 }
 0x548   :  { %vm1752_vm0 = vcmp.gt.f32.partialorder %v2760_v37, 0.0  ;;  %v1784_v46 = vmul.f32 0.2, %v2760_v37  ;;  %2139 = vmatprep.mubr.bf16.mxu0 %v1828_v30  ;;  %v1827_v42 = vpack.c.bf16 %v1807_v45, %v1803_v44  ;;  %v1814_v33 = vsel %vm1750_vm13, %v2774_v13, %v1782_v8 }
 0x549   :  { %v1818_v34 = vsel %vm1754_vm1, %v2776_v1, %v1786_v10  ;;  %v1813_v49 = vsel %vm1749_vm12, %v2773_v11, %v1781_v57  ;;  %v1817_v25 = vsel %vm1753_vm14, %v2775_v15, %v1785_v18  ;;  %v1812_v4 = vsel %vm1748_vm9, %v2758_v28, %v1780_v43 }
 0x54a   :  { %2140 = vmatmul.mubr.bf16.gmra.mrb[40].mxu0 %v1827_v42  ;;  %v1834_v39 = vpack.c.bf16 %v1818_v34, %v1814_v33  ;;  %v1833_v38 = vpack.c.bf16 %v1817_v25, %v1813_v49  ;;  %v1816_v48 = vsel %vm1752_vm0, %v2760_v37, %v1784_v46  ;;  %v1811_v51 = vsel %vm1747_vm15, %v2757_v17, %v1779_v22 }
 0x54b   :  { %v1832_v50 = vpack.c.bf16 %v1816_v48, %v1812_v4  ;;  %v1815_v52 = vsel %vm1751_vm10, %v2759_v29, %v1783_v32 }
 0x54c   :  { %2212 = vmatprep.mubr.bf16.mxu1 %v1834_v39  ;;  %v1831_v53 = vpack.c.bf16 %v1815_v52, %v1811_v51 }
 0x54d   :  { %2147 = vmatprep.mubr.bf16.mxu0 %v1832_v50 }
 0x54f   :  { %2213 = vmatmul.mubr.bf16.gmra.mrb[48].mxu1 %v1833_v38 }
 0x552   :  { %2148 = vmatmul.mubr.bf16.gmra.mrb[44].mxu0 %v1831_v53 }
 0x604   :  { %v2699_v55 = vpop.f32.mrb[36].mxu1 }
 0x605   :  { %v2700_v23 = vpop.f32.mrb[37].mxu1 }
 0x606   :  { %v2701_v21 = vadd.f32 %v2700_v23, %v2699_v55  ;;  %v2702_v47 = vpop.f32.mrb[38].mxu1 }
 0x607   :  { %v2703_v54 = vpop.f32.mrb[39].mxu1 }
 0x608   :  { %v2704_v60 = vadd.f32 %v2703_v54, %v2702_v47 }
 0x60c   :  { %v2659_v62 = vpop.f32.mrb[32].mxu0 }
 0x60d   :  { %v2660_v56 = vpop.f32.mrb[33].mxu0 }
 0x60e   :  { %v2661_v58 = vadd.f32 %v2660_v56, %v2659_v62  ;;  %v2662_v63 = vpop.f32.mrb[34].mxu0 }
 0x60f   :  { %v2663_v35 = vpop.f32.mrb[35].mxu0 }
 0x610   :  { %v2191_v2 = vadd.f32 %v2701_v21, %v2661_v58  ;;  %v2664_v3 = vadd.f32 %v2663_v35, %v2662_v63  ;;  %v2945_v58 = vld [vmem:[%s4299_s8 + $0x40] sm:$0xff]   ;;  %v2947_v35 = vld [vmem:[%s4299_s8 + $0x48] sm:$0xff]  }
 0x611   :  { %v2705_v5 = vpop.f32.mrb[40].mxu1  ;;  %v2946_v63 = vld [vmem:[%s4299_s8] sm:$0xff]   ;;  %2723 = vmatprep.subr.bf16.mxu0 %v2945_v58 }
 0x612   :  { %v2194_v6 = vadd.f32 %v2704_v60, %v2664_v3  ;;  %v2706_v59 = vpop.f32.mrb[41].mxu1  ;;  %v4194_v12 = vmul.f32 0.04, %v2191_v2  ;;  %2724 = vmatpush3.bf16.msra.mxu0 %v2946_v63  ;;  %v2948_v2 = vld [vmem:[%s4299_s8 + $0x8] sm:$0xff]   ;;  %v2949_v3 = vld [vmem:[%s4299_s8 + $0x50] sm:$0xff]  }
 0x613   :  { %v2707_v9 = vadd.f32 %v2706_v59, %v2705_v5  ;;  %v2708_v11 = vpop.f32.mrb[42].mxu1  ;;  %2725 = vmatprep.subr.bf16.mxu0 %v2947_v35  ;;  %v2950_v5 = vld [vmem:[%s4299_s8 + $0x10] sm:$0xff]   ;;  %v2952_v59 = vld [vmem:[%s4299_s8 + $0x18] sm:$0xff]  }
 0x614   :  { %v4196_v0 = vmul.f32 0.04, %v2194_v6  ;;  %v2665_v13 = vpop.f32.mrb[36].mxu0  ;;  %v2709_v15 = vpop.f32.mrb[43].mxu1  ;;  %v2951_v6 = vld [vmem:[%s4299_s8 + $0x58] sm:$0xff]  }
 0x615   :  { %v2710_v16 = vadd.f32 %v2709_v15, %v2708_v11  ;;  %v2666_v7 = vpop.f32.mrb[37].mxu0  ;;  %v2954_v11 = vld [vmem:[%s4299_s8 + $0x20] sm:$0xff]   ;;  %v2956_v15 = vld [vmem:[%s4299_s8 + $0x28] sm:$0xff]  }
 0x616   :  { %v2667_v61 = vadd.f32 %v2666_v7, %v2665_v13  ;;  %v2668_v57 = vpop.f32.mrb[38].mxu0  ;;  %v2833_v17 = vpack.i.bf16 %v4196_v0, %v4194_v12  ;;  %v2309_v19 = vpack.c.bf16 %v4196_v0, %v4194_v12  ;;  %2726 = vmatpush3.bf16.msra.mxu0 %v2948_v2  ;;  %v2955_v13 = vld [vmem:[%s4299_s8 + $0x68] sm:$0xff]   ;;  %v2958_v7 = vld [vmem:[%s4299_s8 + $0x30] sm:$0xff]   ;;  %v2626_v2 = vld [vmem:[%s4300_s9] ss:$0 sm:$0xff] }
 0x617   :  { %v2669_v1 = vpop.f32.mrb[39].mxu0  ;;  %2727 = vmatprep.subr.bf16.mxu0 %v2949_v3 }
 0x618   :  { %v2199_v20 = vadd.f32 %v2707_v9, %v2667_v61  ;;  %v2670_v8 = vadd.f32 %v2669_v1, %v2668_v57  ;;  %2834 = vrot.lane.b32.xlu0 %v2833_v17, %s2986_s20  ;;  %2824 = vrot.lane.b32.xlu1 %v2833_v17, %s2994_s7  ;;  %v2953_v9 = vld [vmem:[%s4299_s8 + $0x60] sm:$0xff]   ;;  %v2959_v61 = vld [vmem:[%s4299_s8 + $0x78] sm:$0xff]  }
 0x619   :  { %v2960_v57 = vld [vmem:[%s4299_s8 + $0x38] sm:$0xff]  }
 0x61a   :  { %v2202_v18 = vadd.f32 %v2710_v16, %v2670_v8  ;;  %v2711_v22 = vpop.f32.mrb[44].mxu1  ;;  %v4204_v27 = vmul.f32 0.04, %v2199_v20  ;;  %2728 = vmatpush3.bf16.msra.mxu0 %v2950_v5  ;;  %v2957_v16 = vld [vmem:[%s4299_s8 + $0x70] sm:$0xff]  }
 0x61b   :  { %v2712_v10 = vpop.f32.mrb[45].mxu1  ;;  %2729 = vmatprep.subr.bf16.mxu0 %v2951_v6 }
 0x61c   :  { %v4206_v28 = vmul.f32 0.04, %v2202_v18  ;;  %v2713_v24 = vadd.f32 %v2712_v10, %v2711_v22  ;;  %v2714_v14 = vpop.f32.mrb[46].mxu1  ;;  %2829 = vrot.lane.b32.xlu1 %v2833_v17, %s2995_s22 }
 0x61d   :  { %v2671_v31 = vpop.f32.mrb[40].mxu0  ;;  %v2715_v36 = vpop.f32.mrb[47].mxu1 }
 0x61e   :  { %v2716_v29 = vadd.f32 %v2715_v36, %v2714_v14  ;;  %v2672_v26 = vpop.f32.mrb[41].mxu0  ;;  %v2838_v40 = vpack.i.bf16 %v4206_v28, %v4204_v27  ;;  %v2310_v37 = vpack.c.bf16 %v4206_v28, %v4204_v27  ;;  %2730 = vmatpush3.bf16.msra.mxu0 %v2952_v59 }
 0x61f   :  { %v2673_v41 = vadd.f32 %v2672_v26, %v2671_v31  ;;  %v2674_v43 = vpop.f32.mrb[42].mxu0  ;;  %2731 = vmatprep.subr.bf16.mxu0 %v2953_v9 }
 0x620   :  { %v2675_v30 = vpop.f32.mrb[43].mxu0  ;;  %2839 = vrot.lane.b32.xlu0 %v2838_v40, %s2994_s7  ;;  %2844 = vrot.lane.b32.xlu1 %v2838_v40, %s2995_s22 }
 0x621   :  { %v2207_v32 = vadd.f32 %v2713_v24, %v2673_v41  ;;  %v2676_v44 = vadd.f32 %v2675_v30, %v2674_v43 }
 0x622   :  { %v2717_v45 = vpop.f32.mrb[48].mxu1  ;;  %2732 = vmatpush3.bf16.msra.mxu0 %v2954_v11 }
 0x623   :  { %v2210_v46 = vadd.f32 %v2716_v29, %v2676_v44  ;;  %v2718_v42 = vpop.f32.mrb[49].mxu1  ;;  %v2225_v49 = vmul.f32 0.04, %v2207_v32  ;;  %2733 = vmatprep.subr.bf16.mxu0 %v2955_v13 }
 0x624   :  { %v2719_v33 = vadd.f32 %v2718_v42, %v2717_v45  ;;  %v2720_v34 = vpop.f32.mrb[50].mxu1 }
 0x625   :  { %v2226_v25 = vmul.f32 0.04, %v2210_v46  ;;  %v2677_v39 = vpop.f32.mrb[44].mxu0  ;;  %v2721_v38 = vpop.f32.mrb[51].mxu1 }
 0x626   :  { %v2722_v4 = vadd.f32 %v2721_v38, %v2720_v34  ;;  %v2678_v48 = vpop.f32.mrb[45].mxu0  ;;  %2734 = vmatpush3.bf16.msra.mxu0 %v2956_v15 }
 0x627   :  { %v2679_v50 = vadd.f32 %v2678_v48, %v2677_v39  ;;  %v2680_v51 = vpop.f32.mrb[46].mxu0  ;;  %v2848_v52 = vpack.i.bf16 %v2226_v25, %v2225_v49  ;;  %v2311_v55 = vpack.c.bf16 %v2226_v25, %v2225_v49  ;;  %2735 = vmatprep.subr.bf16.mxu0 %v2957_v16 }
 0x628   :  { %v2681_v53 = vpop.f32.mrb[47].mxu0 }
 0x629   :  { %v2215_v23 = vadd.f32 %v2719_v33, %v2679_v50  ;;  %v2682_v21 = vadd.f32 %v2681_v53, %v2680_v51  ;;  %2849 = vrot.lane.b32.xlu1 %v2848_v52, %s2994_s7 }
 0x62a   :  { %2736 = vmatpush3.bf16.msra.mxu0 %v2958_v7 }
 0x62b   :  { %v2218_v47 = vadd.f32 %v2722_v4, %v2682_v21  ;;  %v2227_v54 = vmul.f32 0.04, %v2215_v23  ;;  %2737 = vmatprep.subr.bf16.mxu0 %v2959_v61 }
 0x62d   :  { %v2228_v60 = vmul.f32 0.04, %v2218_v47  ;;  %2864 = vrot.lane.b32.xlu1 %v2848_v52, %s2995_s22 }
 0x62e   :  { %2738 = vmatpush3.bf16.msra.mxu0 %v2960_v57 }
 0x62f   :  { %v2853_v62 = vpack.i.bf16 %v2228_v60, %v2227_v54  ;;  %v2312_v56 = vpack.c.bf16 %v2228_v60, %v2227_v54 }
 0x631   :  { %2854 = vrot.lane.b32.xlu0 %v2853_v62, %s2994_s7  ;;  %2874 = vrot.lane.b32.xlu1 %v2853_v62, %s2995_s22 }
 0x635   :  { %2859 = vrot.lane.b32.xlu0 %v2838_v40, %s2986_s20 }
 0x639   :  { %2869 = vrot.lane.b32.xlu0 %v2848_v52, %s2986_s20 }
 0x63d   :  { %2879 = vrot.lane.b32.xlu0 %v2853_v62, %s2986_s20 }
 0x65b   :  { %2364 = vxpose.xlu0.c.b16.start [1/8] (narrow) %v2309_v19, 16 }
 0x65f   :  { %2365 = vxpose.xlu0.c.b16.cont [2/8] (narrow) %v2310_v37, 16 }
 0x663   :  { %2366 = vxpose.xlu0.c.b16.cont [3/8] (narrow) %v2311_v55, 16 }
 0x667   :  { %2367 = vxpose.xlu0.c.b16.cont [4/8] (narrow) %v2312_v56, 16 }
 0x68a   :  { %v2835_v17 = vpop.permute.xlu0 %2834  ;;  %v2825_v1 = vpop.permute.xlu1 %2824 }
 0x68b   :  { %v2837_v20 = vunpack.i.h.bf16 %v2835_v17  ;;  %v2836_v8 = vunpack.i.l.bf16 %v2835_v17  ;;  %v2827_v18 = vunpack.i.h.bf16 %v2825_v1  ;;  %v2826_v22 = vunpack.i.l.bf16 %v2825_v1 }
 0x68d   :  { %v2313_v10 = vpack.c.bf16 %v2837_v20, %v2836_v8  ;;  %v2317_v24 = vpack.c.bf16 %v2827_v18, %v2826_v22 }
 0x68e   :  { %v2830_v14 = vpop.permute.xlu1 %2829 }
 0x68f   :  { %2380 = vxpose.xlu1.c.b16.start [1/8] (narrow) %v2317_v24, 16  ;;  %2368 = vxpose.xlu0.c.b16.cont [5/8] (narrow) %v2313_v10, 16  ;;  %v2832_v37 = vunpack.i.h.bf16 %v2830_v14  ;;  %v2831_v30 = vunpack.i.l.bf16 %v2830_v14 }
 0x691   :  { %v2321_v33 = vpack.c.bf16 %v2832_v37, %v2831_v30 }
 0x692   :  { %v2840_v31 = vpop.permute.xlu0 %2839  ;;  %v2845_v36 = vpop.permute.xlu1 %2844 }
 0x693   :  { %v2842_v12 = vunpack.i.h.bf16 %v2840_v31  ;;  %v2841_v0 = vunpack.i.l.bf16 %v2840_v31  ;;  %v2847_v34 = vunpack.i.h.bf16 %v2845_v36  ;;  %v2846_v49 = vunpack.i.l.bf16 %v2845_v36 }
 0x695   :  { %v2318_v19 = vpack.c.bf16 %v2842_v12, %v2841_v0  ;;  %v2322_v48 = vpack.c.bf16 %v2847_v34, %v2846_v49 }
 0x697   :  { %2381 = vxpose.xlu1.c.b16.cont [2/8] (narrow) %v2318_v19, 16 }
 0x69b   :  { %v2850_v27 = vpop.permute.xlu1 %2849 }
 0x69c   :  { %v2852_v28 = vunpack.i.h.bf16 %v2850_v27  ;;  %v2851_v29 = vunpack.i.l.bf16 %v2850_v27 }
 0x69e   :  { %v2319_v26 = vpack.c.bf16 %v2852_v28, %v2851_v29 }
 0x69f   :  { %v2865_v42 = vpop.permute.xlu1 %2864 }
 0x6a0   :  { %2382 = vxpose.xlu1.c.b16.cont [3/8] (narrow) %v2319_v26, 16  ;;  %v2867_v50 = vunpack.i.h.bf16 %v2865_v42  ;;  %v2866_v51 = vunpack.i.l.bf16 %v2865_v42 }
 0x6a2   :  { %v2323_v47 = vpack.c.bf16 %v2867_v50, %v2866_v51 }
 0x6a3   :  { %v2855_v40 = vpop.permute.xlu0 %2854  ;;  %v2875_v53 = vpop.permute.xlu1 %2874 }
 0x6a4   :  { %v2857_v41 = vunpack.i.h.bf16 %v2855_v40  ;;  %v2856_v43 = vunpack.i.l.bf16 %v2855_v40  ;;  %v2877_v54 = vunpack.i.h.bf16 %v2875_v53  ;;  %v2876_v60 = vunpack.i.l.bf16 %v2875_v53 }
 0x6a6   :  { %v2320_v32 = vpack.c.bf16 %v2857_v41, %v2856_v43  ;;  %v2324_v56 = vpack.c.bf16 %v2877_v54, %v2876_v60 }
 0x6a7   :  { %v2860_v44 = vpop.permute.xlu0 %2859 }
 0x6a8   :  { %v2862_v45 = vunpack.i.h.bf16 %v2860_v44  ;;  %v2861_v46 = vunpack.i.l.bf16 %v2860_v44  ;;  %2383 = vxpose.xlu1.c.b16.cont [4/8] (narrow) %v2320_v32, 16 }
 0x6aa   :  { %v2314_v25 = vpack.c.bf16 %v2862_v45, %v2861_v46 }
 0x6ab   :  { %v2870_v39 = vpop.permute.xlu0 %2869 }
 0x6ac   :  { %v2872_v38 = vunpack.i.h.bf16 %v2870_v39  ;;  %v2871_v4 = vunpack.i.l.bf16 %v2870_v39  ;;  %2384 = vxpose.xlu1.c.b16.cont [5/8] (narrow) %v2321_v33, 16  ;;  %2369 = vxpose.xlu0.c.b16.cont [6/8] (narrow) %v2314_v25, 16 }
 0x6ae   :  { %v2315_v52 = vpack.c.bf16 %v2872_v38, %v2871_v4 }
 0x6af   :  { %v2880_v55 = vpop.permute.xlu0 %2879 }
 0x6b0   :  { %v2882_v23 = vunpack.i.h.bf16 %v2880_v55  ;;  %v2881_v21 = vunpack.i.l.bf16 %v2880_v55  ;;  %2385 = vxpose.xlu1.c.b16.cont [6/8] (narrow) %v2322_v48, 16  ;;  %2370 = vxpose.xlu0.c.b16.cont [7/8] (narrow) %v2315_v52, 16 }
 0x6b2   :  { %v2316_v62 = vpack.c.bf16 %v2882_v23, %v2881_v21 }
 0x6b4   :  { %2386 = vxpose.xlu1.c.b16.cont [7/8] (narrow) %v2323_v47, 16  ;;  %2371 = vxpose.xlu0.c.b16.end [8/8] (narrow) %v2316_v62, 16 }
 0x6b8   :  { %2387 = vxpose.xlu1.c.b16.end [8/8] (narrow) %v2324_v56, 16 }
 0x6fe   :  { %v2372_v58 = vpop.trf.xlu0 }
 0x702   :  { %v2388_v63 = vpop.trf.xlu1 }
 0x703   :  { %2524 = vmatprep.mubr.bf16.mxu0 %v2388_v63 }
 0x704   :  { %2525 = vmatmul.mubr.bf16.vlgmr.msra.gmra.mrb[48].mxu0 %v2372_v58 }
 0x7d7   :  { %v2739_v35 = vpop.f32.mrb[48].mxu0 }
 0x7d8   :  { %v2740_v3 = vpop.f32.mrb[49].mxu0 }
 0x7d9   :  { %v2741_v5 = vadd.f32 %v2740_v3, %v2739_v35  ;;  %v2742_v6 = vpop.f32.mrb[50].mxu0 }
 0x7da   :  { %v2743_v59 = vpop.f32.mrb[51].mxu0 }
 0x7db   :  { %v2527_v9 = vadd.f32 %v2741_v5, %v2626_v2 }
 0x7dd   :  { %vm2532_vm2 = vcmp.gt.f32.partialorder %v2527_v9, 0.0  ;;  %v2533_v11 = vmul.f32 0.2, %v2527_v9 }
 0x7df   :  { %v2534_v13 = vsel %vm2532_vm2, %v2527_v9, %v2533_v11 }
 0x7e0   :  { %2535 = vst [vmem:[#allocation2] sm:$0x3] %v2534_v13 }
 0x7e1   :  { %2972 = shalt.err (!%p2969_p4)
}
 0x7e2   :  { %s2973_s16 = scalar_lea.hbm %s4301_s10, 32 }
 0x7e3   :  { %p2974_p5 = scmp.ne.s32.totalorder %s4301_s10, %s2973_s16  ;;  %p2977_p6 = scmp.lt.u32.totalorder %s2973_s16, %s4301_s10 }
 0x7e5   :  { %p2979_p7 = pnand %p2977_p6, %p2974_p5 }
 0x7e7   :  { %2982 = shalt.err (!%p2979_p7)
}
 0x7e8   :  { %2545 = dma.vmem_to_hbm [thread:$0]  %s2543_s14, 32, %s4301_s10, [#allocation3]  }
 0x7e9   :  { %2983 = dma.done.wait [#allocation3], 32  }
 0x7ea   :  { %2984 = vsyncadd [#allocation3], 4294967264 }
 0x7eb   :  { %2549 = vsyncpa [#allocation3], 1 }

</bundles_post_ra>
